<compile_context>
chip_gen: v7x
topology: tpu7x:2x2x1
jax: 0.10.0
libtpu: 0.0.40
codegen_flags: <defaults>
</compile_context>

<pallas_src>
import functools

import jax
import jax.numpy as jnp
from jax.experimental import pallas as pl
from jax.experimental.pallas import tpu as pltpu

EPS = 1e-5      # torch.nn.InstanceNorm2d default eps
SLOPE = 0.2     # LeakyReLU negative slope


def _round_up(x, m):
    return ((x + m - 1) // m) * m


def _pad_axis(x, axis, target):
    pad = target - x.shape[axis]
    if pad <= 0:
        return x
    widths = [(0, 0)] * x.ndim
    widths[axis] = (0, pad)
    return jnp.pad(x, widths)


# ---------------------------------------------------------------------------
# Pallas kernels
# ---------------------------------------------------------------------------
def _matmul_bias_kernel(p_ref, w_ref, b_ref, o_ref, acc_ref, *, apply_act):
    # p_ref: (tm, tk) bf16 patches, w_ref: (tk, tn) bf16, b_ref: (1, tn) f32
    @pl.when(pl.program_id(2) == 0)
    def _init():
        acc_ref[...] = jnp.zeros_like(acc_ref)

    acc_ref[...] += jnp.dot(p_ref[...], w_ref[...],
                            preferred_element_type=jnp.float32)

    @pl.when(pl.program_id(2) == pl.num_programs(2) - 1)
    def _finalize():
        y = acc_ref[...] + b_ref[...]
        if apply_act:                       # fused LeakyReLU (normalize=False block)
            y = jnp.where(y >= 0, y, SLOPE * y)
        o_ref[...] = y.astype(o_ref.dtype)


def pallas_matmul_bias(patches, w_mat, bias, apply_act, out_dtype):
    M, K = patches.shape
    K2, N = w_mat.shape
    assert K == K2, (K, K2)

    # Tile sizes: K/N tiles are 128-multiples (MXU friendly on v5e/v6e/v7x),
    # M padded to a tile multiple so every block is dense.
    tk = next((t for t in (512, 256, 128) if K % t == 0), K)
    tn = next((t for t in (256, 128) if N % t == 0), N)
    tm = next((t for t in (512, 256, 128) if M % t == 0), None)
    if tm is None:
        tm = 256 if M > 256 else _round_up(M, 8)
    Mp = _round_up(M, tm)
    patches = _pad_axis(patches, 0, Mp)

    kernel = functools.partial(_matmul_bias_kernel, apply_act=apply_act)
    out = pl.pallas_call(
        kernel,
        out_shape=jax.ShapeDtypeStruct((Mp, N), out_dtype),
        grid=(Mp // tm, N // tn, K // tk),
        in_specs=[
            pl.BlockSpec((tm, tk), lambda i, j, k: (i, k)),
            pl.BlockSpec((tk, tn), lambda i, j, k: (k, j)),
            pl.BlockSpec((1, tn), lambda i, j, k: (0, j)),
        ],
        out_specs=pl.BlockSpec((tm, tn), lambda i, j, k: (i, j)),
        scratch_shapes=[pltpu.VMEM((tm, tn), jnp.float32)],
        compiler_params=pltpu.CompilerParams(
            dimension_semantics=("parallel", "parallel", "arbitrary")),
    )(patches, w_mat, bias)
    return out[:M]


def _norm_act_kernel(x_ref, o_ref):
    # x_ref: (1, H*W, tc) f32.  InstanceNorm over the spatial axis per (sample,
    # channel) with single-pass mean / E[x^2], then LeakyReLU(0.2); output bf16.
    x = x_ref[...]
    mean = jnp.mean(x, axis=1, keepdims=True)
    mean_sq = jnp.mean(x * x, axis=1, keepdims=True)
    var = mean_sq - mean * mean               # biased variance (torch default)
    y = (x - mean) * jax.lax.rsqrt(var + EPS)
    y = jnp.where(y >= 0, y, SLOPE * y)
    o_ref[...] = y.astype(o_ref.dtype)


def pallas_norm_act(x_nhwc, out_dtype=jnp.bfloat16):
    N, H, W, C = x_nhwc.shape
    HW = H * W
    x3 = x_nhwc.reshape(N, HW, C)
    tc = 128 if C % 128 == 0 else C
    y = pl.pallas_call(
        _norm_act_kernel,
        out_shape=jax.ShapeDtypeStruct((N, HW, C), out_dtype),
        grid=(N, C // tc),
        in_specs=[pl.BlockSpec((1, HW, tc), lambda n, c: (n, 0, c))],
        out_specs=pl.BlockSpec((1, HW, tc), lambda n, c: (n, 0, c)),
        compiler_params=pltpu.CompilerParams(
            dimension_semantics=("parallel", "parallel")),
    )(x3)
    return y.reshape(N, H, W, C)


# ---------------------------------------------------------------------------
# Conv2d = im2col (XLA glue, bf16) + Pallas tiled matmul
# ---------------------------------------------------------------------------
# TODO(synk): im2col still materializes the 4x-expanded patch tensor in HBM;
# in-kernel patch assembly via overlapping BlockSpec windows would remove it.
def _im2col_nhwc(x, k, stride, pad):
    # pad = (top, bottom, left, right); padding happens in bf16 (half the bytes)
    pt, pb, pleft, pright = pad
    N, H, W, C = x.shape
    xp = jnp.pad(x.astype(jnp.bfloat16),
                 ((0, 0), (pt, pb), (pleft, pright), (0, 0)))
    Ho = (H + pt + pb - k) // stride + 1
    Wo = (W + pleft + pright - k) // stride + 1
    cols = []
    for i in range(k):
        for j in range(k):
            cols.append(xp[:, i:i + stride * Ho:stride, j:j + stride * Wo:stride, :])
    # patch K-axis ordering is (kh, kw, cin)
    p = jnp.stack(cols, axis=3)                 # (N, Ho, Wo, k*k, C)
    p = p.reshape(N * Ho * Wo, k * k * C)
    return p, Ho, Wo


def conv2d_nhwc(x, w_mat, bias, *, cout, stride, pad, apply_act, out_dtype):
    n = x.shape[0]
    patches, Ho, Wo = _im2col_nhwc(x, 4, stride, pad)
    patches = _pad_axis(patches, 1, w_mat.shape[0])     # match padded K
    out = pallas_matmul_bias(patches, w_mat, bias, apply_act, out_dtype)
    return out[:, :cout].reshape(n, Ho, Wo, cout)


# ---------------------------------------------------------------------------
# Parameter preparation (done ONCE, outside the forward)
# ---------------------------------------------------------------------------
def prepare_params(params):
    """(Cout,Cin,4,4) OIHW weights -> (K_padded, Cout_padded) bf16 matmul
    weights matching the (kh,kw,cin) im2col ordering; biases -> (1, Cout_padded)
    f32 rows.  K and Cout are padded to multiples of 128 (lane-dense MXU/VPU)."""
    prepared = {}
    for idx in range(1, 6):
        w = params[f"w{idx}"]                          # (Cout, Cin, kh, kw)
        b = params[f"b{idx}"]                          # (Cout,)
        cout, cin, kh, kw = w.shape
        w_mat = jnp.transpose(w, (2, 3, 1, 0)).reshape(kh * kw * cin, cout)
        kp = _round_up(kh * kw * cin, 128)
        ncols = _round_up(cout, 128)
        w_mat = _pad_axis(_pad_axis(w_mat, 0, kp), 1, ncols).astype(jnp.bfloat16)
        b_row = _pad_axis(b.reshape(1, cout), 1, ncols).astype(jnp.float32)
        prepared[f"w{idx}"] = w_mat
        prepared[f"b{idx}"] = b_row
    return prepared


# ---------------------------------------------------------------------------
# Discriminator forward (matches the PyTorch module)
# ---------------------------------------------------------------------------
def discriminator_forward(img_nchw, p):
    x = jnp.transpose(img_nchw, (0, 2, 3, 1))              # NCHW -> NHWC
    sym1 = (1, 1, 1, 1)
    # DiscriminatorBlock(C, 64, normalize=False): bias+LeakyReLU fused, bf16 out
    x = conv2d_nhwc(x, p["w1"], p["b1"], cout=64, stride=2, pad=sym1,
                    apply_act=True, out_dtype=jnp.bfloat16)
    # DiscriminatorBlock(64, 128)
    x = conv2d_nhwc(x, p["w2"], p["b2"], cout=128, stride=2, pad=sym1,
                    apply_act=False, out_dtype=jnp.float32)
    x = pallas_norm_act(x)                                  # bf16 out
    # DiscriminatorBlock(128, 256)
    x = conv2d_nhwc(x, p["w3"], p["b3"], cout=256, stride=2, pad=sym1,
                    apply_act=False, out_dtype=jnp.float32)
    x = pallas_norm_act(x)
    # DiscriminatorBlock(256, 512)
    x = conv2d_nhwc(x, p["w4"], p["b4"], cout=512, stride=2, pad=sym1,
                    apply_act=False, out_dtype=jnp.float32)
    x = pallas_norm_act(x)
    # nn.ZeroPad2d((1, 0, 1, 0)) fused with Conv2d(512, 1, 4, padding=1):
    # total pad top=2, bottom=1, left=2, right=1.  Cout padded to 128 lanes.
    x = conv2d_nhwc(x, p["w5"], p["b5"], cout=1, stride=1, pad=(2, 1, 2, 1),
                    apply_act=False, out_dtype=jnp.float32)
    return jnp.transpose(x, (0, 3, 1, 2))                   # NHWC -> NCHW


# ---------------------------------------------------------------------------
# Deterministic parameter init (weights ~ N(0, 0.02), per weights_init_normal)
# ---------------------------------------------------------------------------
def init_params(key, channels):
    shapes = [
        (64, channels, 4, 4),
        (128, 64, 4, 4),
        (256, 128, 4, 4),
        (512, 256, 4, 4),
        (1, 512, 4, 4),
    ]
    keys = jax.random.split(key, 2 * len(shapes))
    params = {}
    for idx, s in enumerate(shapes):
        params[f"w{idx + 1}"] = 0.02 * jax.random.normal(keys[2 * idx], s, jnp.float32)
        params[f"b{idx + 1}"] = 0.02 * jax.random.normal(
            keys[2 * idx + 1], (s[0],), jnp.float32
        )
    return params


# ---------------------------------------------------------------------------
# Pure-JAX reference (bf16 conv inputs, f32 accumulation — matches the kernel)
# ---------------------------------------------------------------------------
def ref_forward(img, params):
    def conv(x, w, b, stride, pad):
        y = jax.lax.conv_general_dilated(
            x.astype(jnp.bfloat16), w.astype(jnp.bfloat16),
            (stride, stride), ((pad, pad), (pad, pad)),
            dimension_numbers=("NCHW", "OIHW", "NCHW"),
            preferred_element_type=jnp.float32,
        )
        return y + b[None, :, None, None]

    def inorm(x):
        m = jnp.mean(x, axis=(2, 3), keepdims=True)
        v = jnp.mean((x - m) ** 2, axis=(2, 3), keepdims=True)
        return (x - m) / jnp.sqrt(v + EPS)

    def lrelu(x):
        return jnp.where(x >= 0, x, SLOPE * x)

    x = lrelu(conv(img, params["w1"], params["b1"], 2, 1))
    x = lrelu(inorm(conv(x, params["w2"], params["b2"], 2, 1)))
    x = lrelu(inorm(conv(x, params["w3"], params["b3"], 2, 1)))
    x = lrelu(inorm(conv(x, params["w4"], params["b4"], 2, 1)))
    x = jnp.pad(x, ((0, 0), (0, 0), (1, 0), (1, 0)))
    return conv(x, params["w5"], params["b5"], 1, 1)


if __name__ == "__main__":
    key = jax.random.PRNGKey(0)
    k_img, k_par = jax.random.split(key)

    B, C, H, W = 2, 3, 32, 32          # H, W must be >= 16 (4 stride-2 convs)
    img = jax.random.normal(k_img, (B, C, H, W), jnp.float32)
    raw_params = init_params(k_par, C)
    prepared = prepare_params(raw_params)      # done once, outside the forward

    out = jax.jit(discriminator_forward)(img, prepared)
    out = jax.block_until_ready(out)
    assert out.shape == (B, 1, H // 16, W // 16), out.shape

    ref = jax.block_until_ready(jax.jit(ref_forward)(img, raw_params))
    max_err = float(jnp.max(jnp.abs(out - ref)))
    assert jnp.allclose(out, ref, atol=3e-2, rtol=3e-2), max_err

    print("KERNEL_OK")
</pallas_src>

<mosaic_0001>
module attributes {stable_mosaic.version = 11 : i64} {
  func.func @_matmul_bias_kernel(%arg0: i32, %arg1: i32, %arg2: i32, %arg3: memref<512x128xbf16, #tpu.memory_space<vmem>>, %arg4: memref<128x128xbf16, #tpu.memory_space<vmem>>, %arg5: memref<1x128xf32, #tpu.memory_space<vmem>>, %arg6: memref<512x128xbf16, #tpu.memory_space<vmem>>, %arg7: memref<512x128xf32, #tpu.memory_space<vmem>>) attributes {dimension_semantics = [#tpu.dimension_semantics<parallel>, #tpu.dimension_semantics<parallel>, #tpu.dimension_semantics<arbitrary>], iteration_bounds = array<i64: 1, 1, 1>, scalar_prefetch = 0 : i64, scratch_operands = 1 : i64, tpu.core_type = #tpu.core_type<tc>, window_params = [{transform_indices = @transform_0, window_bounds = array<i64: 512, 128>}, {transform_indices = @transform_1, window_bounds = array<i64: 128, 128>}, {transform_indices = @transform_2, window_bounds = array<i64: 1, 128>}, {transform_indices = @transform_3, window_bounds = array<i64: 512, 128>}]} {
    %c0_i32 = arith.constant 0 : i32
    %0 = arith.cmpi eq, %arg2, %c0_i32 : i32
    %1 = arith.extui %0 : i1 to i32
    %c0_i32_0 = arith.constant 0 : i32
    %2 = arith.cmpi ne, %1, %c0_i32_0 : i32
    scf.if %2 {
      %cst_10 = arith.constant 0.000000e+00 : f32
      %12 = vector.broadcast %cst_10 : f32 to vector<512x128xf32>
      %c0_11 = arith.constant 0 : index
      %c0_12 = arith.constant 0 : index
      %13 = vector.load %arg7[%c0_11, %c0_12] : memref<512x128xf32, #tpu.memory_space<vmem>>, vector<512x128xf32>
      tpu.vector_store %arg7[%c0_11, %c0_12], %12 {strides = array<i32>} : memref<512x128xf32, #tpu.memory_space<vmem>>, vector<512x128xf32>,
    } else {
    }
    %c0 = arith.constant 0 : index
    %c0_1 = arith.constant 0 : index
    %3 = vector.load %arg7[%c0, %c0_1] : memref<512x128xf32, #tpu.memory_space<vmem>>, vector<512x128xf32>
    %c0_2 = arith.constant 0 : index
    %c0_3 = arith.constant 0 : index
    %4 = vector.load %arg3[%c0_2, %c0_3] : memref<512x128xbf16, #tpu.memory_space<vmem>>, vector<512x128xbf16>
    %c0_4 = arith.constant 0 : index
    %c0_5 = arith.constant 0 : index
    %5 = vector.load %arg4[%c0_4, %c0_5] : memref<128x128xbf16, #tpu.memory_space<vmem>>, vector<128x128xbf16>
    %cst = arith.constant dense<0.000000e+00> : vector<512x128xf32>
    %6 = tpu.matmul %4, %5, %cst {dimension_numbers = #tpu.dot_dimension_numbers<[1], [0], [0], [1], [0, 0, 1, 1], [], []>} : vector<512x128xbf16>, vector<128x128xbf16>, vector<512x128xf32> -> vector<512x128xf32>
    %7 = arith.addf %3, %6 : vector<512x128xf32>
    %c0_6 = arith.constant 0 : index
    %c0_7 = arith.constant 0 : index
    %8 = vector.load %arg7[%c0_6, %c0_7] : memref<512x128xf32, #tpu.memory_space<vmem>>, vector<512x128xf32>
    tpu.vector_store %arg7[%c0_6, %c0_7], %7 {strides = array<i32>} : memref<512x128xf32, #tpu.memory_space<vmem>>, vector<512x128xf32>,
    %c0_i32_8 = arith.constant 0 : i32
    %9 = arith.cmpi eq, %arg2, %c0_i32_8 : i32
    %10 = arith.extui %9 : i1 to i32
    %c0_i32_9 = arith.constant 0 : i32
    %11 = arith.cmpi ne, %10, %c0_i32_9 : i32
    scf.if %11 {
      %c0_10 = arith.constant 0 : index
      %c0_11 = arith.constant 0 : index
      %12 = vector.load %arg7[%c0_10, %c0_11] : memref<512x128xf32, #tpu.memory_space<vmem>>, vector<512x128xf32>
      %c0_12 = arith.constant 0 : index
      %c0_13 = arith.constant 0 : index
      %13 = vector.load %arg5[%c0_12, %c0_13] : memref<1x128xf32, #tpu.memory_space<vmem>>, vector<1x128xf32>
      %14 = vector.broadcast %13 : vector<1x128xf32> to vector<512x128xf32>
      %15 = arith.addf %12, %14 : vector<512x128xf32>
      %cst_14 = arith.constant 0.000000e+00 : f32
      %16 = vector.broadcast %cst_14 : f32 to vector<512x128xf32>
      %17 = arith.cmpf oge, %15, %16 : vector<512x128xf32>
      %cst_15 = arith.constant 2.000000e-01 : f32
      %18 = vector.broadcast %cst_15 : f32 to vector<512x128xf32>
      %19 = arith.mulf %18, %15 : vector<512x128xf32>
      %20 = arith.select %17, %15, %19 : vector<512x128xi1>, vector<512x128xf32>
      %21 = arith.truncf %20 : vector<512x128xf32> to vector<512x128xbf16>
      %c0_16 = arith.constant 0 : index
      %c0_17 = arith.constant 0 : index
      %22 = vector.load %arg6[%c0_16, %c0_17] : memref<512x128xbf16, #tpu.memory_space<vmem>>, vector<512x128xbf16>
      tpu.vector_store %arg6[%c0_16, %c0_17], %21 {strides = array<i32>} : memref<512x128xbf16, #tpu.memory_space<vmem>>, vector<512x128xbf16>,
    } else {
    }
    return
  }
  func.func @transform_0(%arg0: i32, %arg1: i32, %arg2: i32) -> (i32, i32) {
    %c0_i32 = arith.constant 0 : i32
    return %arg0, %arg2 : i32, i32
  }
  func.func @transform_1(%arg0: i32, %arg1: i32, %arg2: i32) -> (i32, i32) {
    %c0_i32 = arith.constant 0 : i32
    return %arg2, %arg1 : i32, i32
  }
  func.func @transform_2(%arg0: i32, %arg1: i32, %arg2: i32) -> (i32, i32) {
    %c0_i32 = arith.constant 0 : i32
    %c0_i32_0 = arith.constant 0 : i32
    return %c0_i32, %arg1 : i32, i32
  }
  func.func @transform_3(%arg0: i32, %arg1: i32, %arg2: i32) -> (i32, i32) {
    %c0_i32 = arith.constant 0 : i32
    return %arg0, %arg1 : i32, i32
  }
}

module attributes {stable_mosaic.version = 11 : i64} {
  func.func @_matmul_bias_kernel(%arg0: i32, %arg1: i32, %arg2: i32, %arg3: memref<128x512xbf16, #tpu.memory_space<vmem>>, %arg4: memref<512x128xbf16, #tpu.memory_space<vmem>>, %arg5: memref<1x128xf32, #tpu.memory_space<vmem>>, %arg6: memref<128x128xf32, #tpu.memory_space<vmem>>, %arg7: memref<128x128xf32, #tpu.memory_space<vmem>>) attributes {dimension_semantics = [#tpu.dimension_semantics<parallel>, #tpu.dimension_semantics<parallel>, #tpu.dimension_semantics<arbitrary>], iteration_bounds = array<i64: 1, 1, 2>, scalar_prefetch = 0 : i64, scratch_operands = 1 : i64, tpu.core_type = #tpu.core_type<tc>, window_params = [{transform_indices = @transform_0, window_bounds = array<i64: 128, 512>}, {transform_indices = @transform_1, window_bounds = array<i64: 512, 128>}, {transform_indices = @transform_2, window_bounds = array<i64: 1, 128>}, {transform_indices = @transform_3, window_bounds = array<i64: 128, 128>}]} {
    %c0_i32 = arith.constant 0 : i32
    %0 = arith.cmpi eq, %arg2, %c0_i32 : i32
    %1 = arith.extui %0 : i1 to i32
    %c0_i32_0 = arith.constant 0 : i32
    %2 = arith.cmpi ne, %1, %c0_i32_0 : i32
    scf.if %2 {
      %cst_9 = arith.constant 0.000000e+00 : f32
      %12 = vector.broadcast %cst_9 : f32 to vector<128x128xf32>
      %c0_10 = arith.constant 0 : index
      %c0_11 = arith.constant 0 : index
      %13 = vector.load %arg7[%c0_10, %c0_11] : memref<128x128xf32, #tpu.memory_space<vmem>>, vector<128x128xf32>
      tpu.vector_store %arg7[%c0_10, %c0_11], %12 {strides = array<i32>} : memref<128x128xf32, #tpu.memory_space<vmem>>, vector<128x128xf32>,
    } else {
    }
    %c0 = arith.constant 0 : index
    %c0_1 = arith.constant 0 : index
    %3 = vector.load %arg7[%c0, %c0_1] : memref<128x128xf32, #tpu.memory_space<vmem>>, vector<128x128xf32>
    %c0_2 = arith.constant 0 : index
    %c0_3 = arith.constant 0 : index
    %4 = vector.load %arg3[%c0_2, %c0_3] : memref<128x512xbf16, #tpu.memory_space<vmem>>, vector<128x512xbf16>
    %c0_4 = arith.constant 0 : index
    %c0_5 = arith.constant 0 : index
    %5 = vector.load %arg4[%c0_4, %c0_5] : memref<512x128xbf16, #tpu.memory_space<vmem>>, vector<512x128xbf16>
    %cst = arith.constant dense<0.000000e+00> : vector<128x128xf32>
    %6 = tpu.matmul %4, %5, %cst {dimension_numbers = #tpu.dot_dimension_numbers<[1], [0], [0], [1], [0, 0, 1, 1], [], []>} : vector<128x512xbf16>, vector<512x128xbf16>, vector<128x128xf32> -> vector<128x128xf32>
    %7 = arith.addf %3, %6 : vector<128x128xf32>
    %c0_6 = arith.constant 0 : index
    %c0_7 = arith.constant 0 : index
    %8 = vector.load %arg7[%c0_6, %c0_7] : memref<128x128xf32, #tpu.memory_space<vmem>>, vector<128x128xf32>
    tpu.vector_store %arg7[%c0_6, %c0_7], %7 {strides = array<i32>} : memref<128x128xf32, #tpu.memory_space<vmem>>, vector<128x128xf32>,
    %c1_i32 = arith.constant 1 : i32
    %9 = arith.cmpi eq, %arg2, %c1_i32 : i32
    %10 = arith.extui %9 : i1 to i32
    %c0_i32_8 = arith.constant 0 : i32
    %11 = arith.cmpi ne, %10, %c0_i32_8 : i32
    scf.if %11 {
      %c0_9 = arith.constant 0 : index
      %c0_10 = arith.constant 0 : index
      %12 = vector.load %arg7[%c0_9, %c0_10] : memref<128x128xf32, #tpu.memory_space<vmem>>, vector<128x128xf32>
      %c0_11 = arith.constant 0 : index
      %c0_12 = arith.constant 0 : index
      %13 = vector.load %arg5[%c0_11, %c0_12] : memref<1x128xf32, #tpu.memory_space<vmem>>, vector<1x128xf32>
      %14 = vector.broadcast %13 : vector<1x128xf32> to vector<128x128xf32>
      %15 = arith.addf %12, %14 : vector<128x128xf32>
      %c0_13 = arith.constant 0 : index
      %c0_14 = arith.constant 0 : index
      %16 = vector.load %arg6[%c0_13, %c0_14] : memref<128x128xf32, #tpu.memory_space<vmem>>, vector<128x128xf32>
      tpu.vector_store %arg6[%c0_13, %c0_14], %15 {strides = array<i32>} : memref<128x128xf32, #tpu.memory_space<vmem>>, vector<128x128xf32>,
    } else {
    }
    return
  }
  func.func @transform_0(%arg0: i32, %arg1: i32, %arg2: i32) -> (i32, i32) {
    %c0_i32 = arith.constant 0 : i32
    return %arg0, %arg2 : i32, i32
  }
  func.func @transform_1(%arg0: i32, %arg1: i32, %arg2: i32) -> (i32, i32) {
    %c0_i32 = arith.constant 0 : i32
    return %arg2, %arg1 : i32, i32
  }
  func.func @transform_2(%arg0: i32, %arg1: i32, %arg2: i32) -> (i32, i32) {
    %c0_i32 = arith.constant 0 : i32
    %c0_i32_0 = arith.constant 0 : i32
    return %c0_i32, %arg1 : i32, i32
  }
  func.func @transform_3(%arg0: i32, %arg1: i32, %arg2: i32) -> (i32, i32) {
    %c0_i32 = arith.constant 0 : i32
    return %arg0, %arg1 : i32, i32
  }
}

module attributes {stable_mosaic.version = 11 : i64} {
  func.func @_norm_act_kernel(%arg0: i32, %arg1: i32, %arg2: memref<1x64x128xf32, #tpu.memory_space<vmem>>, %arg3: memref<1x64x128xbf16, #tpu.memory_space<vmem>>) attributes {dimension_semantics = [#tpu.dimension_semantics<parallel>, #tpu.dimension_semantics<parallel>], iteration_bounds = array<i64: 2, 1>, scalar_prefetch = 0 : i64, scratch_operands = 0 : i64, tpu.core_type = #tpu.core_type<tc>, window_params = [{transform_indices = @transform_0, window_bounds = array<i64: 1, 64, 128>}, {transform_indices = @transform_1, window_bounds = array<i64: 1, 64, 128>}]} {
    %c0 = arith.constant 0 : index
    %c0_0 = arith.constant 0 : index
    %c0_1 = arith.constant 0 : index
    %0 = vector.load %arg2[%c0, %c0_0, %c0_1] : memref<1x64x128xf32, #tpu.memory_space<vmem>>, vector<1x64x128xf32>
    %cst = arith.constant dense<0.000000e+00> : vector<1x128xf32>
    %1 = vector.multi_reduction <add>, %0, %cst [1] : vector<1x64x128xf32> to vector<1x128xf32>
    %2 = vector.shape_cast %1 : vector<1x128xf32> to vector<1x1x128xf32>
    %cst_2 = arith.constant 6.400000e+01 : f32
    %3 = vector.broadcast %cst_2 : f32 to vector<1x1x128xf32>
    %4 = arith.divf %2, %3 : vector<1x1x128xf32>
    %5 = arith.mulf %0, %0 : vector<1x64x128xf32>
    %cst_3 = arith.constant dense<0.000000e+00> : vector<1x128xf32>
    %6 = vector.multi_reduction <add>, %5, %cst_3 [1] : vector<1x64x128xf32> to vector<1x128xf32>
    %7 = vector.shape_cast %6 : vector<1x128xf32> to vector<1x1x128xf32>
    %cst_4 = arith.constant 6.400000e+01 : f32
    %8 = vector.broadcast %cst_4 : f32 to vector<1x1x128xf32>
    %9 = arith.divf %7, %8 : vector<1x1x128xf32>
    %10 = arith.mulf %4, %4 : vector<1x1x128xf32>
    %11 = arith.subf %9, %10 : vector<1x1x128xf32>
    %12 = vector.broadcast %4 : vector<1x1x128xf32> to vector<1x64x128xf32>
    %13 = arith.subf %0, %12 : vector<1x64x128xf32>
    %cst_5 = arith.constant 9.99999974E-6 : f32
    %14 = vector.broadcast %cst_5 : f32 to vector<1x1x128xf32>
    %15 = arith.addf %11, %14 : vector<1x1x128xf32>
    %16 = math.rsqrt %15 : vector<1x1x128xf32>
    %17 = vector.broadcast %16 : vector<1x1x128xf32> to vector<1x64x128xf32>
    %18 = arith.mulf %13, %17 : vector<1x64x128xf32>
    %cst_6 = arith.constant 0.000000e+00 : f32
    %19 = vector.broadcast %cst_6 : f32 to vector<1x64x128xf32>
    %20 = arith.cmpf oge, %18, %19 : vector<1x64x128xf32>
    %cst_7 = arith.constant 2.000000e-01 : f32
    %21 = vector.broadcast %cst_7 : f32 to vector<1x64x128xf32>
    %22 = arith.mulf %21, %18 : vector<1x64x128xf32>
    %23 = arith.select %20, %18, %22 : vector<1x64x128xi1>, vector<1x64x128xf32>
    %24 = arith.truncf %23 : vector<1x64x128xf32> to vector<1x64x128xbf16>
    %c0_8 = arith.constant 0 : index
    %c0_9 = arith.constant 0 : index
    %c0_10 = arith.constant 0 : index
    %25 = vector.load %arg3[%c0_8, %c0_9, %c0_10] : memref<1x64x128xbf16, #tpu.memory_space<vmem>>, vector<1x64x128xbf16>
    tpu.vector_store %arg3[%c0_8, %c0_9, %c0_10], %24 {strides = array<i32>} : memref<1x64x128xbf16, #tpu.memory_space<vmem>>, vector<1x64x128xbf16>,
    return
  }
  func.func @transform_0(%arg0: i32, %arg1: i32) -> (i32, i32, i32) {
    %c0_i32 = arith.constant 0 : i32
    %c0_i32_0 = arith.constant 0 : i32
    return %arg0, %c0_i32, %arg1 : i32, i32, i32
  }
  func.func @transform_1(%arg0: i32, %arg1: i32) -> (i32, i32, i32) {
    %c0_i32 = arith.constant 0 : i32
    %c0_i32_0 = arith.constant 0 : i32
    return %arg0, %c0_i32, %arg1 : i32, i32, i32
  }
}

module attributes {stable_mosaic.version = 11 : i64} {
  func.func @_norm_act_kernel(%arg0: i32, %arg1: i32, %arg2: memref<1x16x128xf32, #tpu.memory_space<vmem>>, %arg3: memref<1x16x128xbf16, #tpu.memory_space<vmem>>) attributes {dimension_semantics = [#tpu.dimension_semantics<parallel>, #tpu.dimension_semantics<parallel>], iteration_bounds = array<i64: 2, 2>, scalar_prefetch = 0 : i64, scratch_operands = 0 : i64, tpu.core_type = #tpu.core_type<tc>, window_params = [{transform_indices = @transform_0, window_bounds = array<i64: 1, 16, 128>}, {transform_indices = @transform_1, window_bounds = array<i64: 1, 16, 128>}]} {
    %c0 = arith.constant 0 : index
    %c0_0 = arith.constant 0 : index
    %c0_1 = arith.constant 0 : index
    %0 = vector.load %arg2[%c0, %c0_0, %c0_1] : memref<1x16x128xf32, #tpu.memory_space<vmem>>, vector<1x16x128xf32>
    %cst = arith.constant dense<0.000000e+00> : vector<1x128xf32>
    %1 = vector.multi_reduction <add>, %0, %cst [1] : vector<1x16x128xf32> to vector<1x128xf32>
    %2 = vector.shape_cast %1 : vector<1x128xf32> to vector<1x1x128xf32>
    %cst_2 = arith.constant 1.600000e+01 : f32
    %3 = vector.broadcast %cst_2 : f32 to vector<1x1x128xf32>
    %4 = arith.divf %2, %3 : vector<1x1x128xf32>
    %5 = arith.mulf %0, %0 : vector<1x16x128xf32>
    %cst_3 = arith.constant dense<0.000000e+00> : vector<1x128xf32>
    %6 = vector.multi_reduction <add>, %5, %cst_3 [1] : vector<1x16x128xf32> to vector<1x128xf32>
    %7 = vector.shape_cast %6 : vector<1x128xf32> to vector<1x1x128xf32>
    %cst_4 = arith.constant 1.600000e+01 : f32
    %8 = vector.broadcast %cst_4 : f32 to vector<1x1x128xf32>
    %9 = arith.divf %7, %8 : vector<1x1x128xf32>
    %10 = arith.mulf %4, %4 : vector<1x1x128xf32>
    %11 = arith.subf %9, %10 : vector<1x1x128xf32>
    %12 = vector.broadcast %4 : vector<1x1x128xf32> to vector<1x16x128xf32>
    %13 = arith.subf %0, %12 : vector<1x16x128xf32>
    %cst_5 = arith.constant 9.99999974E-6 : f32
    %14 = vector.broadcast %cst_5 : f32 to vector<1x1x128xf32>
    %15 = arith.addf %11, %14 : vector<1x1x128xf32>
    %16 = math.rsqrt %15 : vector<1x1x128xf32>
    %17 = vector.broadcast %16 : vector<1x1x128xf32> to vector<1x16x128xf32>
    %18 = arith.mulf %13, %17 : vector<1x16x128xf32>
    %cst_6 = arith.constant 0.000000e+00 : f32
    %19 = vector.broadcast %cst_6 : f32 to vector<1x16x128xf32>
    %20 = arith.cmpf oge, %18, %19 : vector<1x16x128xf32>
    %cst_7 = arith.constant 2.000000e-01 : f32
    %21 = vector.broadcast %cst_7 : f32 to vector<1x16x128xf32>
    %22 = arith.mulf %21, %18 : vector<1x16x128xf32>
    %23 = arith.select %20, %18, %22 : vector<1x16x128xi1>, vector<1x16x128xf32>
    %24 = arith.truncf %23 : vector<1x16x128xf32> to vector<1x16x128xbf16>
    %c0_8 = arith.constant 0 : index
    %c0_9 = arith.constant 0 : index
    %c0_10 = arith.constant 0 : index
    %25 = vector.load %arg3[%c0_8, %c0_9, %c0_10] : memref<1x16x128xbf16, #tpu.memory_space<vmem>>, vector<1x16x128xbf16>
    tpu.vector_store %arg3[%c0_8, %c0_9, %c0_10], %24 {strides = array<i32>} : memref<1x16x128xbf16, #tpu.memory_space<vmem>>, vector<1x16x128xbf16>,
    return
  }
  func.func @transform_0(%arg0: i32, %arg1: i32) -> (i32, i32, i32) {
    %c0_i32 = arith.constant 0 : i32
    %c0_i32_0 = arith.constant 0 : i32
    return %arg0, %c0_i32, %arg1 : i32, i32, i32
  }
  func.func @transform_1(%arg0: i32, %arg1: i32) -> (i32, i32, i32) {
    %c0_i32 = arith.constant 0 : i32
    %c0_i32_0 = arith.constant 0 : i32
    return %arg0, %c0_i32, %arg1 : i32, i32, i32
  }
}

module attributes {stable_mosaic.version = 11 : i64} {
  func.func @_matmul_bias_kernel(%arg0: i32, %arg1: i32, %arg2: i32, %arg3: memref<32x512xbf16, #tpu.memory_space<vmem>>, %arg4: memref<512x256xbf16, #tpu.memory_space<vmem>>, %arg5: memref<1x256xf32, #tpu.memory_space<vmem>>, %arg6: memref<32x256xf32, #tpu.memory_space<vmem>>, %arg7: memref<32x256xf32, #tpu.memory_space<vmem>>) attributes {dimension_semantics = [#tpu.dimension_semantics<parallel>, #tpu.dimension_semantics<parallel>, #tpu.dimension_semantics<arbitrary>], iteration_bounds = array<i64: 1, 1, 4>, scalar_prefetch = 0 : i64, scratch_operands = 1 : i64, tpu.core_type = #tpu.core_type<tc>, window_params = [{transform_indices = @transform_0, window_bounds = array<i64: 32, 512>}, {transform_indices = @transform_1, window_bounds = array<i64: 512, 256>}, {transform_indices = @transform_2, window_bounds = array<i64: 1, 256>}, {transform_indices = @transform_3, window_bounds = array<i64: 32, 256>}]} {
    %c0_i32 = arith.constant 0 : i32
    %0 = arith.cmpi eq, %arg2, %c0_i32 : i32
    %1 = arith.extui %0 : i1 to i32
    %c0_i32_0 = arith.constant 0 : i32
    %2 = arith.cmpi ne, %1, %c0_i32_0 : i32
    scf.if %2 {
      %cst_9 = arith.constant 0.000000e+00 : f32
      %12 = vector.broadcast %cst_9 : f32 to vector<32x256xf32>
      %c0_10 = arith.constant 0 : index
      %c0_11 = arith.constant 0 : index
      %13 = vector.load %arg7[%c0_10, %c0_11] : memref<32x256xf32, #tpu.memory_space<vmem>>, vector<32x256xf32>
      tpu.vector_store %arg7[%c0_10, %c0_11], %12 {strides = array<i32>} : memref<32x256xf32, #tpu.memory_space<vmem>>, vector<32x256xf32>,
    } else {
    }
    %c0 = arith.constant 0 : index
    %c0_1 = arith.constant 0 : index
    %3 = vector.load %arg7[%c0, %c0_1] : memref<32x256xf32, #tpu.memory_space<vmem>>, vector<32x256xf32>
    %c0_2 = arith.constant 0 : index
    %c0_3 = arith.constant 0 : index
    %4 = vector.load %arg3[%c0_2, %c0_3] : memref<32x512xbf16, #tpu.memory_space<vmem>>, vector<32x512xbf16>
    %c0_4 = arith.constant 0 : index
    %c0_5 = arith.constant 0 : index
    %5 = vector.load %arg4[%c0_4, %c0_5] : memref<512x256xbf16, #tpu.memory_space<vmem>>, vector<512x256xbf16>
    %cst = arith.constant dense<0.000000e+00> : vector<32x256xf32>
    %6 = tpu.matmul %4, %5, %cst {dimension_numbers = #tpu.dot_dimension_numbers<[1], [0], [0], [1], [0, 0, 1, 1], [], []>} : vector<32x512xbf16>, vector<512x256xbf16>, vector<32x256xf32> -> vector<32x256xf32>
    %7 = arith.addf %3, %6 : vector<32x256xf32>
    %c0_6 = arith.constant 0 : index
    %c0_7 = arith.constant 0 : index
    %8 = vector.load %arg7[%c0_6, %c0_7] : memref<32x256xf32, #tpu.memory_space<vmem>>, vector<32x256xf32>
    tpu.vector_store %arg7[%c0_6, %c0_7], %7 {strides = array<i32>} : memref<32x256xf32, #tpu.memory_space<vmem>>, vector<32x256xf32>,
    %c3_i32 = arith.constant 3 : i32
    %9 = arith.cmpi eq, %arg2, %c3_i32 : i32
    %10 = arith.extui %9 : i1 to i32
    %c0_i32_8 = arith.constant 0 : i32
    %11 = arith.cmpi ne, %10, %c0_i32_8 : i32
    scf.if %11 {
      %c0_9 = arith.constant 0 : index
      %c0_10 = arith.constant 0 : index
      %12 = vector.load %arg7[%c0_9, %c0_10] : memref<32x256xf32, #tpu.memory_space<vmem>>, vector<32x256xf32>
      %c0_11 = arith.constant 0 : index
      %c0_12 = arith.constant 0 : index
      %13 = vector.load %arg5[%c0_11, %c0_12] : memref<1x256xf32, #tpu.memory_space<vmem>>, vector<1x256xf32>
      %14 = vector.broadcast %13 : vector<1x256xf32> to vector<32x256xf32>
      %15 = arith.addf %12, %14 : vector<32x256xf32>
      %c0_13 = arith.constant 0 : index
      %c0_14 = arith.constant 0 : index
      %16 = vector.load %arg6[%c0_13, %c0_14] : memref<32x256xf32, #tpu.memory_space<vmem>>, vector<32x256xf32>
      tpu.vector_store %arg6[%c0_13, %c0_14], %15 {strides = array<i32>} : memref<32x256xf32, #tpu.memory_space<vmem>>, vector<32x256xf32>,
    } else {
    }
    return
  }
  func.func @transform_0(%arg0: i32, %arg1: i32, %arg2: i32) -> (i32, i32) {
    %c0_i32 = arith.constant 0 : i32
    return %arg0, %arg2 : i32, i32
  }
  func.func @transform_1(%arg0: i32, %arg1: i32, %arg2: i32) -> (i32, i32) {
    %c0_i32 = arith.constant 0 : i32
    return %arg2, %arg1 : i32, i32
  }
  func.func @transform_2(%arg0: i32, %arg1: i32, %arg2: i32) -> (i32, i32) {
    %c0_i32 = arith.constant 0 : i32
    %c0_i32_0 = arith.constant 0 : i32
    return %c0_i32, %arg1 : i32, i32
  }
  func.func @transform_3(%arg0: i32, %arg1: i32, %arg2: i32) -> (i32, i32) {
    %c0_i32 = arith.constant 0 : i32
    return %arg0, %arg1 : i32, i32
  }
}

module attributes {stable_mosaic.version = 11 : i64} {
  func.func @_matmul_bias_kernel(%arg0: i32, %arg1: i32, %arg2: i32, %arg3: memref<8x512xbf16, #tpu.memory_space<vmem>>, %arg4: memref<512x256xbf16, #tpu.memory_space<vmem>>, %arg5: memref<1x256xf32, #tpu.memory_space<vmem>>, %arg6: memref<8x256xf32, #tpu.memory_space<vmem>>, %arg7: memref<8x256xf32, #tpu.memory_space<vmem>>) attributes {dimension_semantics = [#tpu.dimension_semantics<parallel>, #tpu.dimension_semantics<parallel>, #tpu.dimension_semantics<arbitrary>], iteration_bounds = array<i64: 1, 2, 8>, scalar_prefetch = 0 : i64, scratch_operands = 1 : i64, tpu.core_type = #tpu.core_type<tc>, window_params = [{transform_indices = @transform_0, window_bounds = array<i64: 8, 512>}, {transform_indices = @transform_1, window_bounds = array<i64: 512, 256>}, {transform_indices = @transform_2, window_bounds = array<i64: 1, 256>}, {transform_indices = @transform_3, window_bounds = array<i64: 8, 256>}]} {
    %c0_i32 = arith.constant 0 : i32
    %0 = arith.cmpi eq, %arg2, %c0_i32 : i32
    %1 = arith.extui %0 : i1 to i32
    %c0_i32_0 = arith.constant 0 : i32
    %2 = arith.cmpi ne, %1, %c0_i32_0 : i32
    scf.if %2 {
      %cst_9 = arith.constant 0.000000e+00 : f32
      %12 = vector.broadcast %cst_9 : f32 to vector<8x256xf32>
      %c0_10 = arith.constant 0 : index
      %c0_11 = arith.constant 0 : index
      %13 = vector.load %arg7[%c0_10, %c0_11] : memref<8x256xf32, #tpu.memory_space<vmem>>, vector<8x256xf32>
      tpu.vector_store %arg7[%c0_10, %c0_11], %12 {strides = array<i32>} : memref<8x256xf32, #tpu.memory_space<vmem>>, vector<8x256xf32>,
    } else {
    }
    %c0 = arith.constant 0 : index
    %c0_1 = arith.constant 0 : index
    %3 = vector.load %arg7[%c0, %c0_1] : memref<8x256xf32, #tpu.memory_space<vmem>>, vector<8x256xf32>
    %c0_2 = arith.constant 0 : index
    %c0_3 = arith.constant 0 : index
    %4 = vector.load %arg3[%c0_2, %c0_3] : memref<8x512xbf16, #tpu.memory_space<vmem>>, vector<8x512xbf16>
    %c0_4 = arith.constant 0 : index
    %c0_5 = arith.constant 0 : index
    %5 = vector.load %arg4[%c0_4, %c0_5] : memref<512x256xbf16, #tpu.memory_space<vmem>>, vector<512x256xbf16>
    %cst = arith.constant dense<0.000000e+00> : vector<8x256xf32>
    %6 = tpu.matmul %4, %5, %cst {dimension_numbers = #tpu.dot_dimension_numbers<[1], [0], [0], [1], [0, 0, 1, 1], [], []>} : vector<8x512xbf16>, vector<512x256xbf16>, vector<8x256xf32> -> vector<8x256xf32>
    %7 = arith.addf %3, %6 : vector<8x256xf32>
    %c0_6 = arith.constant 0 : index
    %c0_7 = arith.constant 0 : index
    %8 = vector.load %arg7[%c0_6, %c0_7] : memref<8x256xf32, #tpu.memory_space<vmem>>, vector<8x256xf32>
    tpu.vector_store %arg7[%c0_6, %c0_7], %7 {strides = array<i32>} : memref<8x256xf32, #tpu.memory_space<vmem>>, vector<8x256xf32>,
    %c7_i32 = arith.constant 7 : i32
    %9 = arith.cmpi eq, %arg2, %c7_i32 : i32
    %10 = arith.extui %9 : i1 to i32
    %c0_i32_8 = arith.constant 0 : i32
    %11 = arith.cmpi ne, %10, %c0_i32_8 : i32
    scf.if %11 {
      %c0_9 = arith.constant 0 : index
      %c0_10 = arith.constant 0 : index
      %12 = vector.load %arg7[%c0_9, %c0_10] : memref<8x256xf32, #tpu.memory_space<vmem>>, vector<8x256xf32>
      %c0_11 = arith.constant 0 : index
      %c0_12 = arith.constant 0 : index
      %13 = vector.load %arg5[%c0_11, %c0_12] : memref<1x256xf32, #tpu.memory_space<vmem>>, vector<1x256xf32>
      %14 = vector.broadcast %13 : vector<1x256xf32> to vector<8x256xf32>
      %15 = arith.addf %12, %14 : vector<8x256xf32>
      %c0_13 = arith.constant 0 : index
      %c0_14 = arith.constant 0 : index
      %16 = vector.load %arg6[%c0_13, %c0_14] : memref<8x256xf32, #tpu.memory_space<vmem>>, vector<8x256xf32>
      tpu.vector_store %arg6[%c0_13, %c0_14], %15 {strides = array<i32>} : memref<8x256xf32, #tpu.memory_space<vmem>>, vector<8x256xf32>,
    } else {
    }
    return
  }
  func.func @transform_0(%arg0: i32, %arg1: i32, %arg2: i32) -> (i32, i32) {
    %c0_i32 = arith.constant 0 : i32
    return %arg0, %arg2 : i32, i32
  }
  func.func @transform_1(%arg0: i32, %arg1: i32, %arg2: i32) -> (i32, i32) {
    %c0_i32 = arith.constant 0 : i32
    return %arg2, %arg1 : i32, i32
  }
  func.func @transform_2(%arg0: i32, %arg1: i32, %arg2: i32) -> (i32, i32) {
    %c0_i32 = arith.constant 0 : i32
    %c0_i32_0 = arith.constant 0 : i32
    return %c0_i32, %arg1 : i32, i32
  }
  func.func @transform_3(%arg0: i32, %arg1: i32, %arg2: i32) -> (i32, i32) {
    %c0_i32 = arith.constant 0 : i32
    return %arg0, %arg1 : i32, i32
  }
}

module attributes {stable_mosaic.version = 11 : i64} {
  func.func @_norm_act_kernel(%arg0: i32, %arg1: i32, %arg2: memref<1x4x128xf32, #tpu.memory_space<vmem>>, %arg3: memref<1x4x128xbf16, #tpu.memory_space<vmem>>) attributes {dimension_semantics = [#tpu.dimension_semantics<parallel>, #tpu.dimension_semantics<parallel>], iteration_bounds = array<i64: 2, 4>, scalar_prefetch = 0 : i64, scratch_operands = 0 : i64, tpu.core_type = #tpu.core_type<tc>, window_params = [{transform_indices = @transform_0, window_bounds = array<i64: 1, 4, 128>}, {transform_indices = @transform_1, window_bounds = array<i64: 1, 4, 128>}]} {
    %c0 = arith.constant 0 : index
    %c0_0 = arith.constant 0 : index
    %c0_1 = arith.constant 0 : index
    %0 = vector.load %arg2[%c0, %c0_0, %c0_1] : memref<1x4x128xf32, #tpu.memory_space<vmem>>, vector<1x4x128xf32>
    %cst = arith.constant dense<0.000000e+00> : vector<1x128xf32>
    %1 = vector.multi_reduction <add>, %0, %cst [1] : vector<1x4x128xf32> to vector<1x128xf32>
    %2 = vector.shape_cast %1 : vector<1x128xf32> to vector<1x1x128xf32>
    %cst_2 = arith.constant 4.000000e+00 : f32
    %3 = vector.broadcast %cst_2 : f32 to vector<1x1x128xf32>
    %4 = arith.divf %2, %3 : vector<1x1x128xf32>
    %5 = arith.mulf %0, %0 : vector<1x4x128xf32>
    %cst_3 = arith.constant dense<0.000000e+00> : vector<1x128xf32>
    %6 = vector.multi_reduction <add>, %5, %cst_3 [1] : vector<1x4x128xf32> to vector<1x128xf32>
    %7 = vector.shape_cast %6 : vector<1x128xf32> to vector<1x1x128xf32>
    %cst_4 = arith.constant 4.000000e+00 : f32
    %8 = vector.broadcast %cst_4 : f32 to vector<1x1x128xf32>
    %9 = arith.divf %7, %8 : vector<1x1x128xf32>
    %10 = arith.mulf %4, %4 : vector<1x1x128xf32>
    %11 = arith.subf %9, %10 : vector<1x1x128xf32>
    %12 = vector.broadcast %4 : vector<1x1x128xf32> to vector<1x4x128xf32>
    %13 = arith.subf %0, %12 : vector<1x4x128xf32>
    %cst_5 = arith.constant 9.99999974E-6 : f32
    %14 = vector.broadcast %cst_5 : f32 to vector<1x1x128xf32>
    %15 = arith.addf %11, %14 : vector<1x1x128xf32>
    %16 = math.rsqrt %15 : vector<1x1x128xf32>
    %17 = vector.broadcast %16 : vector<1x1x128xf32> to vector<1x4x128xf32>
    %18 = arith.mulf %13, %17 : vector<1x4x128xf32>
    %cst_6 = arith.constant 0.000000e+00 : f32
    %19 = vector.broadcast %cst_6 : f32 to vector<1x4x128xf32>
    %20 = arith.cmpf oge, %18, %19 : vector<1x4x128xf32>
    %cst_7 = arith.constant 2.000000e-01 : f32
    %21 = vector.broadcast %cst_7 : f32 to vector<1x4x128xf32>
    %22 = arith.mulf %21, %18 : vector<1x4x128xf32>
    %23 = arith.select %20, %18, %22 : vector<1x4x128xi1>, vector<1x4x128xf32>
    %24 = arith.truncf %23 : vector<1x4x128xf32> to vector<1x4x128xbf16>
    %c0_8 = arith.constant 0 : index
    %c0_9 = arith.constant 0 : index
    %c0_10 = arith.constant 0 : index
    %25 = vector.load %arg3[%c0_8, %c0_9, %c0_10] : memref<1x4x128xbf16, #tpu.memory_space<vmem>>, vector<1x4x128xbf16>
    tpu.vector_store %arg3[%c0_8, %c0_9, %c0_10], %24 {strides = array<i32>} : memref<1x4x128xbf16, #tpu.memory_space<vmem>>, vector<1x4x128xbf16>,
    return
  }
  func.func @transform_0(%arg0: i32, %arg1: i32) -> (i32, i32, i32) {
    %c0_i32 = arith.constant 0 : i32
    %c0_i32_0 = arith.constant 0 : i32
    return %arg0, %c0_i32, %arg1 : i32, i32, i32
  }
  func.func @transform_1(%arg0: i32, %arg1: i32) -> (i32, i32, i32) {
    %c0_i32 = arith.constant 0 : i32
    %c0_i32_0 = arith.constant 0 : i32
    return %arg0, %c0_i32, %arg1 : i32, i32, i32
  }
}

module attributes {stable_mosaic.version = 11 : i64} {
  func.func @_matmul_bias_kernel(%arg0: i32, %arg1: i32, %arg2: i32, %arg3: memref<8x512xbf16, #tpu.memory_space<vmem>>, %arg4: memref<512x128xbf16, #tpu.memory_space<vmem>>, %arg5: memref<1x128xf32, #tpu.memory_space<vmem>>, %arg6: memref<8x128xf32, #tpu.memory_space<vmem>>, %arg7: memref<8x128xf32, #tpu.memory_space<vmem>>) attributes {dimension_semantics = [#tpu.dimension_semantics<parallel>, #tpu.dimension_semantics<parallel>, #tpu.dimension_semantics<arbitrary>], iteration_bounds = array<i64: 1, 1, 16>, scalar_prefetch = 0 : i64, scratch_operands = 1 : i64, tpu.core_type = #tpu.core_type<tc>, window_params = [{transform_indices = @transform_0, window_bounds = array<i64: 8, 512>}, {transform_indices = @transform_1, window_bounds = array<i64: 512, 128>}, {transform_indices = @transform_2, window_bounds = array<i64: 1, 128>}, {transform_indices = @transform_3, window_bounds = array<i64: 8, 128>}]} {
    %c0_i32 = arith.constant 0 : i32
    %0 = arith.cmpi eq, %arg2, %c0_i32 : i32
    %1 = arith.extui %0 : i1 to i32
    %c0_i32_0 = arith.constant 0 : i32
    %2 = arith.cmpi ne, %1, %c0_i32_0 : i32
    scf.if %2 {
      %cst_9 = arith.constant 0.000000e+00 : f32
      %12 = vector.broadcast %cst_9 : f32 to vector<8x128xf32>
      %c0_10 = arith.constant 0 : index
      %c0_11 = arith.constant 0 : index
      %13 = vector.load %arg7[%c0_10, %c0_11] : memref<8x128xf32, #tpu.memory_space<vmem>>, vector<8x128xf32>
      tpu.vector_store %arg7[%c0_10, %c0_11], %12 {strides = array<i32>} : memref<8x128xf32, #tpu.memory_space<vmem>>, vector<8x128xf32>,
    } else {
    }
    %c0 = arith.constant 0 : index
    %c0_1 = arith.constant 0 : index
    %3 = vector.load %arg7[%c0, %c0_1] : memref<8x128xf32, #tpu.memory_space<vmem>>, vector<8x128xf32>
    %c0_2 = arith.constant 0 : index
    %c0_3 = arith.constant 0 : index
    %4 = vector.load %arg3[%c0_2, %c0_3] : memref<8x512xbf16, #tpu.memory_space<vmem>>, vector<8x512xbf16>
    %c0_4 = arith.constant 0 : index
    %c0_5 = arith.constant 0 : index
    %5 = vector.load %arg4[%c0_4, %c0_5] : memref<512x128xbf16, #tpu.memory_space<vmem>>, vector<512x128xbf16>
    %cst = arith.constant dense<0.000000e+00> : vector<8x128xf32>
    %6 = tpu.matmul %4, %5, %cst {dimension_numbers = #tpu.dot_dimension_numbers<[1], [0], [0], [1], [0, 0, 1, 1], [], []>} : vector<8x512xbf16>, vector<512x128xbf16>, vector<8x128xf32> -> vector<8x128xf32>
    %7 = arith.addf %3, %6 : vector<8x128xf32>
    %c0_6 = arith.constant 0 : index
    %c0_7 = arith.constant 0 : index
    %8 = vector.load %arg7[%c0_6, %c0_7] : memref<8x128xf32, #tpu.memory_space<vmem>>, vector<8x128xf32>
    tpu.vector_store %arg7[%c0_6, %c0_7], %7 {strides = array<i32>} : memref<8x128xf32, #tpu.memory_space<vmem>>, vector<8x128xf32>,
    %c15_i32 = arith.constant 15 : i32
    %9 = arith.cmpi eq, %arg2, %c15_i32 : i32
    %10 = arith.extui %9 : i1 to i32
    %c0_i32_8 = arith.constant 0 : i32
    %11 = arith.cmpi ne, %10, %c0_i32_8 : i32
    scf.if %11 {
      %c0_9 = arith.constant 0 : index
      %c0_10 = arith.constant 0 : index
      %12 = vector.load %arg7[%c0_9, %c0_10] : memref<8x128xf32, #tpu.memory_space<vmem>>, vector<8x128xf32>
      %c0_11 = arith.constant 0 : index
      %c0_12 = arith.constant 0 : index
      %13 = vector.load %arg5[%c0_11, %c0_12] : memref<1x128xf32, #tpu.memory_space<vmem>>, vector<1x128xf32>
      %14 = vector.broadcast %13 : vector<1x128xf32> to vector<8x128xf32>
      %15 = arith.addf %12, %14 : vector<8x128xf32>
      %c0_13 = arith.constant 0 : index
      %c0_14 = arith.constant 0 : index
      %16 = vector.load %arg6[%c0_13, %c0_14] : memref<8x128xf32, #tpu.memory_space<vmem>>, vector<8x128xf32>
      tpu.vector_store %arg6[%c0_13, %c0_14], %15 {strides = array<i32>} : memref<8x128xf32, #tpu.memory_space<vmem>>, vector<8x128xf32>,
    } else {
    }
    return
  }
  func.func @transform_0(%arg0: i32, %arg1: i32, %arg2: i32) -> (i32, i32) {
    %c0_i32 = arith.constant 0 : i32
    return %arg0, %arg2 : i32, i32
  }
  func.func @transform_1(%arg0: i32, %arg1: i32, %arg2: i32) -> (i32, i32) {
    %c0_i32 = arith.constant 0 : i32
    return %arg2, %arg1 : i32, i32
  }
  func.func @transform_2(%arg0: i32, %arg1: i32, %arg2: i32) -> (i32, i32) {
    %c0_i32 = arith.constant 0 : i32
    %c0_i32_0 = arith.constant 0 : i32
    return %c0_i32, %arg1 : i32, i32
  }
  func.func @transform_3(%arg0: i32, %arg1: i32, %arg2: i32) -> (i32, i32) {
    %c0_i32 = arith.constant 0 : i32
    return %arg0, %arg1 : i32, i32
  }
}

</mosaic_0001>

<bundles_post_ra>
// kernel: discriminator_forward.8
= control target key start
LH: loop header
LB: loop body
LE: loop exit
PB: predicated region body
PF: predicated region fallthrough
CT: control target
= control target key end

     0   :  { %8 = vsyncpa [#allocation4], 0  ;;  %s2469_s0 = inlined_call_operand.vmem [shape: bf16[512,128], index: 0, kind: input, shape index: {}]   ;;  %s2470_s1 = inlined_call_operand.hbm [shape: bf16[128,128], index: 1, kind: input, shape index: {}]   ;;  %s2471_s2 = inlined_call_operand.hbm [shape: f32[1,128], index: 2, kind: input, shape index: {}]   ;;  %s2472_s3 = inlined_call_operand.vmem [shape: bf16[512,128], index: 3, kind: output, shape index: {}]  }
   0x1   :  { %9 = vsyncpa [#allocation6], 0  ;;  %s2154_s12 = smov [#allocation3]   ;;  %s2106_s16 = scalar_lea.hbm %s2470_s1, 1024 }
   0x2   :  { %s17_s13 = sshll.u32 %s2154_s12, 4  ;;  %p2107_p0 = scmp.ne.s32.totalorder %s2470_s1, %s2106_s16  ;;  %s18_s13 = int_to_ptr.vmem [resolvable:$true] %s17_s13 }
   0x3   :  { %p2110_p1 = scmp.lt.u32.totalorder %s2106_s16, %s2470_s1 }
   0x5   :  { %p2112_p2 = pnand %p2110_p1, %p2107_p0 }
   0x7   :  { %2115 = shalt.err (!%p2112_p2)
}
   0x8   :  { %s2116_s21 = scalar_lea.vmem %s18_s13, 1024  ;;  %p2121_p4 = scmp.lt.s32.totalorder %s18_s13, %s18_s13 }
   0x9   :  { %p2117_p3 = scmp.ne.s32.totalorder %s18_s13, %s2116_s21  ;;  %p2122_p5 = scmp.lt.s32.totalorder %s2116_s21, %s2116_s21 }
   0xb   :  { %p2123_p6 = por %p2122_p5, %p2121_p4 }
   0xd   :  { %p2124_p7 = pnand %p2123_p6, %p2117_p3 }
   0xf   :  { %2127 = shalt.err (!%p2124_p7)
}
  0x10   :  { %s2155_s22 = smov 64   ;;  %s2156_s23 = smov 4  }
  0x11   :  { %23 = dma.hbm_to_vmem [thread:$0]  %s2470_s1, 1024, %s18_s13, [#allocation4], %s2155_s22, %s2155_s22, %s2156_s23  }
  0x12   :  { %s2157_s26 = smov [#allocation5]   ;;  %s2128_s30 = scalar_lea.hbm %s2471_s2, 16 }
  0x13   :  { %s30_s27 = sshll.u32 %s2157_s26, 4  ;;  %p2129_p8 = scmp.ne.s32.totalorder %s2471_s2, %s2128_s30  ;;  %s31_s27 = int_to_ptr.vmem [resolvable:$true] %s30_s27 }
  0x14   :  { %p2132_p9 = scmp.lt.u32.totalorder %s2128_s30, %s2471_s2 }
  0x16   :  { %p2134_p10 = pnand %p2132_p9, %p2129_p8 }
  0x18   :  { %2137 = shalt.err (!%p2134_p10)
}
  0x19   :  { %s2138_s8 = scalar_lea.vmem %s31_s27, 16  ;;  %s2142_s1 = scalar_lea.vmem %s31_s27, 32 }
  0x1a   :  { %p2139_p11 = scmp.ne.s32.totalorder %s31_s27, %s2138_s8  ;;  %p2143_p12 = scmp.lt.s32.totalorder %s31_s27, %s31_s27 }
  0x1b   :  { %p2144_p13 = scmp.lt.s32.totalorder %s2142_s1, %s2138_s8 }
  0x1d   :  { %p2145_p0 = por %p2144_p13, %p2143_p12 }
  0x1f   :  { %p2146_p1 = pnand %p2145_p0, %p2139_p11 }
  0x21   :  { %2149 = shalt.err (!%p2146_p1)
}
  0x22   :  { %33 = dma.hbm_to_vmem [thread:$0]  %s2471_s2, 16, %s31_s27, [#allocation6]  }
  0x23   :  { %2150 = dma.done.wait [#allocation4], 1024  }
  0x24   :  { %2151 = vsyncadd [#allocation4], 4294966272 }
  0x25   :  { %2152 = dma.done.wait [#allocation6], 16  }
  0x26   :  { %2153 = vsyncadd [#allocation6], 4294967280  ;;  %v2066_v0 = vld [vmem:[#allocation3] sm:$0xff]   ;;  %v2067_v1 = vld [vmem:[#allocation3 + $0x8] sm:$0xff]  }
  0x27   :  { %1966 = vmatprep.subr.bf16.mxu0 %v2066_v0  ;;  %2046 = vmatprep.subr.bf16.mxu1 %v2066_v0  ;;  %v2068_v2 = vld [vmem:[#allocation3 + $0x10] sm:$0xff]   ;;  %v2069_v3 = vld [vmem:[#allocation3 + $0x18] sm:$0xff]   ;;  %v2074_v4 = vld [vmem:[%s2469_s0] sm:$0xff]  }
  0x28   :  { %1967 = vmatpush3.bf16.msra.mxu0 %v2066_v0  ;;  %2054 = vmatpush3.bf16.msra.mxu1 %v2066_v0  ;;  %v2075_v5 = vld [vmem:[%s2469_s0 + $0x80] sm:$0xff]   ;;  %v2071_v7 = vld [vmem:[#allocation3 + $0x28] sm:$0xff]   ;;  %v2072_v8 = vld [vmem:[#allocation3 + $0x30] sm:$0xff]  }
  0x29   :  { %1968 = vmatprep.subr.bf16.mxu0 %v2067_v1  ;;  %2047 = vmatprep.subr.bf16.mxu1 %v2067_v1  ;;  %v2070_v6 = vld [vmem:[#allocation3 + $0x20] sm:$0xff]   ;;  %v2073_v9 = vld [vmem:[#allocation3 + $0x38] sm:$0xff]   ;;  %v2076_v10 = vld [vmem:[%s2469_s0 + $0x8] sm:$0xff]  }
  0x2a   :  { %1982 = vmatprep.mubr.bf16.mxu0 %v2074_v4  ;;  %2014 = vmatprep.mubr.bf16.mxu1 %v2075_v5  ;;  %v2077_v11 = vld [vmem:[%s2469_s0 + $0x88] sm:$0xff]   ;;  %v2078_v12 = vld [vmem:[%s2469_s0 + $0x10] sm:$0xff]   ;;  %v2080_v14 = vld [vmem:[%s2469_s0 + $0x18] sm:$0xff]  }
  0x2b   :  { %v2079_v13 = vld [vmem:[%s2469_s0 + $0x90] sm:$0xff]   ;;  %v2081_v15 = vld [vmem:[%s2469_s0 + $0x98] sm:$0xff]   ;;  %v2082_v16 = vld [vmem:[%s2469_s0 + $0x20] sm:$0xff]  }
  0x2c   :  { %1969 = vmatpush3.bf16.msra.mxu0 %v2067_v1  ;;  %2055 = vmatpush3.bf16.msra.mxu1 %v2067_v1  ;;  %v2083_v17 = vld [vmem:[%s2469_s0 + $0xa0] sm:$0xff]   ;;  %v2084_v18 = vld [vmem:[%s2469_s0 + $0x28] sm:$0xff]   ;;  %v2086_v20 = vld [vmem:[%s2469_s0 + $0x30] sm:$0xff]  }
  0x2d   :  { %1970 = vmatprep.subr.bf16.mxu0 %v2068_v2  ;;  %2048 = vmatprep.subr.bf16.mxu1 %v2068_v2  ;;  %v2085_v19 = vld [vmem:[%s2469_s0 + $0xa8] sm:$0xff]   ;;  %v2087_v21 = vld [vmem:[%s2469_s0 + $0xb0] sm:$0xff]   ;;  %v2088_v22 = vld [vmem:[%s2469_s0 + $0x38] sm:$0xff]  }
  0x2e   :  { %v2089_v23 = vld [vmem:[%s2469_s0 + $0xb8] sm:$0xff]   ;;  %v2090_v24 = vld [vmem:[%s2469_s0 + $0x40] sm:$0xff]   ;;  %v2092_v26 = vld [vmem:[%s2469_s0 + $0x48] sm:$0xff]  }
  0x2f   :  { %v2091_v25 = vld [vmem:[%s2469_s0 + $0xc0] sm:$0xff]   ;;  %v2093_v27 = vld [vmem:[%s2469_s0 + $0xc8] sm:$0xff]   ;;  %v2094_v28 = vld [vmem:[%s2469_s0 + $0x50] sm:$0xff]  }
  0x30   :  { %1971 = vmatpush3.bf16.msra.mxu0 %v2068_v2  ;;  %2056 = vmatpush3.bf16.msra.mxu1 %v2068_v2  ;;  %v2095_v29 = vld [vmem:[%s2469_s0 + $0xd0] sm:$0xff]   ;;  %v2096_v30 = vld [vmem:[%s2469_s0 + $0x58] sm:$0xff]   ;;  %v2098_v32 = vld [vmem:[%s2469_s0 + $0x60] sm:$0xff]  }
  0x31   :  { %1972 = vmatprep.subr.bf16.mxu0 %v2069_v3  ;;  %2049 = vmatprep.subr.bf16.mxu1 %v2069_v3  ;;  %v2097_v31 = vld [vmem:[%s2469_s0 + $0xd8] sm:$0xff]   ;;  %v2099_v33 = vld [vmem:[%s2469_s0 + $0xe0] sm:$0xff]   ;;  %v2100_v34 = vld [vmem:[%s2469_s0 + $0x68] sm:$0xff]  }
  0x32   :  { %v2101_v35 = vld [vmem:[%s2469_s0 + $0xe8] sm:$0xff]   ;;  %v2102_v36 = vld [vmem:[%s2469_s0 + $0x70] sm:$0xff]   ;;  %v2104_v38 = vld [vmem:[%s2469_s0 + $0x78] sm:$0xff]  }
  0x33   :  { %v2103_v37 = vld [vmem:[%s2469_s0 + $0xf0] sm:$0xff]   ;;  %v2105_v39 = vld [vmem:[%s2469_s0 + $0xf8] sm:$0xff]   ;;  %v2298_v40 = vld [vmem:[#allocation5] ss:$0 sm:$0xff] }
  0x34   :  { %1973 = vmatpush3.bf16.msra.mxu0 %v2069_v3  ;;  %2057 = vmatpush3.bf16.msra.mxu1 %v2069_v3 }
  0x35   :  { %1974 = vmatprep.subr.bf16.mxu0 %v2070_v6  ;;  %2050 = vmatprep.subr.bf16.mxu1 %v2070_v6 }
  0x38   :  { %1975 = vmatpush3.bf16.msra.mxu0 %v2070_v6  ;;  %2058 = vmatpush3.bf16.msra.mxu1 %v2070_v6 }
  0x39   :  { %1976 = vmatprep.subr.bf16.mxu0 %v2071_v7  ;;  %2051 = vmatprep.subr.bf16.mxu1 %v2071_v7 }
  0x3c   :  { %1977 = vmatpush3.bf16.msra.mxu0 %v2071_v7  ;;  %2059 = vmatpush3.bf16.msra.mxu1 %v2071_v7 }
  0x3d   :  { %1978 = vmatprep.subr.bf16.mxu0 %v2072_v8  ;;  %2052 = vmatprep.subr.bf16.mxu1 %v2072_v8 }
  0x40   :  { %1979 = vmatpush3.bf16.msra.mxu0 %v2072_v8  ;;  %2060 = vmatpush3.bf16.msra.mxu1 %v2072_v8 }
  0x41   :  { %1980 = vmatprep.subr.bf16.mxu0 %v2073_v9  ;;  %2053 = vmatprep.subr.bf16.mxu1 %v2073_v9 }
  0x44   :  { %1981 = vmatpush3.bf16.msra.mxu0 %v2073_v9  ;;  %2061 = vmatpush3.bf16.msra.mxu1 %v2073_v9 }
  0x47   :  { %1983 = vmatmul.mubr.bf16.vlgmr.msra.gmra.mrb[0].mxu0 %v2076_v10  ;;  %2015 = vmatmul.mubr.bf16.vlgmr.msra.gmra.mrb[0].mxu1 %v2077_v11 }
  0x48   :  { %1986 = vmatprep.mubr.bf16.mxu0 %v2078_v12  ;;  %2018 = vmatprep.mubr.bf16.mxu1 %v2079_v13 }
  0x4f   :  { %1987 = vmatmul.mubr.bf16.gmra.mrb[4].mxu0 %v2080_v14  ;;  %2019 = vmatmul.mubr.bf16.gmra.mrb[4].mxu1 %v2081_v15 }
  0x50   :  { %1990 = vmatprep.mubr.bf16.mxu0 %v2082_v16  ;;  %2022 = vmatprep.mubr.bf16.mxu1 %v2083_v17 }
  0x57   :  { %1991 = vmatmul.mubr.bf16.gmra.mrb[8].mxu0 %v2084_v18  ;;  %2023 = vmatmul.mubr.bf16.gmra.mrb[8].mxu1 %v2085_v19 }
  0x58   :  { %1994 = vmatprep.mubr.bf16.mxu0 %v2086_v20  ;;  %2026 = vmatprep.mubr.bf16.mxu1 %v2087_v21 }
  0x5f   :  { %1995 = vmatmul.mubr.bf16.gmra.mrb[12].mxu0 %v2088_v22  ;;  %2027 = vmatmul.mubr.bf16.gmra.mrb[12].mxu1 %v2089_v23 }
  0x60   :  { %1998 = vmatprep.mubr.bf16.mxu0 %v2090_v24  ;;  %2030 = vmatprep.mubr.bf16.mxu1 %v2091_v25 }
  0x67   :  { %1999 = vmatmul.mubr.bf16.gmra.mrb[16].mxu0 %v2092_v26  ;;  %2031 = vmatmul.mubr.bf16.gmra.mrb[16].mxu1 %v2093_v27 }
  0x68   :  { %2002 = vmatprep.mubr.bf16.mxu0 %v2094_v28  ;;  %2034 = vmatprep.mubr.bf16.mxu1 %v2095_v29 }
  0x6f   :  { %2003 = vmatmul.mubr.bf16.gmra.mrb[20].mxu0 %v2096_v30  ;;  %2035 = vmatmul.mubr.bf16.gmra.mrb[20].mxu1 %v2097_v31 }
  0x70   :  { %2006 = vmatprep.mubr.bf16.mxu0 %v2098_v32  ;;  %2038 = vmatprep.mubr.bf16.mxu1 %v2099_v33 }
  0x77   :  { %2007 = vmatmul.mubr.bf16.gmra.mrb[24].mxu0 %v2100_v34  ;;  %2039 = vmatmul.mubr.bf16.gmra.mrb[24].mxu1 %v2101_v35 }
  0x78   :  { %2010 = vmatprep.mubr.bf16.mxu0 %v2102_v36  ;;  %2042 = vmatprep.mubr.bf16.mxu1 %v2103_v37 }
  0x7f   :  { %2011 = vmatmul.mubr.bf16.gmra.mrb[28].mxu0 %v2104_v38  ;;  %2043 = vmatmul.mubr.bf16.gmra.mrb[28].mxu1 %v2105_v39 }
 0x11a   :  { %v1984_v41 = vpop.f32.mrb[0].mxu0  ;;  %v2016_v42 = vpop.f32.mrb[0].mxu1 }
 0x11b   :  { %v986_v43 = vadd.f32 %v1984_v41, %v2298_v40  ;;  %v1018_v44 = vadd.f32 %v2016_v42, %v2298_v40  ;;  %v527_v45 = vpop.f32.mrb[1].mxu0  ;;  %v655_v46 = vpop.f32.mrb[1].mxu1 }
 0x11c   :  { %v984_v47 = vadd.f32 %v2298_v40, %v527_v45  ;;  %v1016_v48 = vadd.f32 %v2298_v40, %v655_v46  ;;  %v1985_v49 = vpop.f32.mrb[2].mxu0  ;;  %v2017_v50 = vpop.f32.mrb[2].mxu1 }
 0x11d   :  { %vm1050_vm0 = vcmp.ge.f32.partialorder %v986_v43, 0.0  ;;  %v1114_v51 = vmul.f32 0.2, %v986_v43  ;;  %vm1082_vm1 = vcmp.ge.f32.partialorder %v1018_v44, 0.0  ;;  %v1146_v52 = vmul.f32 0.2, %v1018_v44 }
 0x11e   :  { %vm1048_vm2 = vcmp.ge.f32.partialorder %v984_v47, 0.0  ;;  %v1112_v53 = vmul.f32 0.2, %v984_v47  ;;  %vm1080_vm3 = vcmp.ge.f32.partialorder %v1016_v48, 0.0  ;;  %v1144_v54 = vmul.f32 0.2, %v1016_v48 }
 0x11f   :  { %v987_v55 = vadd.f32 %v1985_v49, %v2298_v40  ;;  %v1019_v56 = vadd.f32 %v2017_v50, %v2298_v40  ;;  %v530_v57 = vpop.f32.mrb[3].mxu0  ;;  %v658_v58 = vpop.f32.mrb[3].mxu1  ;;  %v1178_v59 = vsel %vm1050_vm0, %v986_v43, %v1114_v51  ;;  %v1210_v60 = vsel %vm1082_vm1, %v1018_v44, %v1146_v52 }
 0x120   :  { %v985_v61 = vadd.f32 %v2298_v40, %v530_v57  ;;  %v1017_v62 = vadd.f32 %v2298_v40, %v658_v58  ;;  %v1176_v3 = vsel %vm1048_vm2, %v984_v47, %v1112_v53  ;;  %v1208_v4 = vsel %vm1080_vm3, %v1016_v48, %v1144_v54 }
 0x121   :  { %vm1051_vm4 = vcmp.ge.f32.partialorder %v987_v55, 0.0  ;;  %v1115_v63 = vmul.f32 0.2, %v987_v55  ;;  %vm1083_vm5 = vcmp.ge.f32.partialorder %v1019_v56, 0.0  ;;  %v1147_v0 = vmul.f32 0.2, %v1019_v56 }
 0x122   :  { %vm1049_vm6 = vcmp.ge.f32.partialorder %v985_v61, 0.0  ;;  %v1113_v1 = vmul.f32 0.2, %v985_v61  ;;  %vm1081_vm7 = vcmp.ge.f32.partialorder %v1017_v62, 0.0  ;;  %v1145_v2 = vmul.f32 0.2, %v1017_v62 }
 0x123   :  { %v1179_v5 = vsel %vm1051_vm4, %v987_v55, %v1115_v63  ;;  %v1211_v6 = vsel %vm1083_vm5, %v1019_v56, %v1147_v0  ;;  %v1988_v7 = vpop.f32.mrb[4].mxu0  ;;  %v2020_v8 = vpop.f32.mrb[4].mxu1 }
 0x124   :  { %v1743_v9 = vpack.c.bf16 %v1179_v5, %v1178_v59  ;;  %v1823_v10 = vpack.c.bf16 %v1211_v6, %v1210_v60  ;;  %v1177_v11 = vsel %vm1049_vm6, %v985_v61, %v1113_v1  ;;  %v1209_v12 = vsel %vm1081_vm7, %v1017_v62, %v1145_v2  ;;  %v543_v13 = vpop.f32.mrb[5].mxu0  ;;  %v671_v14 = vpop.f32.mrb[5].mxu1 }
 0x125   :  { %v1738_v15 = vpack.c.bf16 %v1177_v11, %v1176_v3  ;;  %v1818_v16 = vpack.c.bf16 %v1209_v12, %v1208_v4  ;;  %v990_v17 = vadd.f32 %v1988_v7, %v2298_v40  ;;  %v1022_v18 = vadd.f32 %v2020_v8, %v2298_v40  ;;  %v1989_v19 = vpop.f32.mrb[6].mxu0  ;;  %v2021_v20 = vpop.f32.mrb[6].mxu1 }
 0x126   :  { %1895 = vst [vmem:[%s2472_s3 + $0x8] sm:$0xff] %v1743_v9   ;;  %1911 = vst [vmem:[%s2472_s3 + $0x88] sm:$0xff] %v1823_v10   ;;  %v988_v21 = vadd.f32 %v2298_v40, %v543_v13  ;;  %v1020_v22 = vadd.f32 %v2298_v40, %v671_v14  ;;  %v991_v23 = vadd.f32 %v1989_v19, %v2298_v40  ;;  %v546_v25 = vpop.f32.mrb[7].mxu0  ;;  %v674_v26 = vpop.f32.mrb[7].mxu1 }
 0x127   :  { %v1023_v24 = vadd.f32 %v2021_v20, %v2298_v40  ;;  %1739 = vst [vmem:[%s2472_s3] sm:$0xff] %v1738_v15   ;;  %1910 = vst [vmem:[%s2472_s3 + $0x80] sm:$0xff] %v1818_v16   ;;  %vm1054_vm8 = vcmp.ge.f32.partialorder %v990_v17, 0.0  ;;  %v1118_v27 = vmul.f32 0.2, %v990_v17  ;;  %vm1086_vm9 = vcmp.ge.f32.partialorder %v1022_v18, 0.0 }
 0x128   :  { %v1150_v28 = vmul.f32 0.2, %v1022_v18  ;;  %vm1052_vm10 = vcmp.ge.f32.partialorder %v988_v21, 0.0  ;;  %v1116_v29 = vmul.f32 0.2, %v988_v21  ;;  %vm1084_vm11 = vcmp.ge.f32.partialorder %v1020_v22, 0.0 }
 0x129   :  { %v1148_v30 = vmul.f32 0.2, %v1020_v22  ;;  %v1182_v31 = vsel %vm1054_vm8, %v990_v17, %v1118_v27  ;;  %vm1055_vm12 = vcmp.ge.f32.partialorder %v991_v23, 0.0  ;;  %v1119_v33 = vmul.f32 0.2, %v991_v23 }
 0x12a   :  { %v1214_v32 = vsel %vm1086_vm9, %v1022_v18, %v1150_v28  ;;  %v1180_v34 = vsel %vm1052_vm10, %v988_v21, %v1116_v29  ;;  %vm1087_vm13 = vcmp.ge.f32.partialorder %v1023_v24, 0.0  ;;  %v1151_v36 = vmul.f32 0.2, %v1023_v24  ;;  %v1992_v37 = vpop.f32.mrb[8].mxu0  ;;  %v2024_v38 = vpop.f32.mrb[8].mxu1 }
 0x12b   :  { %v1212_v35 = vsel %vm1084_vm11, %v1020_v22, %v1148_v30  ;;  %v1183_v39 = vsel %vm1055_vm12, %v991_v23, %v1119_v33  ;;  %v989_v41 = vadd.f32 %v2298_v40, %v546_v25  ;;  %v1021_v42 = vadd.f32 %v2298_v40, %v674_v26  ;;  %v559_v44 = vpop.f32.mrb[9].mxu0  ;;  %v687_v45 = vpop.f32.mrb[9].mxu1 }
 0x12c   :  { %v994_v43 = vadd.f32 %v1992_v37, %v2298_v40  ;;  %v1753_v46 = vpack.c.bf16 %v1183_v39, %v1182_v31  ;;  %v1215_v47 = vsel %vm1087_vm13, %v1023_v24, %v1151_v36  ;;  %v1026_v48 = vadd.f32 %v2024_v38, %v2298_v40  ;;  %v1993_v50 = vpop.f32.mrb[10].mxu0  ;;  %v2025_v51 = vpop.f32.mrb[10].mxu1 }
 0x12d   :  { %v992_v49 = vadd.f32 %v2298_v40, %v559_v44  ;;  %v1833_v52 = vpack.c.bf16 %v1215_v47, %v1214_v32  ;;  %vm1053_vm14 = vcmp.ge.f32.partialorder %v989_v41, 0.0  ;;  %v1117_v53 = vmul.f32 0.2, %v989_v41  ;;  %v562_v54 = vpop.f32.mrb[11].mxu0  ;;  %v690_v55 = vpop.f32.mrb[11].mxu1 }
 0x12e   :  { %vm1085_vm15 = vcmp.ge.f32.partialorder %v1021_v42, 0.0  ;;  %1897 = vst [vmem:[%s2472_s3 + $0x18] sm:$0xff] %v1753_v46   ;;  %v1149_v56 = vmul.f32 0.2, %v1021_v42  ;;  %vm1058_vm0 = vcmp.ge.f32.partialorder %v994_v43, 0.0  ;;  %vm1090_vm1 = vcmp.ge.f32.partialorder %v1026_v48, 0.0 }
 0x12f   :  { %v1122_v57 = vmul.f32 0.2, %v994_v43  ;;  %1913 = vst [vmem:[%s2472_s3 + $0x98] sm:$0xff] %v1833_v52   ;;  %v1181_v58 = vsel %vm1053_vm14, %v989_v41, %v1117_v53  ;;  %v1154_v59 = vmul.f32 0.2, %v1026_v48  ;;  %vm1056_vm2 = vcmp.ge.f32.partialorder %v992_v49, 0.0 }
 0x130   :  { %v1120_v60 = vmul.f32 0.2, %v992_v49  ;;  %v1748_v61 = vpack.c.bf16 %v1181_v58, %v1180_v34  ;;  %v1213_v62 = vsel %vm1085_vm15, %v1021_v42, %v1149_v56  ;;  %v1024_v0 = vadd.f32 %v2298_v40, %v687_v45 }
 0x131   :  { %v1186_v63 = vsel %vm1058_vm0, %v994_v43, %v1122_v57  ;;  %v1828_v1 = vpack.c.bf16 %v1213_v62, %v1212_v35  ;;  %v1218_v2 = vsel %vm1090_vm1, %v1026_v48, %v1154_v59  ;;  %v995_v4 = vadd.f32 %v1993_v50, %v2298_v40 }
 0x132   :  { %v1184_v3 = vsel %vm1056_vm2, %v992_v49, %v1120_v60  ;;  %1896 = vst [vmem:[%s2472_s3 + $0x10] sm:$0xff] %v1748_v61   ;;  %vm1088_vm3 = vcmp.ge.f32.partialorder %v1024_v0, 0.0  ;;  %v1152_v5 = vmul.f32 0.2, %v1024_v0  ;;  %v1027_v6 = vadd.f32 %v2025_v51, %v2298_v40  ;;  %v1996_v8 = vpop.f32.mrb[12].mxu0  ;;  %v2028_v9 = vpop.f32.mrb[12].mxu1 }
 0x133   :  { %v993_v7 = vadd.f32 %v2298_v40, %v562_v54  ;;  %1912 = vst [vmem:[%s2472_s3 + $0x90] sm:$0xff] %v1828_v1   ;;  %vm1059_vm4 = vcmp.ge.f32.partialorder %v995_v4, 0.0  ;;  %v1123_v10 = vmul.f32 0.2, %v995_v4  ;;  %v1025_v11 = vadd.f32 %v2298_v40, %v690_v55  ;;  %v575_v13 = vpop.f32.mrb[13].mxu0  ;;  %v703_v14 = vpop.f32.mrb[13].mxu1 }
 0x134   :  { %v998_v12 = vadd.f32 %v1996_v8, %v2298_v40  ;;  %v1216_v15 = vsel %vm1088_vm3, %v1024_v0, %v1152_v5  ;;  %vm1091_vm5 = vcmp.ge.f32.partialorder %v1027_v6, 0.0  ;;  %v1155_v16 = vmul.f32 0.2, %v1027_v6  ;;  %v1997_v17 = vpop.f32.mrb[14].mxu0  ;;  %v2029_v18 = vpop.f32.mrb[14].mxu1 }
 0x135   :  { %vm1057_vm6 = vcmp.ge.f32.partialorder %v993_v7, 0.0  ;;  %v1187_v19 = vsel %vm1059_vm4, %v995_v4, %v1123_v10  ;;  %v1121_v20 = vmul.f32 0.2, %v993_v7  ;;  %vm1089_vm7 = vcmp.ge.f32.partialorder %v1025_v11, 0.0  ;;  %v578_v22 = vpop.f32.mrb[15].mxu0  ;;  %v706_v26 = vpop.f32.mrb[15].mxu1 }
 0x136   :  { %v1153_v21 = vmul.f32 0.2, %v1025_v11  ;;  %v1763_v23 = vpack.c.bf16 %v1187_v19, %v1186_v63  ;;  %v1219_v24 = vsel %vm1091_vm5, %v1027_v6, %v1155_v16  ;;  %vm1062_vm8 = vcmp.ge.f32.partialorder %v998_v12, 0.0 }
 0x137   :  { %v1126_v25 = vmul.f32 0.2, %v998_v12  ;;  %v1843_v27 = vpack.c.bf16 %v1219_v24, %v1218_v2  ;;  %v1185_v28 = vsel %vm1057_vm6, %v993_v7, %v1121_v20  ;;  %v1030_v30 = vadd.f32 %v2028_v9, %v2298_v40 }
 0x138   :  { %v1217_v29 = vsel %vm1089_vm7, %v1025_v11, %v1153_v21  ;;  %1899 = vst [vmem:[%s2472_s3 + $0x28] sm:$0xff] %v1763_v23   ;;  %v1758_v31 = vpack.c.bf16 %v1185_v28, %v1184_v3  ;;  %v996_v34 = vadd.f32 %v2298_v40, %v575_v13  ;;  %v1028_v36 = vadd.f32 %v2298_v40, %v703_v14 }
 0x139   :  { %v1838_v32 = vpack.c.bf16 %v1217_v29, %v1216_v15  ;;  %v1190_v33 = vsel %vm1062_vm8, %v998_v12, %v1126_v25  ;;  %1915 = vst [vmem:[%s2472_s3 + $0xa8] sm:$0xff] %v1843_v27   ;;  %vm1094_vm9 = vcmp.ge.f32.partialorder %v1030_v30, 0.0  ;;  %v1158_v35 = vmul.f32 0.2, %v1030_v30 }
 0x13a   :  { %v999_v37 = vadd.f32 %v1997_v17, %v2298_v40  ;;  %1898 = vst [vmem:[%s2472_s3 + $0x20] sm:$0xff] %v1758_v31   ;;  %vm1060_vm10 = vcmp.ge.f32.partialorder %v996_v34, 0.0  ;;  %v1124_v38 = vmul.f32 0.2, %v996_v34  ;;  %v1031_v39 = vadd.f32 %v2029_v18, %v2298_v40  ;;  %v2000_v42 = vpop.f32.mrb[16].mxu0  ;;  %v2032_v43 = vpop.f32.mrb[16].mxu1 }
 0x13b   :  { %1914 = vst [vmem:[%s2472_s3 + $0xa0] sm:$0xff] %v1838_v32   ;;  %v997_v41 = vadd.f32 %v2298_v40, %v578_v22  ;;  %v1222_v44 = vsel %vm1094_vm9, %v1030_v30, %v1158_v35  ;;  %vm1092_vm11 = vcmp.ge.f32.partialorder %v1028_v36, 0.0  ;;  %v1156_v45 = vmul.f32 0.2, %v1028_v36  ;;  %v591_v46 = vpop.f32.mrb[17].mxu0  ;;  %v719_v47 = vpop.f32.mrb[17].mxu1 }
 0x13c   :  { %vm1063_vm12 = vcmp.ge.f32.partialorder %v999_v37, 0.0  ;;  %v1188_v48 = vsel %vm1060_vm10, %v996_v34, %v1124_v38  ;;  %v1127_v49 = vmul.f32 0.2, %v999_v37  ;;  %vm1095_vm13 = vcmp.ge.f32.partialorder %v1031_v39, 0.0  ;;  %v2001_v51 = vpop.f32.mrb[18].mxu0  ;;  %v2033_v55 = vpop.f32.mrb[18].mxu1 }
 0x13d   :  { %v1159_v50 = vmul.f32 0.2, %v1031_v39  ;;  %v1220_v52 = vsel %vm1092_vm11, %v1028_v36, %v1156_v45  ;;  %vm1061_vm14 = vcmp.ge.f32.partialorder %v997_v41, 0.0  ;;  %v1125_v53 = vmul.f32 0.2, %v997_v41  ;;  %v594_v56 = vpop.f32.mrb[19].mxu0 }
 0x13e   :  { %v1029_v54 = vadd.f32 %v2298_v40, %v706_v26  ;;  %v1191_v57 = vsel %vm1063_vm12, %v999_v37, %v1127_v49  ;;  %v1002_v59 = vadd.f32 %v2000_v42, %v2298_v40  ;;  %v1034_v60 = vadd.f32 %v2032_v43, %v2298_v40  ;;  %v722_v61 = vpop.f32.mrb[19].mxu1 }
 0x13f   :  { %v1223_v58 = vsel %vm1095_vm13, %v1031_v39, %v1159_v50  ;;  %v1773_v62 = vpack.c.bf16 %v1191_v57, %v1190_v33  ;;  %v1189_v0 = vsel %vm1061_vm14, %v997_v41, %v1125_v53  ;;  %v1000_v5 = vadd.f32 %v2298_v40, %v591_v46 }
 0x140   :  { %v1853_v63 = vpack.c.bf16 %v1223_v58, %v1222_v44  ;;  %vm1093_vm15 = vcmp.ge.f32.partialorder %v1029_v54, 0.0  ;;  %v1768_v1 = vpack.c.bf16 %v1189_v0, %v1188_v48  ;;  %v1157_v2 = vmul.f32 0.2, %v1029_v54 }
 0x141   :  { %vm1066_vm0 = vcmp.ge.f32.partialorder %v1002_v59, 0.0  ;;  %v1130_v3 = vmul.f32 0.2, %v1002_v59  ;;  %1901 = vst [vmem:[%s2472_s3 + $0x38] sm:$0xff] %v1773_v62   ;;  %vm1098_vm1 = vcmp.ge.f32.partialorder %v1034_v60, 0.0  ;;  %v1032_v6 = vadd.f32 %v2298_v40, %v719_v47 }
 0x142   :  { %1917 = vst [vmem:[%s2472_s3 + $0xb8] sm:$0xff] %v1853_v63   ;;  %v1162_v4 = vmul.f32 0.2, %v1034_v60  ;;  %1900 = vst [vmem:[%s2472_s3 + $0x30] sm:$0xff] %v1768_v1   ;;  %v1221_v7 = vsel %vm1093_vm15, %v1029_v54, %v1157_v2  ;;  %v1003_v9 = vadd.f32 %v2001_v51, %v2298_v40  ;;  %v1035_v10 = vadd.f32 %v2033_v55, %v2298_v40  ;;  %v2004_v11 = vpop.f32.mrb[20].mxu0  ;;  %v2036_v12 = vpop.f32.mrb[20].mxu1 }
 0x143   :  { %v1194_v8 = vsel %vm1066_vm0, %v1002_v59, %v1130_v3  ;;  %v1848_v13 = vpack.c.bf16 %v1221_v7, %v1220_v52  ;;  %vm1064_vm2 = vcmp.ge.f32.partialorder %v1000_v5, 0.0  ;;  %v1128_v15 = vmul.f32 0.2, %v1000_v5  ;;  %v607_v16 = vpop.f32.mrb[21].mxu0  ;;  %v735_v17 = vpop.f32.mrb[21].mxu1 }
 0x144   :  { %v1226_v14 = vsel %vm1098_vm1, %v1034_v60, %v1162_v4  ;;  %vm1096_vm3 = vcmp.ge.f32.partialorder %v1032_v6, 0.0  ;;  %v1160_v18 = vmul.f32 0.2, %v1032_v6  ;;  %vm1067_vm4 = vcmp.ge.f32.partialorder %v1003_v9, 0.0  ;;  %v2005_v23 = vpop.f32.mrb[22].mxu0  ;;  %v2037_v24 = vpop.f32.mrb[22].mxu1 }
 0x145   :  { %v1131_v19 = vmul.f32 0.2, %v1003_v9  ;;  %1916 = vst [vmem:[%s2472_s3 + $0xb0] sm:$0xff] %v1848_v13   ;;  %v1192_v20 = vsel %vm1064_vm2, %v1000_v5, %v1128_v15  ;;  %vm1099_vm5 = vcmp.ge.f32.partialorder %v1035_v10, 0.0  ;;  %v1163_v21 = vmul.f32 0.2, %v1035_v10 }
 0x146   :  { %v1001_v22 = vadd.f32 %v2298_v40, %v594_v56  ;;  %v1224_v25 = vsel %vm1096_vm3, %v1032_v6, %v1160_v18  ;;  %v1033_v27 = vadd.f32 %v2298_v40, %v722_v61  ;;  %v1006_v28 = vadd.f32 %v2004_v11, %v2298_v40  ;;  %v610_v29 = vpop.f32.mrb[23].mxu0  ;;  %v738_v30 = vpop.f32.mrb[23].mxu1 }
 0x147   :  { %v1195_v26 = vsel %vm1067_vm4, %v1003_v9, %v1131_v19  ;;  %v1227_v32 = vsel %vm1099_vm5, %v1035_v10, %v1163_v21  ;;  %v1038_v38 = vadd.f32 %v2036_v12, %v2298_v40  ;;  %v1004_v39 = vadd.f32 %v2298_v40, %v607_v16 }
 0x148   :  { %v1783_v31 = vpack.c.bf16 %v1195_v26, %v1194_v8  ;;  %vm1065_vm6 = vcmp.ge.f32.partialorder %v1001_v22, 0.0  ;;  %v1129_v33 = vmul.f32 0.2, %v1001_v22  ;;  %v1863_v34 = vpack.c.bf16 %v1227_v32, %v1226_v14 }
 0x149   :  { %vm1097_vm7 = vcmp.ge.f32.partialorder %v1033_v27, 0.0  ;;  %v1161_v35 = vmul.f32 0.2, %v1033_v27  ;;  %vm1070_vm8 = vcmp.ge.f32.partialorder %v1006_v28, 0.0  ;;  %v1134_v37 = vmul.f32 0.2, %v1006_v28 }
 0x14a   :  { %1903 = vst [vmem:[%s2472_s3 + $0x48] sm:$0xff] %v1783_v31   ;;  %v1193_v36 = vsel %vm1065_vm6, %v1001_v22, %v1129_v33  ;;  %1919 = vst [vmem:[%s2472_s3 + $0xc8] sm:$0xff] %v1863_v34   ;;  %v1036_v43 = vadd.f32 %v2298_v40, %v735_v17  ;;  %v1007_v44 = vadd.f32 %v2005_v23, %v2298_v40  ;;  %v2008_v45 = vpop.f32.mrb[24].mxu0  ;;  %v2040_v46 = vpop.f32.mrb[24].mxu1  ;;  %vm1102_vm9 = vcmp.ge.f32.partialorder %v1038_v38, 0.0 }
 0x14b   :  { %v1778_v41 = vpack.c.bf16 %v1193_v36, %v1192_v20  ;;  %v1225_v42 = vsel %vm1097_vm7, %v1033_v27, %v1161_v35  ;;  %v1166_v48 = vmul.f32 0.2, %v1038_v38  ;;  %v623_v49 = vpop.f32.mrb[25].mxu0  ;;  %v751_v50 = vpop.f32.mrb[25].mxu1  ;;  %v1198_v51 = vsel %vm1070_vm8, %v1006_v28, %v1134_v37 }
 0x14c   :  { %v1858_v47 = vpack.c.bf16 %v1225_v42, %v1224_v25  ;;  %vm1068_vm10 = vcmp.ge.f32.partialorder %v1004_v39, 0.0  ;;  %v1132_v52 = vmul.f32 0.2, %v1004_v39  ;;  %v1164_v53 = vmul.f32 0.2, %v1036_v43  ;;  %v2009_v56 = vpop.f32.mrb[26].mxu0 }
 0x14d   :  { %1902 = vst [vmem:[%s2472_s3 + $0x40] sm:$0xff] %v1778_v41   ;;  %vm1100_vm11 = vcmp.ge.f32.partialorder %v1036_v43, 0.0  ;;  %vm1071_vm12 = vcmp.ge.f32.partialorder %v1007_v44, 0.0  ;;  %v1135_v54 = vmul.f32 0.2, %v1007_v44  ;;  %v1039_v55 = vadd.f32 %v2037_v24, %v2298_v40  ;;  %v2041_v57 = vpop.f32.mrb[26].mxu1 }
 0x14e   :  { %1918 = vst [vmem:[%s2472_s3 + $0xc0] sm:$0xff] %v1858_v47   ;;  %v1230_v58 = vsel %vm1102_vm9, %v1038_v38, %v1166_v48  ;;  %v1196_v59 = vsel %vm1068_vm10, %v1004_v39, %v1132_v52  ;;  %v1005_v60 = vadd.f32 %v2298_v40, %v610_v29  ;;  %v1037_v61 = vadd.f32 %v2298_v40, %v738_v30  ;;  %v626_v62 = vpop.f32.mrb[27].mxu0  ;;  %v754_v63 = vpop.f32.mrb[27].mxu1 }
 0x14f   :  { %v1199_v0 = vsel %vm1071_vm12, %v1007_v44, %v1135_v54  ;;  %vm1103_vm13 = vcmp.ge.f32.partialorder %v1039_v55, 0.0  ;;  %v1167_v1 = vmul.f32 0.2, %v1039_v55  ;;  %v1010_v2 = vadd.f32 %v2008_v45, %v2298_v40 }
 0x150   :  { %v1793_v3 = vpack.c.bf16 %v1199_v0, %v1198_v51  ;;  %vm1069_vm14 = vcmp.ge.f32.partialorder %v1005_v60, 0.0  ;;  %v1133_v4 = vmul.f32 0.2, %v1005_v60  ;;  %vm1101_vm15 = vcmp.ge.f32.partialorder %v1037_v61, 0.0 }
 0x151   :  { %v1231_v5 = vsel %vm1103_vm13, %v1039_v55, %v1167_v1  ;;  %v1165_v6 = vmul.f32 0.2, %v1037_v61  ;;  %vm1074_vm0 = vcmp.ge.f32.partialorder %v1010_v2, 0.0  ;;  %v1138_v7 = vmul.f32 0.2, %v1010_v2 }
 0x152   :  { %1905 = vst [vmem:[%s2472_s3 + $0x58] sm:$0xff] %v1793_v3   ;;  %v1873_v8 = vpack.c.bf16 %v1231_v5, %v1230_v58  ;;  %v1197_v9 = vsel %vm1069_vm14, %v1005_v60, %v1133_v4  ;;  %v1042_v10 = vadd.f32 %v2040_v46, %v2298_v40  ;;  %v1008_v11 = vadd.f32 %v2298_v40, %v623_v49  ;;  %v2012_v12 = vpop.f32.mrb[28].mxu0  ;;  %v2044_v13 = vpop.f32.mrb[28].mxu1 }
 0x153   :  { %v1228_v14 = vsel %vm1100_vm11, %v1036_v43, %v1164_v53  ;;  %v1788_v15 = vpack.c.bf16 %v1197_v9, %v1196_v59  ;;  %v1229_v16 = vsel %vm1101_vm15, %v1037_v61, %v1165_v6  ;;  %v1040_v17 = vadd.f32 %v2298_v40, %v751_v50  ;;  %v639_v18 = vpop.f32.mrb[29].mxu0  ;;  %v767_v19 = vpop.f32.mrb[29].mxu1 }
 0x154   :  { %1921 = vst [vmem:[%s2472_s3 + $0xd8] sm:$0xff] %v1873_v8   ;;  %v1868_v20 = vpack.c.bf16 %v1229_v16, %v1228_v14  ;;  %vm1106_vm1 = vcmp.ge.f32.partialorder %v1042_v10, 0.0  ;;  %v1170_v21 = vmul.f32 0.2, %v1042_v10  ;;  %vm1072_vm2 = vcmp.ge.f32.partialorder %v1008_v11, 0.0  ;;  %v2013_v22 = vpop.f32.mrb[30].mxu0 }
 0x155   :  { %v2045_v23 = vpop.f32.mrb[30].mxu1  ;;  %1904 = vst [vmem:[%s2472_s3 + $0x50] sm:$0xff] %v1788_v15   ;;  %v1202_v24 = vsel %vm1074_vm0, %v1010_v2, %v1138_v7  ;;  %v1136_v25 = vmul.f32 0.2, %v1008_v11  ;;  %vm1104_vm3 = vcmp.ge.f32.partialorder %v1040_v17, 0.0  ;;  %v1011_v26 = vadd.f32 %v2009_v56, %v2298_v40  ;;  %v642_v27 = vpop.f32.mrb[31].mxu0 }
 0x156   :  { %1920 = vst [vmem:[%s2472_s3 + $0xd0] sm:$0xff] %v1868_v20   ;;  %v1168_v28 = vmul.f32 0.2, %v1040_v17  ;;  %v1043_v29 = vadd.f32 %v2041_v57, %v2298_v40  ;;  %v1009_v30 = vadd.f32 %v2298_v40, %v626_v62  ;;  %v1041_v31 = vadd.f32 %v2298_v40, %v754_v63  ;;  %v770_v32 = vpop.f32.mrb[31].mxu1 }
 0x157   :  { %v1234_v33 = vsel %vm1106_vm1, %v1042_v10, %v1170_v21  ;;  %v1200_v34 = vsel %vm1072_vm2, %v1008_v11, %v1136_v25  ;;  %vm1075_vm4 = vcmp.ge.f32.partialorder %v1011_v26, 0.0  ;;  %v1139_v35 = vmul.f32 0.2, %v1011_v26 }
 0x158   :  { %vm1107_vm5 = vcmp.ge.f32.partialorder %v1043_v29, 0.0  ;;  %v1171_v36 = vmul.f32 0.2, %v1043_v29  ;;  %vm1073_vm6 = vcmp.ge.f32.partialorder %v1009_v30, 0.0  ;;  %v1137_v37 = vmul.f32 0.2, %v1009_v30 }
 0x159   :  { %v1203_v38 = vsel %vm1075_vm4, %v1011_v26, %v1139_v35  ;;  %vm1105_vm7 = vcmp.ge.f32.partialorder %v1041_v31, 0.0  ;;  %v1169_v39 = vmul.f32 0.2, %v1041_v31  ;;  %v1014_v41 = vadd.f32 %v2012_v12, %v2298_v40 }
 0x15a   :  { %v1803_v42 = vpack.c.bf16 %v1203_v38, %v1202_v24  ;;  %v1235_v43 = vsel %vm1107_vm5, %v1043_v29, %v1171_v36  ;;  %v1201_v44 = vsel %vm1073_vm6, %v1009_v30, %v1137_v37  ;;  %v1046_v45 = vadd.f32 %v2044_v13, %v2298_v40 }
 0x15b   :  { %v1232_v46 = vsel %vm1104_vm3, %v1040_v17, %v1168_v28  ;;  %v1883_v47 = vpack.c.bf16 %v1235_v43, %v1234_v33  ;;  %v1798_v48 = vpack.c.bf16 %v1201_v44, %v1200_v34  ;;  %v1233_v49 = vsel %vm1105_vm7, %v1041_v31, %v1169_v39 }
 0x15c   :  { %1907 = vst [vmem:[%s2472_s3 + $0x68] sm:$0xff] %v1803_v42   ;;  %v1878_v50 = vpack.c.bf16 %v1233_v49, %v1232_v46  ;;  %vm1078_vm8 = vcmp.ge.f32.partialorder %v1014_v41, 0.0  ;;  %v1142_v51 = vmul.f32 0.2, %v1014_v41  ;;  %v1174_v52 = vmul.f32 0.2, %v1046_v45 }
 0x15d   :  { %1923 = vst [vmem:[%s2472_s3 + $0xe8] sm:$0xff] %v1883_v47   ;;  %1906 = vst [vmem:[%s2472_s3 + $0x60] sm:$0xff] %v1798_v48   ;;  %v1012_v53 = vadd.f32 %v2298_v40, %v639_v18  ;;  %v1044_v54 = vadd.f32 %v2298_v40, %v767_v19  ;;  %v1015_v55 = vadd.f32 %v2013_v22, %v2298_v40  ;;  %vm1110_vm9 = vcmp.ge.f32.partialorder %v1046_v45, 0.0 }
 0x15e   :  { %v1047_v56 = vadd.f32 %v2045_v23, %v2298_v40  ;;  %1922 = vst [vmem:[%s2472_s3 + $0xe0] sm:$0xff] %v1878_v50   ;;  %v1013_v57 = vadd.f32 %v2298_v40, %v642_v27  ;;  %v1045_v58 = vadd.f32 %v2298_v40, %v770_v32  ;;  %v1206_v59 = vsel %vm1078_vm8, %v1014_v41, %v1142_v51 }
 0x15f   :  { %vm1076_vm10 = vcmp.ge.f32.partialorder %v1012_v53, 0.0  ;;  %v1140_v60 = vmul.f32 0.2, %v1012_v53  ;;  %v1172_v61 = vmul.f32 0.2, %v1044_v54  ;;  %vm1079_vm11 = vcmp.ge.f32.partialorder %v1015_v55, 0.0 }
 0x160   :  { %v1143_v62 = vmul.f32 0.2, %v1015_v55  ;;  %vm1111_vm12 = vcmp.ge.f32.partialorder %v1047_v56, 0.0  ;;  %v1175_v63 = vmul.f32 0.2, %v1047_v56  ;;  %v1238_v0 = vsel %vm1110_vm9, %v1046_v45, %v1174_v52 }
 0x161   :  { %vm1108_vm13 = vcmp.ge.f32.partialorder %v1044_v54, 0.0  ;;  %vm1077_vm14 = vcmp.ge.f32.partialorder %v1013_v57, 0.0  ;;  %v1141_v1 = vmul.f32 0.2, %v1013_v57  ;;  %vm1109_vm15 = vcmp.ge.f32.partialorder %v1045_v58, 0.0 }
 0x162   :  { %v1207_v2 = vsel %vm1079_vm11, %v1015_v55, %v1143_v62  ;;  %v1239_v3 = vsel %vm1111_vm12, %v1047_v56, %v1175_v63  ;;  %v1173_v4 = vmul.f32 0.2, %v1045_v58  ;;  %v1204_v5 = vsel %vm1076_vm10, %v1012_v53, %v1140_v60 }
 0x163   :  { %v1813_v6 = vpack.c.bf16 %v1207_v2, %v1206_v59  ;;  %v1893_v7 = vpack.c.bf16 %v1239_v3, %v1238_v0  ;;  %v1205_v40 = vsel %vm1077_vm14, %v1013_v57, %v1141_v1  ;;  %v1236_v8 = vsel %vm1108_vm13, %v1044_v54, %v1172_v61 }
 0x164   :  { %v1808_v9 = vpack.c.bf16 %v1205_v40, %v1204_v5  ;;  %v1237_v10 = vsel %vm1109_vm15, %v1045_v58, %v1173_v4 }
 0x165   :  { %1909 = vst [vmem:[%s2472_s3 + $0x78] sm:$0xff] %v1813_v6   ;;  %1925 = vst [vmem:[%s2472_s3 + $0xf8] sm:$0xff] %v1893_v7   ;;  %v1888_v11 = vpack.c.bf16 %v1237_v10, %v1236_v8 }
 0x166   :  { %1908 = vst [vmem:[%s2472_s3 + $0x70] sm:$0xff] %v1808_v9  }
 0x167   :  { %1924 = vst [vmem:[%s2472_s3 + $0xf0] sm:$0xff] %v1888_v11  }
 0x168   :  { %1564 = vsyncpa [#allocation4], 1 }
 0x169   :  { %1565 = vsyncpa [#allocation6], 1 }

// kernel: discriminator_forward.9
= control target key start
LH: loop header
LB: loop body
LE: loop exit
PB: predicated region body
PF: predicated region fallthrough
CT: control target
= control target key end

     0   :  { %s1609_s12 = smov 0   ;;  %s1611_s13 = smov 0   ;;  %s1863_s0 = inlined_call_operand.vmem [shape: bf16[128,1024], index: 0, kind: input, shape index: {}]   ;;  %s1864_s1 = inlined_call_operand.vmem [shape: bf16[1024,128], index: 1, kind: input, shape index: {}]   ;;  %s1865_s2 = inlined_call_operand.vmem [shape: f32[1,128], index: 2, kind: input, shape index: {}]   ;;  %s1866_s3 = inlined_call_operand.vmem [shape: f32[128,128], index: 3, kind: output, shape index: {}]  }
   0x1   :  { %s1613_s14 = smov 0   ;;  %s1615_s15 = smov 0  }
   0x2   :  { %s1617_s16 = smov 0  }
   0x3 LB: > { %s25_s17 = sadd.s32 1, %s1582_s15  ;;  %p48_p1 = scmp.ne.s32.totalorder %s1574_s13, %s1570_s12  ;;  %s1586_s16 = sphi %s1617_s16, %s13_s16   ;;  %s1582_s15 = sphi %s1615_s15, %s1870_s15   ;;  %s1578_s14 = sphi %s1613_s14, %s1869_s14   ;;  %s1574_s13 = sphi %s1611_s13, %s1868_s13   ;;  %s1570_s12 = sphi %s1609_s12, %s1867_s12  }
   0x4   : > { %p26_p0 = scmp.ge.s32.totalorder %s25_s17, 2  ;;  %p49_p2 = scmp.eq.s32.totalorder %s1586_s16, 0 }
   0x5   : > { %s41_s19 = sadd.s32 1, %s1574_s13  ;;  %p1219_p5 = scmp.ge.s32.totalorder %s1586_s16, 2 }
   0x6   : > { %s1872_s17 = smov (%p26_p0, %s25_s17), 0  ;;  %p50_p3 = por %p49_p2, %p48_p1 }
   0x7   : > { %s37_s18 = ssub.s32 %s1582_s15, %s1872_s17  ;;  %162 = sbr.rel (%p1219_p5) target bundleno = 34 (0x22), region = 20 }
   0x8   : > { %p39_p4 = scmp.eq.s32.totalorder %s37_s18, 0 }
   0xa   : > { %s1644_s20 = scalar_select %p39_p4, %s1574_s13, %s41_s19  }
   0xe   : > { %165 = sbr.rel (!%p50_p3) target bundleno = 34 (0x22), region = 24  ;;  %s167_s21 = sand.u32 (%p50_p3), 1, %s1574_s13  }
   0xf   : > { %s1298_s22 = sshll.u32 (%p50_p3), %s1582_s15, 4  ;;  %s1220_s23 = sshll.u32 (%p50_p3), %s167_s21, 8 }
  0x10   : > { %s1652_s26 = scalar_lea.vmem (%p50_p3), %s1863_s0, %s1298_s22  ;;  %s1657_s27 = scalar_lea.vmem (%p50_p3), [#allocation3], %s1220_s23 }
  0x11   : > { %v188_v0 = vld [vmem:[%s1652_s26] sm:$0xff] (%p50_p3)  ;;  %v190_v1 = vld [vmem:[%s1652_s26 + $0x8] sm:$0xff] (%p50_p3) }
  0x12   : > { %v192_v2 = vld [vmem:[%s1652_s26 + $0x20] sm:$0xff] (%p50_p3)  ;;  %189 = vst [vmem:[%s1657_s27] sm:$0xff] (%p50_p3), %v188_v0  ;;  %191 = vst [vmem:[%s1657_s27 + $0x8] sm:$0xff] (%p50_p3), %v190_v1  ;;  %v194_v3 = vld [vmem:[%s1652_s26 + $0x28] sm:$0xff] (%p50_p3) }
  0x13   : > { %193 = vst [vmem:[%s1657_s27 + $0x10] sm:$0xff] (%p50_p3), %v192_v2  ;;  %v196_v4 = vld [vmem:[%s1652_s26 + $0x40] sm:$0xff] (%p50_p3)  ;;  %v198_v5 = vld [vmem:[%s1652_s26 + $0x48] sm:$0xff] (%p50_p3)  ;;  %195 = vst [vmem:[%s1657_s27 + $0x18] sm:$0xff] (%p50_p3), %v194_v3 }
  0x14   : > { %197 = vst [vmem:[%s1657_s27 + $0x20] sm:$0xff] (%p50_p3), %v196_v4  ;;  %199 = vst [vmem:[%s1657_s27 + $0x28] sm:$0xff] (%p50_p3), %v198_v5  ;;  %v200_v6 = vld [vmem:[%s1652_s26 + $0x60] sm:$0xff] (%p50_p3)  ;;  %v202_v7 = vld [vmem:[%s1652_s26 + $0x68] sm:$0xff] (%p50_p3) }
  0x15   : > { %v204_v8 = vld [vmem:[%s1652_s26 + $0x80] sm:$0xff]  ;;  %201 = vst [vmem:[%s1657_s27 + $0x30] sm:$0xff] %v200_v6  ;;  %203 = vst [vmem:[%s1657_s27 + $0x38] sm:$0xff] %v202_v7  ;;  %v206_v9 = vld [vmem:[%s1652_s26 + $0x88] sm:$0xff] }
  0x16   : > { %205 = vst [vmem:[%s1657_s27 + $0x40] sm:$0xff] %v204_v8  ;;  %v208_v10 = vld [vmem:[%s1652_s26 + $0xa0] sm:$0xff]  ;;  %v210_v11 = vld [vmem:[%s1652_s26 + $0xa8] sm:$0xff]  ;;  %207 = vst [vmem:[%s1657_s27 + $0x48] sm:$0xff] %v206_v9 }
  0x17   : > { %209 = vst [vmem:[%s1657_s27 + $0x50] sm:$0xff] %v208_v10  ;;  %211 = vst [vmem:[%s1657_s27 + $0x58] sm:$0xff] %v210_v11  ;;  %v212_v12 = vld [vmem:[%s1652_s26 + $0xc0] sm:$0xff]  ;;  %v214_v13 = vld [vmem:[%s1652_s26 + $0xc8] sm:$0xff] }
  0x18   : > { %v216_v14 = vld [vmem:[%s1652_s26 + $0xe0] sm:$0xff]  ;;  %213 = vst [vmem:[%s1657_s27 + $0x60] sm:$0xff] %v212_v12  ;;  %215 = vst [vmem:[%s1657_s27 + $0x68] sm:$0xff] %v214_v13  ;;  %v218_v15 = vld [vmem:[%s1652_s26 + $0xe8] sm:$0xff] }
  0x19   : > { %217 = vst [vmem:[%s1657_s27 + $0x70] sm:$0xff] %v216_v14  ;;  %v220_v16 = vld [vmem:[%s1652_s26 + $0x100] sm:$0xff]  ;;  %v222_v17 = vld [vmem:[%s1652_s26 + $0x108] sm:$0xff]  ;;  %219 = vst [vmem:[%s1657_s27 + $0x78] sm:$0xff] %v218_v15 }
  0x1a   : > { %221 = vst [vmem:[%s1657_s27 + $0x80] sm:$0xff] %v220_v16  ;;  %223 = vst [vmem:[%s1657_s27 + $0x88] sm:$0xff] %v222_v17  ;;  %v224_v18 = vld [vmem:[%s1652_s26 + $0x120] sm:$0xff]  ;;  %v226_v19 = vld [vmem:[%s1652_s26 + $0x128] sm:$0xff] }
  0x1b   : > { %v228_v20 = vld [vmem:[%s1652_s26 + $0x140] sm:$0xff]  ;;  %225 = vst [vmem:[%s1657_s27 + $0x90] sm:$0xff] %v224_v18  ;;  %227 = vst [vmem:[%s1657_s27 + $0x98] sm:$0xff] %v226_v19  ;;  %v230_v21 = vld [vmem:[%s1652_s26 + $0x148] sm:$0xff] }
  0x1c   : > { %229 = vst [vmem:[%s1657_s27 + $0xa0] sm:$0xff] %v228_v20  ;;  %v232_v22 = vld [vmem:[%s1652_s26 + $0x160] sm:$0xff]  ;;  %v234_v23 = vld [vmem:[%s1652_s26 + $0x168] sm:$0xff]  ;;  %231 = vst [vmem:[%s1657_s27 + $0xa8] sm:$0xff] %v230_v21 }
  0x1d   : > { %233 = vst [vmem:[%s1657_s27 + $0xb0] sm:$0xff] %v232_v22  ;;  %235 = vst [vmem:[%s1657_s27 + $0xb8] sm:$0xff] %v234_v23  ;;  %v236_v24 = vld [vmem:[%s1652_s26 + $0x180] sm:$0xff]  ;;  %v238_v25 = vld [vmem:[%s1652_s26 + $0x188] sm:$0xff] }
  0x1e   : > { %v240_v26 = vld [vmem:[%s1652_s26 + $0x1a0] sm:$0xff]  ;;  %237 = vst [vmem:[%s1657_s27 + $0xc0] sm:$0xff] %v236_v24  ;;  %239 = vst [vmem:[%s1657_s27 + $0xc8] sm:$0xff] %v238_v25  ;;  %v242_v27 = vld [vmem:[%s1652_s26 + $0x1a8] sm:$0xff] }
  0x1f   : > { %241 = vst [vmem:[%s1657_s27 + $0xd0] sm:$0xff] %v240_v26  ;;  %v244_v28 = vld [vmem:[%s1652_s26 + $0x1c0] sm:$0xff]  ;;  %v246_v29 = vld [vmem:[%s1652_s26 + $0x1c8] sm:$0xff]  ;;  %243 = vst [vmem:[%s1657_s27 + $0xd8] sm:$0xff] %v242_v27 }
  0x20   : > { %245 = vst [vmem:[%s1657_s27 + $0xe0] sm:$0xff] %v244_v28  ;;  %247 = vst [vmem:[%s1657_s27 + $0xe8] sm:$0xff] %v246_v29  ;;  %v248_v30 = vld [vmem:[%s1652_s26 + $0x1e0] sm:$0xff]  ;;  %v250_v31 = vld [vmem:[%s1652_s26 + $0x1e8] sm:$0xff] }
  0x21   : > { %249 = vst [vmem:[%s1657_s27 + $0xf0] sm:$0xff] %v248_v30  ;;  %251 = vst [vmem:[%s1657_s27 + $0xf8] sm:$0xff] %v250_v31 }
  0x22 PF: > { %p1223_p6 = scmp.ge.s32.totalorder %s1586_s16, 1  ;;  %p268_p7 = scmp.lt.s32.totalorder %s1586_s16, 3 }
  0x24   : > { %p269_p8 = pnand %p1223_p6, %p268_p7 }
  0x25   : > { %s275_s28 = sand.u32 (!%p269_p8), 1, %s1570_s12   ;;  %s1225_s29 = sshll.u32 (!%p269_p8), %s1578_s14, 6 }
  0x26   : > { %272 = sbr.rel (%p269_p8) target bundleno = 378 (0x17a), region = 51  ;;  %s1224_s30 = sshll.u32 (!%p269_p8), %s275_s28, 8 }
  0x27   : > { %p315_p9 = scmp.lt.s32.totalorder (!%p269_p8), %s1225_s29, 127  ;;  %s1729_s8 = scalar_lea.vmem (!%p269_p8), [#allocation3], %s1224_s30 }
  0x28   : > { %p1227_p10 = scmp.ne.s32.totalorder (!%p269_p8), %s1578_s14, 0 }
  0x2d   : > { %s1874_s29 = smov (!%p315_p9, %s1225_s29), 127  ;;  %339 = sbr.rel (%p1227_p10) target bundleno = 55 (0x37), region = 59 }
  0x2e   : > { %s1226_s4 = sshll.u32 %s1874_s29, 2  ;;  %v1588_v32 = vmov (!%p1227_p10), 0.0  }
  0x2f   : > { %s1727_s7 = scalar_lea.vmem %s1864_s1, %s1226_s4  ;;  %340 = vst [vmem:[#allocation2] sm:$0xff] (!%p1227_p10), %v1588_v32  ;;  %341 = vst [vmem:[#allocation2 + $0x8] sm:$0xff] (!%p1227_p10), %v1588_v32 }
  0x30   : > { %342 = vst [vmem:[#allocation2 + $0x10] sm:$0xff] (!%p1227_p10), %v1588_v32  ;;  %343 = vst [vmem:[#allocation2 + $0x18] sm:$0xff] (!%p1227_p10), %v1588_v32 }
  0x31   : > { %344 = vst [vmem:[#allocation2 + $0x20] sm:$0xff] (!%p1227_p10), %v1588_v32  ;;  %345 = vst [vmem:[#allocation2 + $0x28] sm:$0xff] (!%p1227_p10), %v1588_v32 }
  0x32   : > { %346 = vst [vmem:[#allocation2 + $0x30] sm:$0xff] (!%p1227_p10), %v1588_v32  ;;  %347 = vst [vmem:[#allocation2 + $0x38] sm:$0xff] (!%p1227_p10), %v1588_v32 }
  0x33   : > { %348 = vst [vmem:[#allocation2 + $0x40] sm:$0xff] (!%p1227_p10), %v1588_v32  ;;  %349 = vst [vmem:[#allocation2 + $0x48] sm:$0xff] (!%p1227_p10), %v1588_v32 }
  0x34   : > { %350 = vst [vmem:[#allocation2 + $0x50] sm:$0xff] %v1588_v32  ;;  %351 = vst [vmem:[#allocation2 + $0x58] sm:$0xff] %v1588_v32 }
  0x35   : > { %352 = vst [vmem:[#allocation2 + $0x60] sm:$0xff] %v1588_v32  ;;  %353 = vst [vmem:[#allocation2 + $0x68] sm:$0xff] %v1588_v32 }
  0x36   : > { %354 = vst [vmem:[#allocation2 + $0x70] sm:$0xff] %v1588_v32  ;;  %355 = vst [vmem:[#allocation2 + $0x78] sm:$0xff] %v1588_v32 }
  0x37 PF: > { %v1468_v33 = vld [vmem:[%s1727_s7 + $0x40] sm:$0xff]   ;;  %v1472_v37 = vld [vmem:[%s1727_s7 + $0x48] sm:$0xff]   ;;  %v1476_v41 = vld [vmem:[%s1727_s7 + $0x50] sm:$0xff]   ;;  %p1292_p11 = scmp.ne.s32.totalorder %s1578_s14, 1 }
  0x38   : > { %v1469_v34 = vld [vmem:[%s1727_s7 + $0xc0] sm:$0xff]   ;;  %1299 = vmatprep.subr.bf16.mxu0 %v1468_v33  ;;  %v1473_v38 = vld [vmem:[%s1727_s7 + $0xc8] sm:$0xff]   ;;  %v1477_v42 = vld [vmem:[%s1727_s7 + $0xd0] sm:$0xff]  }
  0x39   : > { %v1470_v35 = vld [vmem:[%s1727_s7] sm:$0xff]   ;;  %1363 = vmatprep.subr.bf16.mxu1 %v1469_v34  ;;  %v1474_v39 = vld [vmem:[%s1727_s7 + $0x8] sm:$0xff]   ;;  %v1478_v43 = vld [vmem:[%s1727_s7 + $0x10] sm:$0xff]  }
  0x3a   : > { %v1471_v36 = vld [vmem:[%s1727_s7 + $0x80] sm:$0xff]   ;;  %1300 = vmatpush3.bf16.msra.mxu0 %v1470_v35  ;;  %v1475_v40 = vld [vmem:[%s1727_s7 + $0x88] sm:$0xff]   ;;  %v1479_v44 = vld [vmem:[%s1727_s7 + $0x90] sm:$0xff]  }
  0x3b   : > { %1364 = vmatpush3.bf16.msra.mxu1 %v1471_v36  ;;  %1301 = vmatprep.subr.bf16.mxu0 %v1472_v37  ;;  %v1480_v45 = vld [vmem:[%s1727_s7 + $0x58] sm:$0xff]   ;;  %v1484_v49 = vld [vmem:[%s1727_s7 + $0x60] sm:$0xff]   ;;  %v1488_v53 = vld [vmem:[%s1727_s7 + $0x68] sm:$0xff]  }
  0x3c   : > { %1365 = vmatprep.subr.bf16.mxu1 %v1473_v38  ;;  %v1481_v46 = vld [vmem:[%s1727_s7 + $0xd8] sm:$0xff]   ;;  %v1485_v50 = vld [vmem:[%s1727_s7 + $0xe0] sm:$0xff]   ;;  %v1489_v54 = vld [vmem:[%s1727_s7 + $0xe8] sm:$0xff]  }
  0x3d   : > { %v1482_v47 = vld [vmem:[%s1727_s7 + $0x18] sm:$0xff]   ;;  %v1486_v51 = vld [vmem:[%s1727_s7 + $0x20] sm:$0xff]   ;;  %v1490_v55 = vld [vmem:[%s1727_s7 + $0x28] sm:$0xff]  }
  0x3e   : > { %1302 = vmatpush3.bf16.msra.mxu0 %v1474_v39  ;;  %v1483_v48 = vld [vmem:[%s1727_s7 + $0x98] sm:$0xff]   ;;  %v1487_v52 = vld [vmem:[%s1727_s7 + $0xa0] sm:$0xff]   ;;  %v1491_v56 = vld [vmem:[%s1727_s7 + $0xa8] sm:$0xff]  }
  0x3f   : > { %1366 = vmatpush3.bf16.msra.mxu1 %v1475_v40  ;;  %1303 = vmatprep.subr.bf16.mxu0 %v1476_v41  ;;  %v1492_v57 = vld [vmem:[%s1727_s7 + $0x70] sm:$0xff]   ;;  %v1496_v61 = vld [vmem:[%s1727_s7 + $0x78] sm:$0xff]  }
  0x40   : > { %1367 = vmatprep.subr.bf16.mxu1 %v1477_v42  ;;  %v1493_v58 = vld [vmem:[%s1727_s7 + $0xf0] sm:$0xff]   ;;  %v1497_v62 = vld [vmem:[%s1727_s7 + $0xf8] sm:$0xff]   ;;  %v356_v42 = vld [vmem:[#allocation2] sm:$0xff] }
  0x41   : > { %v1494_v59 = vld [vmem:[%s1727_s7 + $0x30] sm:$0xff]   ;;  %v1498_v63 = vld [vmem:[%s1727_s7 + $0x38] sm:$0xff]  }
  0x42   : > { %1304 = vmatpush3.bf16.msra.mxu0 %v1478_v43  ;;  %v1495_v60 = vld [vmem:[%s1727_s7 + $0xb0] sm:$0xff]   ;;  %v1499_v0 = vld [vmem:[%s1727_s7 + $0xb8] sm:$0xff]  }
  0x43   : > { %1368 = vmatpush3.bf16.msra.mxu1 %v1479_v44  ;;  %1305 = vmatprep.subr.bf16.mxu0 %v1480_v45  ;;  %v1500_v1 = vld [vmem:[%s1729_s8] ss:$16 sps:$4 sm:$0xff]   ;;  %v1502_v2 = vld [vmem:[%s1729_s8 + $0x4] ss:$16 sps:$4 sm:$0xff]   ;;  %v1503_v3 = vld [vmem:[%s1729_s8 + $0x8] ss:$16 sps:$4 sm:$0xff]  }
  0x44   : > { %1369 = vmatprep.subr.bf16.mxu1 %v1481_v46  ;;  %v1505_v4 = vld [vmem:[%s1729_s8 + $0xc] ss:$16 sps:$4 sm:$0xff]   ;;  %852 = vmatprep.mubr.bf16.mxu0 %v1502_v2  ;;  %v1506_v5 = vld [vmem:[%s1729_s8 + $0x24] ss:$16 sps:$4 sm:$0xff]   ;;  %v1510_v7 = vld [vmem:[%s1729_s8 + $0x20] ss:$16 sps:$4 sm:$0xff]  }
  0x45   : > { %949 = vmatprep.mubr.bf16.mxu1 %v1505_v4  ;;  %v1508_v6 = vld [vmem:[%s1729_s8 + $0x2c] ss:$16 sps:$4 sm:$0xff]   ;;  %v1511_v8 = vld [vmem:[%s1729_s8 + $0x28] ss:$16 sps:$4 sm:$0xff]   ;;  %v1512_v9 = vld [vmem:[%s1729_s8 + $0x44] ss:$16 sps:$4 sm:$0xff]  }
  0x46   : > { %1306 = vmatpush3.bf16.msra.mxu0 %v1482_v47  ;;  %v1514_v10 = vld [vmem:[%s1729_s8 + $0x4c] ss:$16 sps:$4 sm:$0xff]   ;;  %v1516_v11 = vld [vmem:[%s1729_s8 + $0x40] ss:$16 sps:$4 sm:$0xff]   ;;  %v1517_v12 = vld [vmem:[%s1729_s8 + $0x48] ss:$16 sps:$4 sm:$0xff]  }
  0x47   : > { %1370 = vmatpush3.bf16.msra.mxu1 %v1483_v48  ;;  %1307 = vmatprep.subr.bf16.mxu0 %v1484_v49  ;;  %v1518_v13 = vld [vmem:[%s1729_s8 + $0x64] ss:$16 sps:$4 sm:$0xff]   ;;  %v1520_v14 = vld [vmem:[%s1729_s8 + $0x6c] ss:$16 sps:$4 sm:$0xff]   ;;  %v1522_v15 = vld [vmem:[%s1729_s8 + $0x60] ss:$16 sps:$4 sm:$0xff]  }
  0x48   : > { %1371 = vmatprep.subr.bf16.mxu1 %v1485_v50  ;;  %v1523_v16 = vld [vmem:[%s1729_s8 + $0x68] ss:$16 sps:$4 sm:$0xff]   ;;  %v1524_v17 = vld [vmem:[%s1729_s8 + $0x84] ss:$16 sps:$4 sm:$0xff]   ;;  %v1526_v18 = vld [vmem:[%s1729_s8 + $0x8c] ss:$16 sps:$4 sm:$0xff]  }
  0x49   : > { %v1528_v19 = vld [vmem:[%s1729_s8 + $0x80] ss:$16 sps:$4 sm:$0xff]   ;;  %v1529_v20 = vld [vmem:[%s1729_s8 + $0x88] ss:$16 sps:$4 sm:$0xff]   ;;  %v1530_v21 = vld [vmem:[%s1729_s8 + $0xa4] ss:$16 sps:$4 sm:$0xff]  }
  0x4a   : > { %1308 = vmatpush3.bf16.msra.mxu0 %v1486_v51  ;;  %v1532_v22 = vld [vmem:[%s1729_s8 + $0xac] ss:$16 sps:$4 sm:$0xff]   ;;  %v1534_v23 = vld [vmem:[%s1729_s8 + $0xa0] ss:$16 sps:$4 sm:$0xff]   ;;  %v1535_v24 = vld [vmem:[%s1729_s8 + $0xa8] ss:$16 sps:$4 sm:$0xff]  }
  0x4b   : > { %1372 = vmatpush3.bf16.msra.mxu1 %v1487_v52  ;;  %1309 = vmatprep.subr.bf16.mxu0 %v1488_v53  ;;  %v1536_v25 = vld [vmem:[%s1729_s8 + $0xc4] ss:$16 sps:$4 sm:$0xff]   ;;  %v1538_v26 = vld [vmem:[%s1729_s8 + $0xcc] ss:$16 sps:$4 sm:$0xff]   ;;  %v1540_v27 = vld [vmem:[%s1729_s8 + $0xc0] ss:$16 sps:$4 sm:$0xff]  }
  0x4c   : > { %1373 = vmatprep.subr.bf16.mxu1 %v1489_v54  ;;  %v1541_v28 = vld [vmem:[%s1729_s8 + $0xc8] ss:$16 sps:$4 sm:$0xff]   ;;  %v1542_v29 = vld [vmem:[%s1729_s8 + $0xe4] ss:$16 sps:$4 sm:$0xff]   ;;  %v1544_v30 = vld [vmem:[%s1729_s8 + $0xec] ss:$16 sps:$4 sm:$0xff]  }
  0x4d   : > { %v1546_v31 = vld [vmem:[%s1729_s8 + $0xe0] ss:$16 sps:$4 sm:$0xff]   ;;  %v1547_v32 = vld [vmem:[%s1729_s8 + $0xe8] ss:$16 sps:$4 sm:$0xff]  }
  0x4e   : > { %1310 = vmatpush3.bf16.msra.mxu0 %v1490_v55  ;;  %v357_v47 = vld [vmem:[#allocation2 + $0x8] sm:$0xff] }
  0x4f   : > { %1374 = vmatpush3.bf16.msra.mxu1 %v1491_v56  ;;  %1311 = vmatprep.subr.bf16.mxu0 %v1492_v57 }
  0x50   : > { %1375 = vmatprep.subr.bf16.mxu1 %v1493_v58 }
  0x52   : > { %1312 = vmatpush3.bf16.msra.mxu0 %v1494_v59 }
  0x53   : > { %1376 = vmatpush3.bf16.msra.mxu1 %v1495_v60  ;;  %1313 = vmatprep.subr.bf16.mxu0 %v1496_v61  ;;  %v358_v60 = vld [vmem:[#allocation2 + $0x10] sm:$0xff] }
  0x54   : > { %1377 = vmatprep.subr.bf16.mxu1 %v1497_v62 }
  0x56   : > { %1314 = vmatpush3.bf16.msra.mxu0 %v1498_v63 }
  0x57   : > { %1378 = vmatpush3.bf16.msra.mxu1 %v1499_v0 }
  0x59   : > { %853 = vmatmul.mubr.bf16.vlgmr.msra.gmra.mrb[0].mxu0 %v1500_v1  ;;  %v359_v1 = vld [vmem:[#allocation2 + $0x18] sm:$0xff] }
  0x5a   : > { %950 = vmatmul.mubr.bf16.vlgmr.msra.gmra.mrb[0].mxu1 %v1503_v3  ;;  %860 = vmatprep.mubr.bf16.mxu0 %v1506_v5 }
  0x5b   : > { %957 = vmatprep.mubr.bf16.mxu1 %v1508_v6 }
  0x61   : > { %861 = vmatmul.mubr.bf16.gmra.mrb[4].mxu0 %v1510_v7 }
  0x62   : > { %958 = vmatmul.mubr.bf16.gmra.mrb[4].mxu1 %v1511_v8  ;;  %868 = vmatprep.mubr.bf16.mxu0 %v1512_v9 }
  0x63   : > { %965 = vmatprep.mubr.bf16.mxu1 %v1514_v10 }
  0x69   : > { %869 = vmatmul.mubr.bf16.gmra.mrb[8].mxu0 %v1516_v11 }
  0x6a   : > { %966 = vmatmul.mubr.bf16.gmra.mrb[8].mxu1 %v1517_v12  ;;  %876 = vmatprep.mubr.bf16.mxu0 %v1518_v13 }
  0x6b   : > { %973 = vmatprep.mubr.bf16.mxu1 %v1520_v14  ;;  %v360_v14 = vld [vmem:[#allocation2 + $0x20] sm:$0xff] }
  0x71   : > { %877 = vmatmul.mubr.bf16.gmra.mrb[12].mxu0 %v1522_v15 }
  0x72   : > { %974 = vmatmul.mubr.bf16.gmra.mrb[12].mxu1 %v1523_v16  ;;  %884 = vmatprep.mubr.bf16.mxu0 %v1524_v17 }
  0x73   : > { %981 = vmatprep.mubr.bf16.mxu1 %v1526_v18 }
  0x79   : > { %885 = vmatmul.mubr.bf16.gmra.mrb[16].mxu0 %v1528_v19  ;;  %v361_v19 = vld [vmem:[#allocation2 + $0x28] sm:$0xff] }
  0x7a   : > { %982 = vmatmul.mubr.bf16.gmra.mrb[16].mxu1 %v1529_v20  ;;  %892 = vmatprep.mubr.bf16.mxu0 %v1530_v21 }
  0x7b   : > { %989 = vmatprep.mubr.bf16.mxu1 %v1532_v22 }
  0x81   : > { %893 = vmatmul.mubr.bf16.gmra.mrb[20].mxu0 %v1534_v23 }
  0x82   : > { %990 = vmatmul.mubr.bf16.gmra.mrb[20].mxu1 %v1535_v24  ;;  %900 = vmatprep.mubr.bf16.mxu0 %v1536_v25 }
  0x83   : > { %997 = vmatprep.mubr.bf16.mxu1 %v1538_v26 }
  0x89   : > { %901 = vmatmul.mubr.bf16.gmra.mrb[24].mxu0 %v1540_v27 }
  0x8a   : > { %998 = vmatmul.mubr.bf16.gmra.mrb[24].mxu1 %v1541_v28  ;;  %908 = vmatprep.mubr.bf16.mxu0 %v1542_v29 }
  0x8b   : > { %1005 = vmatprep.mubr.bf16.mxu1 %v1544_v30 }
  0x91   : > { %909 = vmatmul.mubr.bf16.gmra.mrb[28].mxu0 %v1546_v31 }
  0x92   : > { %1006 = vmatmul.mubr.bf16.gmra.mrb[28].mxu1 %v1547_v32  ;;  %v362_v32 = vld [vmem:[#allocation2 + $0x30] sm:$0xff] }
 0x12c   : > { %v1315_v33 = vpop.f32.mrb[0].mxu0 }
 0x12d   : > { %v1379_v34 = vpop.f32.mrb[0].mxu1  ;;  %v1316_v35 = vpop.f32.mrb[1].mxu0 }
 0x12e   : > { %v1317_v36 = vadd.f32 %v1316_v35, %v1315_v33  ;;  %v1380_v37 = vpop.f32.mrb[1].mxu1  ;;  %v1318_v38 = vpop.f32.mrb[2].mxu0 }
 0x12f   : > { %v1381_v39 = vadd.f32 %v1380_v37, %v1379_v34  ;;  %v1382_v40 = vpop.f32.mrb[2].mxu1  ;;  %v1319_v41 = vpop.f32.mrb[3].mxu0  ;;  %v363_v37 = vld [vmem:[#allocation2 + $0x38] sm:$0xff] }
 0x130   : > { %v1320_v43 = vadd.f32 %v1319_v41, %v1318_v38  ;;  %v1383_v44 = vpop.f32.mrb[3].mxu1 }
 0x131   : > { %v952_v45 = vadd.f32 %v1381_v39, %v1317_v36  ;;  %v1384_v46 = vadd.f32 %v1383_v44, %v1382_v40 }
 0x133   : > { %v1014_v48 = vadd.f32 %v952_v45, %v356_v42  ;;  %v955_v49 = vadd.f32 %v1384_v46, %v1320_v43 }
 0x134   : > { %v1321_v50 = vpop.f32.mrb[4].mxu0 }
 0x135   : > { %1030 = vst [vmem:[#allocation2] sm:$0xff] %v1014_v48  ;;  %v1015_v51 = vadd.f32 %v955_v49, %v357_v47  ;;  %v1385_v52 = vpop.f32.mrb[4].mxu1  ;;  %v1322_v53 = vpop.f32.mrb[5].mxu0 }
 0x136   : > { %v1323_v54 = vadd.f32 %v1322_v53, %v1321_v50  ;;  %v1386_v55 = vpop.f32.mrb[5].mxu1  ;;  %v1324_v56 = vpop.f32.mrb[6].mxu0  ;;  %v364_v50 = vld [vmem:[#allocation2 + $0x40] sm:$0xff] }
 0x137   : > { %1031 = vst [vmem:[#allocation2 + $0x8] sm:$0xff] %v1015_v51  ;;  %v1387_v57 = vadd.f32 %v1386_v55, %v1385_v52  ;;  %v1388_v58 = vpop.f32.mrb[6].mxu1  ;;  %v1325_v59 = vpop.f32.mrb[7].mxu0  ;;  %v365_v55 = vld [vmem:[#allocation2 + $0x48] sm:$0xff] }
 0x138   : > { %v1326_v61 = vadd.f32 %v1325_v59, %v1324_v56  ;;  %v1389_v62 = vpop.f32.mrb[7].mxu1 }
 0x139   : > { %v960_v63 = vadd.f32 %v1387_v57, %v1323_v54  ;;  %v1390_v0 = vadd.f32 %v1389_v62, %v1388_v58 }
 0x13b   : > { %v1016_v2 = vadd.f32 %v960_v63, %v358_v60  ;;  %v963_v3 = vadd.f32 %v1390_v0, %v1326_v61 }
 0x13c   : > { %v1327_v4 = vpop.f32.mrb[8].mxu0 }
 0x13d   : > { %1032 = vst [vmem:[#allocation2 + $0x10] sm:$0xff] %v1016_v2  ;;  %v1017_v5 = vadd.f32 %v963_v3, %v359_v1  ;;  %v1391_v6 = vpop.f32.mrb[8].mxu1  ;;  %v1328_v7 = vpop.f32.mrb[9].mxu0 }
 0x13e   : > { %v1329_v8 = vadd.f32 %v1328_v7, %v1327_v4  ;;  %v1392_v9 = vpop.f32.mrb[9].mxu1  ;;  %v1330_v10 = vpop.f32.mrb[10].mxu0  ;;  %v366_v4 = vld [vmem:[#allocation2 + $0x50] sm:$0xff] }
 0x13f   : > { %1033 = vst [vmem:[#allocation2 + $0x18] sm:$0xff] %v1017_v5  ;;  %v1393_v11 = vadd.f32 %v1392_v9, %v1391_v6  ;;  %v1394_v12 = vpop.f32.mrb[10].mxu1  ;;  %v1331_v13 = vpop.f32.mrb[11].mxu0  ;;  %v367_v9 = vld [vmem:[#allocation2 + $0x58] sm:$0xff] }
 0x140   : > { %v1332_v15 = vadd.f32 %v1331_v13, %v1330_v10  ;;  %v1395_v16 = vpop.f32.mrb[11].mxu1 }
 0x141   : > { %v968_v17 = vadd.f32 %v1393_v11, %v1329_v8  ;;  %v1396_v18 = vadd.f32 %v1395_v16, %v1394_v12 }
 0x143   : > { %v1018_v20 = vadd.f32 %v968_v17, %v360_v14  ;;  %v971_v21 = vadd.f32 %v1396_v18, %v1332_v15 }
 0x144   : > { %v1333_v22 = vpop.f32.mrb[12].mxu0 }
 0x145   : > { %1034 = vst [vmem:[#allocation2 + $0x20] sm:$0xff] %v1018_v20  ;;  %v1019_v23 = vadd.f32 %v971_v21, %v361_v19  ;;  %v1397_v24 = vpop.f32.mrb[12].mxu1  ;;  %v1334_v25 = vpop.f32.mrb[13].mxu0 }
 0x146   : > { %v1335_v26 = vadd.f32 %v1334_v25, %v1333_v22  ;;  %v1398_v27 = vpop.f32.mrb[13].mxu1  ;;  %v1336_v28 = vpop.f32.mrb[14].mxu0  ;;  %v368_v22 = vld [vmem:[#allocation2 + $0x60] sm:$0xff] }
 0x147   : > { %1035 = vst [vmem:[#allocation2 + $0x28] sm:$0xff] %v1019_v23  ;;  %v1399_v29 = vadd.f32 %v1398_v27, %v1397_v24  ;;  %v1400_v30 = vpop.f32.mrb[14].mxu1  ;;  %v1337_v31 = vpop.f32.mrb[15].mxu0  ;;  %v369_v27 = vld [vmem:[#allocation2 + $0x68] sm:$0xff] }
 0x148   : > { %v1338_v33 = vadd.f32 %v1337_v31, %v1336_v28  ;;  %v1401_v34 = vpop.f32.mrb[15].mxu1 }
 0x149   : > { %v976_v35 = vadd.f32 %v1399_v29, %v1335_v26  ;;  %v1402_v36 = vadd.f32 %v1401_v34, %v1400_v30 }
 0x14b   : > { %v1020_v38 = vadd.f32 %v976_v35, %v362_v32  ;;  %v979_v39 = vadd.f32 %v1402_v36, %v1338_v33 }
 0x14c   : > { %v1339_v40 = vpop.f32.mrb[16].mxu0 }
 0x14d   : > { %1036 = vst [vmem:[#allocation2 + $0x30] sm:$0xff] %v1020_v38  ;;  %v1021_v41 = vadd.f32 %v979_v39, %v363_v37  ;;  %v1403_v42 = vpop.f32.mrb[16].mxu1  ;;  %v1340_v43 = vpop.f32.mrb[17].mxu0 }
 0x14e   : > { %v1341_v44 = vadd.f32 %v1340_v43, %v1339_v40  ;;  %v1404_v45 = vpop.f32.mrb[17].mxu1  ;;  %v1342_v46 = vpop.f32.mrb[18].mxu0  ;;  %v370_v40 = vld [vmem:[#allocation2 + $0x70] sm:$0xff] }
 0x14f   : > { %1037 = vst [vmem:[#allocation2 + $0x38] sm:$0xff] %v1021_v41  ;;  %v1405_v47 = vadd.f32 %v1404_v45, %v1403_v42  ;;  %v1406_v48 = vpop.f32.mrb[18].mxu1  ;;  %v1343_v49 = vpop.f32.mrb[19].mxu0  ;;  %v371_v45 = vld [vmem:[#allocation2 + $0x78] sm:$0xff] }
 0x150   : > { %v1344_v51 = vadd.f32 %v1343_v49, %v1342_v46  ;;  %v1407_v52 = vpop.f32.mrb[19].mxu1  ;;  %v1050_v49 = vld [vmem:[#allocation2] sm:$0xff] (!%p1292_p11) }
 0x151   : > { %v984_v53 = vadd.f32 %v1405_v47, %v1341_v44  ;;  %v1408_v54 = vadd.f32 %v1407_v52, %v1406_v48 }
 0x153   : > { %v1022_v56 = vadd.f32 %v984_v53, %v364_v50  ;;  %v987_v57 = vadd.f32 %v1408_v54, %v1344_v51  ;;  %v1293_v50 = vld [vmem:[%s1865_s2] ss:$0 sm:$0xff] (!%p1292_p11)  ;;  %v1051_v51 = vld [vmem:[#allocation2 + $0x8] sm:$0xff] (!%p1292_p11)  ;;  %v1052_v54 = vld [vmem:[#allocation2 + $0x10] sm:$0xff] (!%p1292_p11) }
 0x154   : > { %v1345_v58 = vpop.f32.mrb[20].mxu0  ;;  %v1073_v52 = vadd.f32 (!%p1292_p11), %v1293_v50, %v1050_v49  ;;  %v1074_v53 = vadd.f32 (!%p1292_p11), %v1293_v50, %v1051_v51 }
 0x155   : > { %1038 = vst [vmem:[#allocation2 + $0x40] sm:$0xff] %v1022_v56  ;;  %v1023_v59 = vadd.f32 %v987_v57, %v365_v55  ;;  %v1409_v60 = vpop.f32.mrb[20].mxu1  ;;  %v1346_v61 = vpop.f32.mrb[21].mxu0  ;;  %v1053_v55 = vld [vmem:[#allocation2 + $0x18] sm:$0xff] (!%p1292_p11)  ;;  %v1054_v56 = vld [vmem:[#allocation2 + $0x20] sm:$0xff] (!%p1292_p11)  ;;  %v1075_v57 = vadd.f32 (!%p1292_p11), %v1293_v50, %v1052_v54 }
 0x156   : > { %v1347_v62 = vadd.f32 %v1346_v61, %v1345_v58  ;;  %v1410_v63 = vpop.f32.mrb[21].mxu1  ;;  %v1348_v0 = vpop.f32.mrb[22].mxu0  ;;  %v1076_v58 = vadd.f32 (!%p1292_p11), %v1293_v50, %v1053_v55  ;;  %v1056_v61 = vld [vmem:[#allocation2 + $0x30] sm:$0xff] (!%p1292_p11)  ;;  %1089 = vst [vmem:[%s1866_s3] sm:$0xff] (!%p1292_p11), %v1073_v52  ;;  %1090 = vst [vmem:[%s1866_s3 + $0x8] sm:$0xff] (!%p1292_p11), %v1074_v53 }
 0x157   : > { %1039 = vst [vmem:[#allocation2 + $0x48] sm:$0xff] %v1023_v59  ;;  %v1411_v1 = vadd.f32 %v1410_v63, %v1409_v60  ;;  %v1412_v2 = vpop.f32.mrb[22].mxu1  ;;  %v1349_v3 = vpop.f32.mrb[23].mxu0  ;;  %v1077_v59 = vadd.f32 (!%p1292_p11), %v1293_v50, %v1054_v56  ;;  %v1055_v60 = vld [vmem:[#allocation2 + $0x28] sm:$0xff] (!%p1292_p11)  ;;  %1091 = vst [vmem:[%s1866_s3 + $0x10] sm:$0xff] (!%p1292_p11), %v1075_v57 }
 0x158   : > { %v1350_v5 = vadd.f32 %v1349_v3, %v1348_v0  ;;  %v1413_v6 = vpop.f32.mrb[23].mxu1  ;;  %v1078_v63 = vadd.f32 (!%p1292_p11), %v1293_v50, %v1055_v60  ;;  %v1079_v0 = vadd.f32 (!%p1292_p11), %v1293_v50, %v1056_v61  ;;  %1092 = vst [vmem:[%s1866_s3 + $0x18] sm:$0xff] (!%p1292_p11), %v1076_v58 }
 0x159   : > { %v992_v7 = vadd.f32 %v1411_v1, %v1347_v62  ;;  %v1414_v8 = vadd.f32 %v1413_v6, %v1412_v2  ;;  %v1057_v62 = vld [vmem:[#allocation2 + $0x38] sm:$0xff] (!%p1292_p11)  ;;  %1093 = vst [vmem:[%s1866_s3 + $0x20] sm:$0xff] (!%p1292_p11), %v1077_v59 }
 0x15a   : > { %v1080_v1 = vadd.f32 (!%p1292_p11), %v1293_v50, %v1057_v62  ;;  %1094 = vst [vmem:[%s1866_s3 + $0x28] sm:$0xff] (!%p1292_p11), %v1078_v63  ;;  %1095 = vst [vmem:[%s1866_s3 + $0x30] sm:$0xff] (!%p1292_p11), %v1079_v0 }
 0x15b   : > { %v1024_v10 = vadd.f32 %v992_v7, %v366_v4  ;;  %v995_v11 = vadd.f32 %v1414_v8, %v1350_v5 }
 0x15c   : > { %v1351_v12 = vpop.f32.mrb[24].mxu0  ;;  %v1058_v2 = vld [vmem:[#allocation2 + $0x40] sm:$0xff] (!%p1292_p11)  ;;  %1096 = vst [vmem:[%s1866_s3 + $0x38] sm:$0xff] (!%p1292_p11), %v1080_v1 }
 0x15d   : > { %1040 = vst [vmem:[#allocation2 + $0x50] sm:$0xff] %v1024_v10  ;;  %v1025_v13 = vadd.f32 %v995_v11, %v367_v9  ;;  %v1415_v14 = vpop.f32.mrb[24].mxu1  ;;  %v1352_v15 = vpop.f32.mrb[25].mxu0  ;;  %v1081_v5 = vadd.f32 (!%p1292_p11), %v1293_v50, %v1058_v2 }
 0x15e   : > { %v1353_v16 = vadd.f32 %v1352_v15, %v1351_v12  ;;  %v1416_v17 = vpop.f32.mrb[25].mxu1  ;;  %v1354_v18 = vpop.f32.mrb[26].mxu0  ;;  %v1059_v3 = vld [vmem:[#allocation2 + $0x48] sm:$0xff] (!%p1292_p11) }
 0x15f   : > { %1041 = vst [vmem:[#allocation2 + $0x58] sm:$0xff] %v1025_v13  ;;  %v1417_v19 = vadd.f32 %v1416_v17, %v1415_v14  ;;  %v1418_v20 = vpop.f32.mrb[26].mxu1  ;;  %v1355_v21 = vpop.f32.mrb[27].mxu0  ;;  %v1082_v6 = vadd.f32 (!%p1292_p11), %v1293_v50, %v1059_v3  ;;  %1097 = vst [vmem:[%s1866_s3 + $0x40] sm:$0xff] (!%p1292_p11), %v1081_v5 }
 0x160   : > { %v1356_v23 = vadd.f32 %v1355_v21, %v1354_v18  ;;  %v1419_v24 = vpop.f32.mrb[27].mxu1 }
 0x161   : > { %v1000_v25 = vadd.f32 %v1417_v19, %v1353_v16  ;;  %v1420_v26 = vadd.f32 %v1419_v24, %v1418_v20  ;;  %1098 = vst [vmem:[%s1866_s3 + $0x48] sm:$0xff] (!%p1292_p11), %v1082_v6 }
 0x163   : > { %v1026_v28 = vadd.f32 %v1000_v25, %v368_v22  ;;  %v1003_v29 = vadd.f32 %v1420_v26, %v1356_v23 }
 0x164   : > { %v1357_v30 = vpop.f32.mrb[28].mxu0  ;;  %v1060_v4 = vld [vmem:[#allocation2 + $0x50] sm:$0xff] (!%p1292_p11) }
 0x165   : > { %1042 = vst [vmem:[#allocation2 + $0x60] sm:$0xff] %v1026_v28  ;;  %v1027_v31 = vadd.f32 %v1003_v29, %v369_v27  ;;  %v1421_v32 = vpop.f32.mrb[28].mxu1  ;;  %v1358_v33 = vpop.f32.mrb[29].mxu0  ;;  %v1083_v7 = vadd.f32 (!%p1292_p11), %v1293_v50, %v1060_v4 }
 0x166   : > { %v1359_v34 = vadd.f32 %v1358_v33, %v1357_v30  ;;  %v1422_v35 = vpop.f32.mrb[29].mxu1  ;;  %v1360_v36 = vpop.f32.mrb[30].mxu0  ;;  %v1061_v8 = vld [vmem:[#allocation2 + $0x58] sm:$0xff] (!%p1292_p11) }
 0x167   : > { %1043 = vst [vmem:[#allocation2 + $0x68] sm:$0xff] %v1027_v31  ;;  %v1423_v37 = vadd.f32 %v1422_v35, %v1421_v32  ;;  %v1424_v38 = vpop.f32.mrb[30].mxu1  ;;  %v1361_v39 = vpop.f32.mrb[31].mxu0  ;;  %v1084_v11 = vadd.f32 (!%p1292_p11), %v1293_v50, %v1061_v8  ;;  %1099 = vst [vmem:[%s1866_s3 + $0x50] sm:$0xff] (!%p1292_p11), %v1083_v7 }
 0x168   : > { %v1362_v41 = vadd.f32 %v1361_v39, %v1360_v36  ;;  %v1425_v42 = vpop.f32.mrb[31].mxu1 }
 0x169   : > { %v1008_v43 = vadd.f32 %v1423_v37, %v1359_v34  ;;  %v1426_v44 = vadd.f32 %v1425_v42, %v1424_v38  ;;  %1049 = sbr.rel (%p1292_p11) target bundleno = 378 (0x17a), region = 63  ;;  %1100 = vst [vmem:[%s1866_s3 + $0x58] sm:$0xff] (!%p1292_p11), %v1084_v11 }
 0x16b   : > { %v1028_v46 = vadd.f32 %v1008_v43, %v370_v40  ;;  %v1011_v47 = vadd.f32 %v1426_v44, %v1362_v41 }
 0x16c   : > { %v1062_v9 = vld [vmem:[#allocation2 + $0x60] sm:$0xff] (!%p1292_p11) }
 0x16d   : > { %1044 = vst [vmem:[#allocation2 + $0x70] sm:$0xff] %v1028_v46  ;;  %v1029_v48 = vadd.f32 %v1011_v47, %v371_v45  ;;  %v1085_v12 = vadd.f32 (!%p1292_p11), %v1293_v50, %v1062_v9 }
 0x16e   : > { %v1063_v10 = vld [vmem:[#allocation2 + $0x68] sm:$0xff] (!%p1292_p11) }
 0x16f   : > { %1045 = vst [vmem:[#allocation2 + $0x78] sm:$0xff] %v1029_v48  ;;  %v1086_v13 = vadd.f32 (!%p1292_p11), %v1293_v50, %v1063_v10  ;;  %1101 = vst [vmem:[%s1866_s3 + $0x60] sm:$0xff] (!%p1292_p11), %v1085_v12 }
 0x171   : > { %1102 = vst [vmem:[%s1866_s3 + $0x68] sm:$0xff] %v1086_v13 }
 0x174   : > { %v1064_v14 = vld [vmem:[#allocation2 + $0x70] sm:$0xff] }
 0x175   : > { %v1087_v16 = vadd.f32 %v1293_v50, %v1064_v14 }
 0x176   : > { %v1065_v15 = vld [vmem:[#allocation2 + $0x78] sm:$0xff] }
 0x177   : > { %v1088_v17 = vadd.f32 %v1293_v50, %v1065_v15  ;;  %1103 = vst [vmem:[%s1866_s3 + $0x70] sm:$0xff] %v1087_v16 }
 0x179   : > { %1104 = vst [vmem:[%s1866_s3 + $0x78] sm:$0xff] %v1088_v17 }
 0x17a PF: > { %s13_s16 = sadd.s32 1, %s1586_s16   ;;  %s1867_s12 = smov %s1574_s13 }
 0x17b   : > { %p10_p12 = scmp.ge.s32.totalorder %s13_s16, 4   ;;  %s1868_s13 = smov %s1644_s20 }
 0x17c   : > { %s1869_s14 = smov %s1582_s15  ;;  %s1870_s15 = smov %s1872_s17 }
 0x17d   :  { %12 = sbr.rel (!%p10_p12) target bundleno = 3 (0x3), region = 104 }

// kernel: discriminator_forward.10
= control target key start
LH: loop header
LB: loop body
LE: loop exit
PB: predicated region body
PF: predicated region fallthrough
CT: control target
= control target key end

     0   :  { %s472_s6 = smov 0   ;;  %s474_s7 = smov 0   ;;  %s509_s0 = inlined_call_operand.vmem [shape: f32[2,64,128], index: 0, kind: input, shape index: {}]   ;;  %s510_s1 = inlined_call_operand.vmem [shape: bf16[2,64,128], index: 1, kind: output, shape index: {}]  }
   0x1   :  { %s476_s8 = smov 0  }
   0x2 LB: > { %s23_s9 = sadd.s32 1, %s456_s7  ;;  %p364_p0 = scmp.ge.s32.totalorder %s460_s8, 1  ;;  %s460_s8 = sphi %s476_s8, %s11_s8   ;;  %s456_s7 = sphi %s474_s7, %s512_s7   ;;  %s452_s6 = sphi %s472_s6, %s511_s6  }
   0x3   : > { %p25_p1 = scmp.ge.s32.totalorder %s23_s9, 2  ;;  %p106_p2 = scmp.lt.s32.totalorder %s460_s8, 3 }
   0x5   : > { %s514_s9 = smov (%p25_p1, %s23_s9), 0  ;;  %p107_p3 = pnand %p364_p0, %p106_p2 }
   0x6   : > { %p132_p4 = scmp.lt.s32.totalorder (!%p107_p3), %s452_s6, 1 }
   0x7   : > { %110 = sbr.rel (%p107_p3) target bundleno = 76 (0x4c), region = 24 }
   0xe   : > { %s516_s6 = smov (!%p132_p4, %s452_s6), 1 }
   0xf   : > { %s379_s10 = sshll.u32 %s516_s6, 6  ;;  %s380_s14 = sshll.u32 %s516_s6, 5 }
  0x10   : > { %s139_s13 = scalar_lea.vmem %s509_s0, %s379_s10  ;;  %s147_s17 = scalar_lea.vmem %s510_s1, %s380_s14 }
  0x11   : > { %v148_v0 = vld [vmem:[%s139_s13] sm:$0xff]  ;;  %v149_v1 = vld [vmem:[%s139_s13 + $0x8] sm:$0xff]  ;;  %v150_v2 = vld [vmem:[%s139_s13 + $0x10] sm:$0xff] }
  0x12   : > { %v151_v3 = vld [vmem:[%s139_s13 + $0x18] sm:$0xff]  ;;  %v156_v4 = vadd.f32 %v149_v1, %v148_v0  ;;  %v171_v5 = vmul.f32 %v148_v0, %v148_v0  ;;  %v172_v6 = vmul.f32 %v149_v1, %v149_v1  ;;  %v173_v7 = vmul.f32 %v150_v2, %v150_v2  ;;  %v152_v8 = vld [vmem:[%s139_s13 + $0x20] sm:$0xff]  ;;  %v153_v12 = vld [vmem:[%s139_s13 + $0x28] sm:$0xff] }
  0x13   : > { %v174_v10 = vmul.f32 %v151_v3, %v151_v3  ;;  %v175_v14 = vmul.f32 %v152_v8, %v152_v8  ;;  %v154_v16 = vld [vmem:[%s139_s13 + $0x30] sm:$0xff]  ;;  %v176_v18 = vmul.f32 %v153_v12, %v153_v12  ;;  %v155_v20 = vld [vmem:[%s139_s13 + $0x38] sm:$0xff] }
  0x14   : > { %v157_v9 = vadd.f32 %v156_v4, %v150_v2  ;;  %v179_v11 = vadd.f32 %v172_v6, %v171_v5  ;;  %v177_v22 = vmul.f32 %v154_v16, %v154_v16  ;;  %v178_v25 = vmul.f32 %v155_v20, %v155_v20 }
  0x16   : > { %v158_v13 = vadd.f32 %v157_v9, %v151_v3  ;;  %v180_v15 = vadd.f32 %v179_v11, %v173_v7 }
  0x18   : > { %v159_v17 = vadd.f32 %v158_v13, %v152_v8  ;;  %v181_v19 = vadd.f32 %v180_v15, %v174_v10 }
  0x1a   : > { %v160_v21 = vadd.f32 %v159_v17, %v153_v12  ;;  %v182_v23 = vadd.f32 %v181_v19, %v175_v14 }
  0x1c   : > { %v161_v24 = vadd.f32 %v160_v21, %v154_v16  ;;  %v183_v26 = vadd.f32 %v182_v23, %v176_v18 }
  0x1e   : > { %v162_v27 = vadd.f32 %v161_v24, %v155_v20  ;;  %v184_v28 = vadd.f32 %v183_v26, %v177_v22 }
  0x20   : > { %v163_v29 = vrot.slane %v162_v27, 4  ;;  %v185_v30 = vadd.f32 %v184_v28, %v178_v25 }
  0x22   : > { %v164_v31 = vadd.f32 %v163_v29, %v162_v27  ;;  %v186_v32 = vrot.slane %v185_v30, 4 }
  0x24   : > { %v165_v33 = vrot.slane %v164_v31, 2  ;;  %v187_v34 = vadd.f32 %v186_v32, %v185_v30 }
  0x26   : > { %v166_v35 = vadd.f32 %v165_v33, %v164_v31  ;;  %v188_v36 = vrot.slane %v187_v34, 2 }
  0x28   : > { %v167_v37 = vrot.slane %v166_v35, 1  ;;  %v189_v38 = vadd.f32 %v188_v36, %v187_v34 }
  0x2a   : > { %v168_v39 = vadd.f32 %v167_v37, %v166_v35  ;;  %v190_v40 = vrot.slane %v189_v38, 1 }
  0x2c   : > { %v170_v41 = vmul.f32 0.015625, %v168_v39  ;;  %v191_v42 = vadd.f32 %v190_v40, %v189_v38 }
  0x2e   : > { %v192_v43 = vmul.f32 0.015625, %v191_v42  ;;  %v193_v44 = vmul.f32 %v170_v41, %v170_v41  ;;  %v195_v47 = vsub.f32 %v148_v0, %v170_v41  ;;  %v196_v48 = vsub.f32 %v149_v1, %v170_v41 }
  0x2f   : > { %v197_v49 = vsub.f32 %v150_v2, %v170_v41  ;;  %v198_v50 = vsub.f32 %v151_v3, %v170_v41  ;;  %v199_v51 = vsub.f32 %v152_v8, %v170_v41  ;;  %v200_v52 = vsub.f32 %v153_v12, %v170_v41 }
  0x30   : > { %v194_v45 = vsub.f32 %v192_v43, %v193_v44  ;;  %v201_v53 = vsub.f32 %v154_v16, %v170_v41  ;;  %v202_v54 = vsub.f32 %v155_v20, %v170_v41 }
  0x32   : > { %v203_v46 = vadd.f32 1e-05, %v194_v45 }
  0x34   : > { %436 = vrsqrt.f32 %v203_v46 }
  0x3e   : > { %v437_v55 = vpop.eup %436 }
  0x3f   : > { %v205_v56 = vmul.f32 %v437_v55, %v195_v47  ;;  %v206_v57 = vmul.f32 %v437_v55, %v196_v48  ;;  %v207_v58 = vmul.f32 %v437_v55, %v197_v49  ;;  %v208_v59 = vmul.f32 %v437_v55, %v198_v50 }
  0x40   : > { %v209_v60 = vmul.f32 %v437_v55, %v199_v51  ;;  %v210_v61 = vmul.f32 %v437_v55, %v200_v52  ;;  %v211_v62 = vmul.f32 %v437_v55, %v201_v53  ;;  %v212_v63 = vmul.f32 %v437_v55, %v202_v54 }
  0x41   : > { %vm213_vm0 = vcmp.ge.f32.partialorder %v205_v56, 0.0  ;;  %vm214_vm1 = vcmp.ge.f32.partialorder %v206_v57, 0.0  ;;  %v221_v0 = vmul.f32 0.2, %v205_v56  ;;  %v222_v1 = vmul.f32 0.2, %v206_v57 }
  0x42   : > { %vm215_vm2 = vcmp.ge.f32.partialorder %v207_v58, 0.0  ;;  %vm216_vm3 = vcmp.ge.f32.partialorder %v208_v59, 0.0  ;;  %v223_v2 = vmul.f32 0.2, %v207_v58  ;;  %v224_v3 = vmul.f32 0.2, %v208_v59 }
  0x43   : > { %v229_v4 = vsel %vm213_vm0, %v205_v56, %v221_v0  ;;  %v230_v5 = vsel %vm214_vm1, %v206_v57, %v222_v1  ;;  %vm217_vm4 = vcmp.ge.f32.partialorder %v209_v60, 0.0  ;;  %vm218_vm5 = vcmp.ge.f32.partialorder %v210_v61, 0.0 }
  0x44   : > { %v392_v6 = vpack.c.bf16 %v230_v5, %v229_v4  ;;  %v231_v7 = vsel %vm215_vm2, %v207_v58, %v223_v2  ;;  %v232_v8 = vsel %vm216_vm3, %v208_v59, %v224_v3  ;;  %v225_v9 = vmul.f32 0.2, %v209_v60 }
  0x45   : > { %v397_v10 = vpack.c.bf16 %v232_v8, %v231_v7  ;;  %v226_v11 = vmul.f32 0.2, %v210_v61  ;;  %vm219_vm6 = vcmp.ge.f32.partialorder %v211_v62, 0.0  ;;  %vm220_vm7 = vcmp.ge.f32.partialorder %v212_v63, 0.0 }
  0x46   : > { %393 = vst [vmem:[%s147_s17] sm:$0xff] %v392_v6   ;;  %v233_v12 = vsel %vm217_vm4, %v209_v60, %v225_v9  ;;  %v227_v13 = vmul.f32 0.2, %v211_v62  ;;  %v228_v14 = vmul.f32 0.2, %v212_v63 }
  0x47   : > { %409 = vst [vmem:[%s147_s17 + $0x8] sm:$0xff] %v397_v10   ;;  %v234_v15 = vsel %vm218_vm5, %v210_v61, %v226_v11 }
  0x48   : > { %v402_v16 = vpack.c.bf16 %v234_v15, %v233_v12  ;;  %v235_v17 = vsel %vm219_vm6, %v211_v62, %v227_v13  ;;  %v236_v18 = vsel %vm220_vm7, %v212_v63, %v228_v14 }
  0x49   : > { %v407_v19 = vpack.c.bf16 %v236_v18, %v235_v17 }
  0x4a   : > { %410 = vst [vmem:[%s147_s17 + $0x10] sm:$0xff] %v402_v16  }
  0x4b   : > { %411 = vst [vmem:[%s147_s17 + $0x18] sm:$0xff] %v407_v19  }
  0x4c PF: > { %s11_s8 = sadd.s32 1, %s460_s8   ;;  %s511_s6 = smov %s456_s7 }
  0x4d   : > { %p8_p5 = scmp.ge.s32.totalorder %s11_s8, 4   ;;  %s512_s7 = smov %s514_s9 }
  0x4f   :  { %10 = sbr.rel (!%p8_p5) target bundleno = 2 (0x2), region = 54 }

// kernel: discriminator_forward.12
= control target key start
LH: loop header
LB: loop body
LE: loop exit
PB: predicated region body
PF: predicated region fallthrough
CT: control target
= control target key end

     0   :  { %s486_s6 = smov 0   ;;  %s488_s7 = smov 0   ;;  %s586_s0 = inlined_call_operand.vmem [shape: f32[2,16,256], index: 0, kind: input, shape index: {}]   ;;  %s587_s1 = inlined_call_operand.vmem [shape: bf16[2,16,256], index: 1, kind: output, shape index: {}]  }
   0x1   :  { %s490_s8 = smov 0   ;;  %s492_s9 = smov 0  }
   0x2   :  { %s494_s10 = smov 0   ;;  %s496_s11 = smov 0  }
   0x3   :  { %s498_s12 = smov 0  }
   0x4 LB: > { %s20_s13 = sadd.s32 1, %s466_s10  ;;  %s23_s14 = sadd.s32 1, %s470_s11  ;;  %s474_s12 = sphi %s498_s12, %s11_s12   ;;  %s470_s11 = sphi %s496_s11, %s594_s11   ;;  %s466_s10 = sphi %s494_s10, %s593_s10   ;;  %s462_s9 = sphi %s492_s9, %s592_s9   ;;  %s458_s8 = sphi %s490_s8, %s591_s8   ;;  %s454_s7 = sphi %s488_s7, %s590_s7   ;;  %s450_s6 = sphi %s486_s6, %s589_s6  }
   0x5   : > { %p21_p0 = scmp.ge.s32.totalorder %s20_s13, 2  ;;  %s338_s15 = sadd.s32 4294967295, %s474_s12  }
   0x6   : > { %p39_p1 = scmp.ne.s32.totalorder %s454_s7, %s450_s6  ;;  %p40_p2 = scmp.eq.s32.totalorder %s474_s12, 0 }
   0x7   : > { %s596_s13 = smov (%p21_p0, %s20_s13), 0  ;;  %s598_s14 = smov (!%p21_p0, %s23_s14), %s470_s11 }
   0x8   : > { %p25_p3 = scmp.ge.s32.totalorder %s598_s14, 2  ;;  %p71_p4 = scmp.eq.s32.totalorder %s338_s15, 3 }
   0x9   : > { %s28_s16 = ssub.s32 %s466_s10, %s596_s13  ;;  %p41_p5 = por %p40_p2, %p39_p1 }
   0xa   : > { %s600_s14 = smov (%p25_p3, %s598_s14), 0  ;;  %p534_p6 = por %p71_p4, %p39_p1 }
   0xb   : > { %s27_s18 = ssub.s32 %s470_s11, %s600_s14  ;;  %s32_s20 = sadd.s32 1, %s454_s7 }
   0xc   : > { %s29_s19 = sor.u32 %s28_s16, %s27_s18  ;;  %p341_p8 = scmp.ge.s32.totalorder %s474_s12, 4 }
   0xd   : > { %p30_p7 = scmp.eq.s32.totalorder %s29_s19, 0 }
   0xe   : > { %93 = sbr.rel (%p341_p8) target bundleno = 28 (0x1c), region = 16 }
   0xf   : > { %s542_s21 = scalar_select %p30_p7, %s454_s7, %s32_s20  }
  0x15   : > { %96 = sbr.rel (!%p41_p5) target bundleno = 28 (0x1c), region = 20  ;;  %s98_s22 = sand.u32 (%p41_p5), 1, %s454_s7  }
  0x16   : > { %s343_s23 = sshll.u32 (%p41_p5), %s470_s11, 2  ;;  %s342_s24 = sshll.u32 (%p41_p5), %s98_s22, 4 }
  0x17   : > { %s102_s25 = sadd.s32 (%p41_p5), %s466_s10, %s343_s23  ;;  %s100_s30 = scalar_lea.vmem (%p41_p5), [#allocation2], %s342_s24 }
  0x18   : > { %s344_s26 = sshll.u32 (%p41_p5), %s102_s25, 3 }
  0x19   : > { %s104_s29 = scalar_lea.vmem (%p41_p5), %s586_s0, %s344_s26 }
  0x1a   : > { %v134_v0 = vld [vmem:[%s104_s29] sm:$0xff] (%p41_p5)  ;;  %v136_v1 = vld [vmem:[%s104_s29 + $0x10] sm:$0xff] (%p41_p5) }
  0x1b   : > { %135 = vst [vmem:[%s100_s30] sm:$0xff] (%p41_p5), %v134_v0  ;;  %137 = vst [vmem:[%s100_s30 + $0x8] sm:$0xff] (%p41_p5), %v136_v1 }
  0x1c PF: > { %p345_p9 = scmp.ge.s32.totalorder %s474_s12, 1  ;;  %p142_p10 = scmp.lt.s32.totalorder %s474_s12, 5 }
  0x1e   : > { %p143_p11 = pnand %p345_p9, %p142_p10 }
  0x1f   : > { %s149_s2 = sand.u32 (!%p143_p11), 1, %s450_s6  }
  0x20   : > { %146 = sbr.rel (%p143_p11) target bundleno = 84 (0x54), region = 58  ;;  %s346_s3 = sshll.u32 (!%p143_p11), %s149_s2, 4 }
  0x21   : > { %s151_s4 = scalar_lea.vmem (!%p143_p11), [#allocation2], %s346_s3  ;;  %s347_s5 = sshll.u32 (!%p143_p11), %s149_s2, 3 }
  0x22   : > { %v167_v2 = vld [vmem:[%s151_s4] sm:$0xff] (!%p143_p11)  ;;  %v168_v3 = vld [vmem:[%s151_s4 + $0x8] sm:$0xff] (!%p143_p11)  ;;  %s166_s15 = scalar_lea.vmem (!%p143_p11), [#allocation3], %s347_s5 }
  0x23   : > { %v169_v4 = vadd.f32 (!%p143_p11), %v168_v3, %v167_v2  ;;  %v178_v5 = vmul.f32 (!%p143_p11), %v167_v2, %v167_v2  ;;  %v179_v6 = vmul.f32 (!%p143_p11), %v168_v3, %v168_v3 }
  0x25   : > { %v170_v7 = vrot.slane (!%p143_p11), %v169_v4, 4  ;;  %v180_v8 = vadd.f32 (!%p143_p11), %v179_v6, %v178_v5 }
  0x27   : > { %v171_v9 = vadd.f32 %v170_v7, %v169_v4  ;;  %v181_v10 = vrot.slane %v180_v8, 4  ;;  %s351_s16 = sshll.u32 (%p534_p6), %s462_s9, 2 }
  0x28   : > { %s220_s18 = sadd.s32 (%p534_p6), %s458_s8, %s351_s16 }
  0x29   : > { %v172_v11 = vrot.slane %v171_v9, 2  ;;  %v182_v12 = vadd.f32 %v181_v10, %v180_v8  ;;  %s352_s6 = sshll.u32 (%p534_p6), %s220_s18, 2 }
  0x2a   : > { %s222_s22 = scalar_lea.vmem (%p534_p6), %s587_s1, %s352_s6 }
  0x2b   : > { %v173_v13 = vadd.f32 %v172_v11, %v171_v9  ;;  %v183_v14 = vrot.slane %v182_v12, 2 }
  0x2d   : > { %v174_v15 = vrot.slane %v173_v13, 1  ;;  %v184_v16 = vadd.f32 %v183_v14, %v182_v12 }
  0x2f   : > { %v175_v17 = vadd.f32 %v174_v15, %v173_v13  ;;  %v185_v18 = vrot.slane %v184_v16, 1 }
  0x31   : > { %v177_v19 = vmul.f32 0.0625, %v175_v17  ;;  %v186_v20 = vadd.f32 %v185_v18, %v184_v16 }
  0x33   : > { %v187_v21 = vmul.f32 0.0625, %v186_v20  ;;  %v188_v22 = vmul.f32 %v177_v19, %v177_v19  ;;  %v190_v25 = vsub.f32 %v167_v2, %v177_v19  ;;  %v191_v26 = vsub.f32 %v168_v3, %v177_v19 }
  0x35   : > { %v189_v23 = vsub.f32 %v187_v21, %v188_v22 }
  0x37   : > { %v192_v24 = vadd.f32 1e-05, %v189_v23 }
  0x39   : > { %418 = vrsqrt.f32 %v192_v24 }
  0x43   : > { %v419_v27 = vpop.eup %418 }
  0x44   : > { %v194_v28 = vmul.f32 %v419_v27, %v190_v25  ;;  %v195_v29 = vmul.f32 %v419_v27, %v191_v26 }
  0x45   : > { %218 = sbr.rel (!%p534_p6) target bundleno = 84 (0x54), region = 66 }
  0x46   : > { %vm196_vm0 = vcmp.ge.f32.partialorder %v194_v28, 0.0  ;;  %vm197_vm1 = vcmp.ge.f32.partialorder %v195_v29, 0.0  ;;  %v198_v30 = vmul.f32 0.2, %v194_v28  ;;  %v199_v31 = vmul.f32 0.2, %v195_v29 }
  0x48   : > { %v200_v32 = vsel %vm196_vm0, %v194_v28, %v198_v30  ;;  %v201_v33 = vsel %vm197_vm1, %v195_v29, %v199_v31 }
  0x49   : > { %v360_v34 = vpack.c.bf16 %v201_v33, %v200_v32 }
  0x4b   : > { %361 = vst [vmem:[%s166_s15] sm:$0xff] %v360_v34  }
  0x52   : > { %v238_v35 = vld [vmem:[%s166_s15] sm:$0xf]  ;;  %v240_v36 = vld [vmem:[%s166_s15 + $0x4] sm:$0xf] }
  0x53   : > { %239 = vst [vmem:[%s222_s22] sm:$0xf] %v238_v35  ;;  %241 = vst [vmem:[%s222_s22 + $0x8] sm:$0xf] %v240_v36 }
  0x54 PF: > { %s11_s12 = sadd.s32 1, %s474_s12   ;;  %s589_s6 = smov %s454_s7 }
  0x55   : > { %p8_p12 = scmp.ge.s32.totalorder %s11_s12, 6   ;;  %s590_s7 = smov %s542_s21 }
  0x56   : > { %s591_s8 = smov %s466_s10  ;;  %s592_s9 = smov %s470_s11 }
  0x57   : > { %s593_s10 = smov %s596_s13  ;;  %s594_s11 = smov %s600_s14 }
  0x58   :  { %10 = sbr.rel (!%p8_p12) target bundleno = 4 (0x4), region = 138 }

// kernel: discriminator_forward.11
= control target key start
LH: loop header
LB: loop body
LE: loop exit
PB: predicated region body
PF: predicated region fallthrough
CT: control target
= control target key end

     0   :  { %s1352_s12 = smov 0   ;;  %s1354_s13 = smov 0   ;;  %s1522_s0 = inlined_call_operand.vmem [shape: bf16[32,2048], index: 0, kind: input, shape index: {}]   ;;  %s1523_s1 = inlined_call_operand.vmem [shape: bf16[2048,256], index: 1, kind: input, shape index: {}]   ;;  %s1524_s2 = inlined_call_operand.vmem [shape: f32[1,256], index: 2, kind: input, shape index: {}]   ;;  %s1525_s3 = inlined_call_operand.vmem [shape: f32[32,256], index: 3, kind: output, shape index: {}]  }
   0x1   :  { %s1356_s14 = smov 0   ;;  %s1358_s15 = smov 0  }
   0x2   :  { %s1360_s16 = smov 0  }
   0x3 LB: > { %s25_s17 = sadd.s32 1, %s1325_s15  ;;  %p48_p1 = scmp.ne.s32.totalorder %s1317_s13, %s1313_s12  ;;  %s1329_s16 = sphi %s1360_s16, %s13_s16   ;;  %s1325_s15 = sphi %s1358_s15, %s1529_s15   ;;  %s1321_s14 = sphi %s1356_s14, %s1528_s14   ;;  %s1317_s13 = sphi %s1354_s13, %s1527_s13   ;;  %s1313_s12 = sphi %s1352_s12, %s1526_s12  }
   0x4   : > { %p26_p0 = scmp.ge.s32.totalorder %s25_s17, 4  ;;  %p49_p2 = scmp.eq.s32.totalorder %s1329_s16, 0 }
   0x5   : > { %s41_s19 = sadd.s32 1, %s1317_s13  ;;  %p1045_p5 = scmp.ge.s32.totalorder %s1329_s16, 4 }
   0x6   : > { %s1531_s17 = smov (%p26_p0, %s25_s17), 0  ;;  %p50_p3 = por %p49_p2, %p48_p1 }
   0x7   : > { %s37_s18 = ssub.s32 %s1325_s15, %s1531_s17  ;;  %164 = sbr.rel (%p1045_p5) target bundleno = 22 (0x16), region = 20 }
   0x8   : > { %p39_p4 = scmp.eq.s32.totalorder %s37_s18, 0 }
   0xa   : > { %s1387_s20 = scalar_select %p39_p4, %s1317_s13, %s41_s19  }
   0xe   : > { %167 = sbr.rel (!%p50_p3) target bundleno = 22 (0x16), region = 24  ;;  %s169_s21 = sand.u32 (%p50_p3), 1, %s1317_s13  }
   0xf   : > { %s1132_s22 = sshll.u32 (%p50_p3), %s1325_s15, 4  ;;  %s1046_s23 = sshll.u32 (%p50_p3), %s169_s21, 6 }
  0x10   : > { %s177_s26 = scalar_lea.vmem (%p50_p3), %s1522_s0, %s1132_s22  ;;  %s171_s27 = scalar_lea.vmem (%p50_p3), [#allocation3], %s1046_s23 }
  0x11   : > { %v190_v0 = vld [vmem:[%s177_s26] sm:$0xff] (%p50_p3)  ;;  %v192_v1 = vld [vmem:[%s177_s26 + $0x8] sm:$0xff] (%p50_p3) }
  0x12   : > { %v194_v2 = vld [vmem:[%s177_s26 + $0x40] sm:$0xff] (%p50_p3)  ;;  %191 = vst [vmem:[%s171_s27] sm:$0xff] (%p50_p3), %v190_v0  ;;  %193 = vst [vmem:[%s171_s27 + $0x8] sm:$0xff] (%p50_p3), %v192_v1  ;;  %v196_v3 = vld [vmem:[%s177_s26 + $0x48] sm:$0xff] (%p50_p3) }
  0x13   : > { %195 = vst [vmem:[%s171_s27 + $0x10] sm:$0xff] (%p50_p3), %v194_v2  ;;  %v198_v4 = vld [vmem:[%s177_s26 + $0x80] sm:$0xff] (%p50_p3)  ;;  %v200_v5 = vld [vmem:[%s177_s26 + $0x88] sm:$0xff] (%p50_p3)  ;;  %197 = vst [vmem:[%s171_s27 + $0x18] sm:$0xff] (%p50_p3), %v196_v3 }
  0x14   : > { %199 = vst [vmem:[%s171_s27 + $0x20] sm:$0xff] (%p50_p3), %v198_v4  ;;  %201 = vst [vmem:[%s171_s27 + $0x28] sm:$0xff] (%p50_p3), %v200_v5  ;;  %v202_v6 = vld [vmem:[%s177_s26 + $0xc0] sm:$0xff] (%p50_p3)  ;;  %v204_v7 = vld [vmem:[%s177_s26 + $0xc8] sm:$0xff] (%p50_p3) }
  0x15   : > { %203 = vst [vmem:[%s171_s27 + $0x30] sm:$0xff] %v202_v6  ;;  %205 = vst [vmem:[%s171_s27 + $0x38] sm:$0xff] %v204_v7 }
  0x16 PF: > { %p1049_p6 = scmp.ge.s32.totalorder %s1329_s16, 1  ;;  %p225_p7 = scmp.lt.s32.totalorder %s1329_s16, 5 }
  0x18   : > { %p226_p8 = pnand %p1049_p6, %p225_p7 }
  0x19   : > { %s232_s28 = sand.u32 (!%p226_p8), 1, %s1313_s12   ;;  %s1051_s29 = sshll.u32 (!%p226_p8), %s1321_s14, 6 }
  0x1a   : > { %229 = sbr.rel (%p226_p8) target bundleno = 344 (0x158), region = 51  ;;  %s1050_s30 = sshll.u32 (!%p226_p8), %s232_s28, 6 }
  0x1b   : > { %p278_p9 = scmp.lt.s32.totalorder (!%p226_p8), %s1051_s29, 255  ;;  %s1404_s8 = scalar_lea.vmem (!%p226_p8), [#allocation3], %s1050_s30 }
  0x1c   : > { %p1054_p10 = scmp.ne.s32.totalorder (!%p226_p8), %s1321_s14, 0 }
  0x21   : > { %s1533_s29 = smov (!%p278_p9, %s1051_s29), 255  ;;  %308 = sbr.rel (%p1054_p10) target bundleno = 40 (0x28), region = 59 }
  0x22   : > { %s1133_s4 = sshll.u32 %s1533_s29, 3  ;;  %v1331_v8 = vmov (!%p1054_p10), 0.0  }
  0x23   : > { %s1402_s7 = scalar_lea.vmem %s1523_s1, %s1133_s4  ;;  %309 = vst [vmem:[#allocation2] sm:$0xff] (!%p1054_p10), %v1331_v8  ;;  %310 = vst [vmem:[#allocation2 + $0x8] sm:$0xff] (!%p1054_p10), %v1331_v8 }
  0x24   : > { %311 = vst [vmem:[#allocation2 + $0x10] sm:$0xff] (!%p1054_p10), %v1331_v8  ;;  %312 = vst [vmem:[#allocation2 + $0x18] sm:$0xff] (!%p1054_p10), %v1331_v8 }
  0x25   : > { %313 = vst [vmem:[#allocation2 + $0x20] sm:$0xff] (!%p1054_p10), %v1331_v8  ;;  %314 = vst [vmem:[#allocation2 + $0x28] sm:$0xff] (!%p1054_p10), %v1331_v8 }
  0x26   : > { %315 = vst [vmem:[#allocation2 + $0x30] sm:$0xff] (!%p1054_p10), %v1331_v8  ;;  %316 = vst [vmem:[#allocation2 + $0x38] sm:$0xff] (!%p1054_p10), %v1331_v8 }
  0x28 PF: > { %v1183_v9 = vld [vmem:[%s1402_s7 + $0x4] ss:$8 sps:$4 sm:$0xff]   ;;  %v1187_v11 = vld [vmem:[%s1402_s7] ss:$8 sps:$4 sm:$0xff]   ;;  %v1189_v13 = vld [vmem:[%s1402_s7 + $0x14] ss:$8 sps:$4 sm:$0xff]  }
  0x29   : > { %v1185_v10 = vld [vmem:[%s1402_s7 + $0x104] ss:$8 sps:$4 sm:$0xff]   ;;  %757 = vmatprep.subr.bf16.mxu1 %v1183_v9  ;;  %v1188_v12 = vld [vmem:[%s1402_s7 + $0x100] ss:$8 sps:$4 sm:$0xff]   ;;  %v1191_v14 = vld [vmem:[%s1402_s7 + $0x114] ss:$8 sps:$4 sm:$0xff]  }
  0x2a   : > { %810 = vmatprep.subr.bf16.mxu0 %v1185_v10  ;;  %758 = vmatpush1.bf16.msra.mxu1 %v1187_v11  ;;  %v1193_v15 = vld [vmem:[%s1402_s7 + $0x10] ss:$8 sps:$4 sm:$0xff]   ;;  %v1195_v17 = vld [vmem:[%s1402_s7 + $0x24] ss:$8 sps:$4 sm:$0xff]   ;;  %v1199_v19 = vld [vmem:[%s1402_s7 + $0x20] ss:$8 sps:$4 sm:$0xff]  }
  0x2b   : > { %811 = vmatpush1.bf16.msra.mxu0 %v1188_v12  ;;  %759 = vmatprep.subr.bf16.mxu1 %v1189_v13  ;;  %v1194_v16 = vld [vmem:[%s1402_s7 + $0x110] ss:$8 sps:$4 sm:$0xff]   ;;  %v1197_v18 = vld [vmem:[%s1402_s7 + $0x124] ss:$8 sps:$4 sm:$0xff]   ;;  %v1200_v20 = vld [vmem:[%s1402_s7 + $0x120] ss:$8 sps:$4 sm:$0xff]  }
  0x2c   : > { %812 = vmatprep.subr.bf16.mxu0 %v1191_v14  ;;  %v1201_v21 = vld [vmem:[%s1402_s7 + $0x34] ss:$8 sps:$4 sm:$0xff]   ;;  %v1205_v23 = vld [vmem:[%s1402_s7 + $0x30] ss:$8 sps:$4 sm:$0xff]   ;;  %v1207_v25 = vld [vmem:[%s1402_s7 + $0x44] ss:$8 sps:$4 sm:$0xff]  }
  0x2d   : > { %v1203_v22 = vld [vmem:[%s1402_s7 + $0x134] ss:$8 sps:$4 sm:$0xff]   ;;  %v1206_v24 = vld [vmem:[%s1402_s7 + $0x130] ss:$8 sps:$4 sm:$0xff]   ;;  %v1209_v26 = vld [vmem:[%s1402_s7 + $0x144] ss:$8 sps:$4 sm:$0xff]  }
  0x2e   : > { %760 = vmatpush1.bf16.msra.mxu1 %v1193_v15  ;;  %v1211_v27 = vld [vmem:[%s1402_s7 + $0x40] ss:$8 sps:$4 sm:$0xff]   ;;  %v1213_v29 = vld [vmem:[%s1402_s7 + $0x54] ss:$8 sps:$4 sm:$0xff]   ;;  %v1217_v31 = vld [vmem:[%s1402_s7 + $0x50] ss:$8 sps:$4 sm:$0xff]  }
  0x2f   : > { %813 = vmatpush1.bf16.msra.mxu0 %v1194_v16  ;;  %761 = vmatprep.subr.bf16.mxu1 %v1195_v17  ;;  %v1212_v28 = vld [vmem:[%s1402_s7 + $0x140] ss:$8 sps:$4 sm:$0xff]   ;;  %v1215_v30 = vld [vmem:[%s1402_s7 + $0x154] ss:$8 sps:$4 sm:$0xff]   ;;  %v1218_v32 = vld [vmem:[%s1402_s7 + $0x150] ss:$8 sps:$4 sm:$0xff]  }
  0x30   : > { %814 = vmatprep.subr.bf16.mxu0 %v1197_v18  ;;  %v1219_v33 = vld [vmem:[%s1402_s7 + $0x64] ss:$8 sps:$4 sm:$0xff]   ;;  %v1223_v35 = vld [vmem:[%s1402_s7 + $0x60] ss:$8 sps:$4 sm:$0xff]   ;;  %v1225_v37 = vld [vmem:[%s1402_s7 + $0x74] ss:$8 sps:$4 sm:$0xff]  }
  0x31   : > { %v1221_v34 = vld [vmem:[%s1402_s7 + $0x164] ss:$8 sps:$4 sm:$0xff]   ;;  %v1224_v36 = vld [vmem:[%s1402_s7 + $0x160] ss:$8 sps:$4 sm:$0xff]   ;;  %v1227_v38 = vld [vmem:[%s1402_s7 + $0x174] ss:$8 sps:$4 sm:$0xff]  }
  0x32   : > { %762 = vmatpush1.bf16.msra.mxu1 %v1199_v19  ;;  %v1229_v39 = vld [vmem:[%s1402_s7 + $0x70] ss:$8 sps:$4 sm:$0xff]   ;;  %v1231_v41 = vld [vmem:[%s1402_s7 + $0x84] ss:$8 sps:$4 sm:$0xff]   ;;  %v1235_v43 = vld [vmem:[%s1402_s7 + $0x80] ss:$8 sps:$4 sm:$0xff]  }
  0x33   : > { %815 = vmatpush1.bf16.msra.mxu0 %v1200_v20  ;;  %763 = vmatprep.subr.bf16.mxu1 %v1201_v21  ;;  %v1230_v40 = vld [vmem:[%s1402_s7 + $0x170] ss:$8 sps:$4 sm:$0xff]   ;;  %v1233_v42 = vld [vmem:[%s1402_s7 + $0x184] ss:$8 sps:$4 sm:$0xff]   ;;  %v1236_v44 = vld [vmem:[%s1402_s7 + $0x180] ss:$8 sps:$4 sm:$0xff]  }
  0x34   : > { %816 = vmatprep.subr.bf16.mxu0 %v1203_v22  ;;  %v1237_v45 = vld [vmem:[%s1402_s7 + $0x94] ss:$8 sps:$4 sm:$0xff]   ;;  %v1241_v47 = vld [vmem:[%s1402_s7 + $0x90] ss:$8 sps:$4 sm:$0xff]   ;;  %v1243_v49 = vld [vmem:[%s1402_s7 + $0xa4] ss:$8 sps:$4 sm:$0xff]  }
  0x35   : > { %v1239_v46 = vld [vmem:[%s1402_s7 + $0x194] ss:$8 sps:$4 sm:$0xff]   ;;  %v1242_v48 = vld [vmem:[%s1402_s7 + $0x190] ss:$8 sps:$4 sm:$0xff]   ;;  %v1245_v50 = vld [vmem:[%s1402_s7 + $0x1a4] ss:$8 sps:$4 sm:$0xff]  }
  0x36   : > { %764 = vmatpush1.bf16.msra.mxu1 %v1205_v23  ;;  %v1247_v51 = vld [vmem:[%s1402_s7 + $0xa0] ss:$8 sps:$4 sm:$0xff]   ;;  %v1249_v53 = vld [vmem:[%s1402_s7 + $0xb4] ss:$8 sps:$4 sm:$0xff]   ;;  %v1253_v55 = vld [vmem:[%s1402_s7 + $0xb0] ss:$8 sps:$4 sm:$0xff]  }
  0x37   : > { %817 = vmatpush1.bf16.msra.mxu0 %v1206_v24  ;;  %765 = vmatprep.subr.bf16.mxu1 %v1207_v25  ;;  %v1248_v52 = vld [vmem:[%s1402_s7 + $0x1a0] ss:$8 sps:$4 sm:$0xff]   ;;  %v1251_v54 = vld [vmem:[%s1402_s7 + $0x1b4] ss:$8 sps:$4 sm:$0xff]   ;;  %v1254_v56 = vld [vmem:[%s1402_s7 + $0x1b0] ss:$8 sps:$4 sm:$0xff]  }
  0x38   : > { %818 = vmatprep.subr.bf16.mxu0 %v1209_v26  ;;  %v1255_v57 = vld [vmem:[%s1402_s7 + $0xc4] ss:$8 sps:$4 sm:$0xff]   ;;  %v1259_v61 = vld [vmem:[%s1402_s7 + $0xc0] ss:$8 sps:$4 sm:$0xff]   ;;  %v1261_v63 = vld [vmem:[%s1402_s7 + $0xd4] ss:$8 sps:$4 sm:$0xff]  }
  0x39   : > { %v1281_v58 = vld [vmem:[%s1404_s8 + $0x4] ss:$16 sps:$4 sm:$0xff]   ;;  %v1284_v60 = vld [vmem:[%s1404_s8 + $0xc] ss:$16 sps:$4 sm:$0xff]   ;;  %v1260_v62 = vld [vmem:[%s1402_s7 + $0x1c0] ss:$8 sps:$4 sm:$0xff]  }
  0x3a   : > { %766 = vmatpush1.bf16.msra.mxu1 %v1211_v27  ;;  %v1257_v59 = vld [vmem:[%s1402_s7 + $0x1c4] ss:$8 sps:$4 sm:$0xff]   ;;  %789 = vmatprep.mubr.bf16.mxu1 %v1281_v58  ;;  %v1263_v0 = vld [vmem:[%s1402_s7 + $0x1d4] ss:$8 sps:$4 sm:$0xff]   ;;  %v1265_v1 = vld [vmem:[%s1402_s7 + $0xd0] ss:$8 sps:$4 sm:$0xff]  }
  0x3b   : > { %819 = vmatpush1.bf16.msra.mxu0 %v1212_v28  ;;  %767 = vmatprep.subr.bf16.mxu1 %v1213_v29  ;;  %v1266_v2 = vld [vmem:[%s1402_s7 + $0x1d0] ss:$8 sps:$4 sm:$0xff]   ;;  %v1267_v3 = vld [vmem:[%s1402_s7 + $0xe4] ss:$8 sps:$4 sm:$0xff]   ;;  %v1271_v5 = vld [vmem:[%s1402_s7 + $0xe0] ss:$8 sps:$4 sm:$0xff]  }
  0x3c   : > { %820 = vmatprep.subr.bf16.mxu0 %v1215_v30  ;;  %842 = vmatprep.mubr.bf16.mxu0 %v1284_v60  ;;  %v1269_v4 = vld [vmem:[%s1402_s7 + $0x1e4] ss:$8 sps:$4 sm:$0xff]   ;;  %v1272_v6 = vld [vmem:[%s1402_s7 + $0x1e0] ss:$8 sps:$4 sm:$0xff]   ;;  %v1273_v7 = vld [vmem:[%s1402_s7 + $0xf4] ss:$8 sps:$4 sm:$0xff]  }
  0x3d   : > { %v1275_v8 = vld [vmem:[%s1402_s7 + $0x1f4] ss:$8 sps:$4 sm:$0xff]   ;;  %v1277_v9 = vld [vmem:[%s1402_s7 + $0xf0] ss:$8 sps:$4 sm:$0xff]   ;;  %v317_v18 = vld [vmem:[#allocation2] sm:$0xff]  ;;  %p1127_p11 = scmp.ne.s32.totalorder %s1321_s14, 3 }
  0x3e   : > { %768 = vmatpush1.bf16.msra.mxu1 %v1217_v31  ;;  %v1278_v10 = vld [vmem:[%s1402_s7 + $0x1f0] ss:$8 sps:$4 sm:$0xff]   ;;  %v1285_v13 = vld [vmem:[%s1404_s8 + $0x24] ss:$16 sps:$4 sm:$0xff]   ;;  %v1287_v14 = vld [vmem:[%s1404_s8 + $0x2c] ss:$16 sps:$4 sm:$0xff]  }
  0x3f   : > { %821 = vmatpush1.bf16.msra.mxu0 %v1218_v32  ;;  %769 = vmatprep.subr.bf16.mxu1 %v1219_v33  ;;  %v1279_v11 = vld [vmem:[%s1404_s8] ss:$16 sps:$4 sm:$0xff]   ;;  %v1282_v12 = vld [vmem:[%s1404_s8 + $0x8] ss:$16 sps:$4 sm:$0xff]  }
  0x40   : > { %822 = vmatprep.subr.bf16.mxu0 %v1221_v34  ;;  %v1289_v15 = vld [vmem:[%s1404_s8 + $0x20] ss:$16 sps:$4 sm:$0xff]   ;;  %v1290_v16 = vld [vmem:[%s1404_s8 + $0x28] ss:$16 sps:$4 sm:$0xff]  }
  0x41   : > { %v318_v22 = vld [vmem:[#allocation2 + $0x8] sm:$0xff]  ;;  %v319_v26 = vld [vmem:[#allocation2 + $0x10] sm:$0xff]  ;;  %v320_v31 = vld [vmem:[#allocation2 + $0x18] sm:$0xff] }
  0x42   : > { %770 = vmatpush1.bf16.msra.mxu1 %v1223_v35 }
  0x43   : > { %823 = vmatpush1.bf16.msra.mxu0 %v1224_v36  ;;  %771 = vmatprep.subr.bf16.mxu1 %v1225_v37 }
  0x44   : > { %824 = vmatprep.subr.bf16.mxu0 %v1227_v38  ;;  %v321_v38 = vld [vmem:[#allocation2 + $0x20] sm:$0xff] }
  0x46   : > { %772 = vmatpush1.bf16.msra.mxu1 %v1229_v39 }
  0x47   : > { %825 = vmatpush1.bf16.msra.mxu0 %v1230_v40  ;;  %773 = vmatprep.subr.bf16.mxu1 %v1231_v41 }
  0x48   : > { %826 = vmatprep.subr.bf16.mxu0 %v1233_v42  ;;  %v322_v42 = vld [vmem:[#allocation2 + $0x28] sm:$0xff] }
  0x4a   : > { %774 = vmatpush1.bf16.msra.mxu1 %v1235_v43 }
  0x4b   : > { %827 = vmatpush1.bf16.msra.mxu0 %v1236_v44  ;;  %775 = vmatprep.subr.bf16.mxu1 %v1237_v45 }
  0x4c   : > { %828 = vmatprep.subr.bf16.mxu0 %v1239_v46  ;;  %v323_v46 = vld [vmem:[#allocation2 + $0x30] sm:$0xff] }
  0x4e   : > { %776 = vmatpush1.bf16.msra.mxu1 %v1241_v47 }
  0x4f   : > { %829 = vmatpush1.bf16.msra.mxu0 %v1242_v48  ;;  %777 = vmatprep.subr.bf16.mxu1 %v1243_v49 }
  0x50   : > { %830 = vmatprep.subr.bf16.mxu0 %v1245_v50 }
  0x52   : > { %778 = vmatpush1.bf16.msra.mxu1 %v1247_v51  ;;  %v324_v51 = vld [vmem:[#allocation2 + $0x38] sm:$0xff] }
  0x53   : > { %831 = vmatpush1.bf16.msra.mxu0 %v1248_v52  ;;  %779 = vmatprep.subr.bf16.mxu1 %v1249_v53 }
  0x54   : > { %832 = vmatprep.subr.bf16.mxu0 %v1251_v54 }
  0x56   : > { %780 = vmatpush1.bf16.msra.mxu1 %v1253_v55 }
  0x57   : > { %833 = vmatpush1.bf16.msra.mxu0 %v1254_v56  ;;  %781 = vmatprep.subr.bf16.mxu1 %v1255_v57  ;;  %v893_v57 = vlaneseq (!%p1127_p11) }
  0x58   : > { %834 = vmatprep.subr.bf16.mxu0 %v1257_v59  ;;  %v891_v59 = vld [vmem:[%s1524_s2] sm:$0x3] (!%p1127_p11) }
  0x59   : > { %v894_v58 = vshrl.u32 (!%p1127_p11), %v893_v57, 7 }
  0x5a   : > { %782 = vmatpush1.bf16.msra.mxu1 %v1259_v61 }
  0x5b   : > { %835 = vmatpush1.bf16.msra.mxu0 %v1260_v62  ;;  %783 = vmatprep.subr.bf16.mxu1 %v1261_v63  ;;  %v895_v61 = vsub.s32 (!%p1127_p11), 0, %v894_v58  ;;  %v899_v63 = vsub.s32 (!%p1127_p11), 1, %v894_v58 }
  0x5c   : > { %836 = vmatprep.subr.bf16.mxu0 %v1263_v0 }
  0x5e   : > { %784 = vmatpush1.bf16.msra.mxu1 %v1265_v1 }
  0x5f   : > { %837 = vmatpush1.bf16.msra.mxu0 %v1266_v2  ;;  %785 = vmatprep.subr.bf16.mxu1 %v1267_v3  ;;  %v896_v3 = vrot.slane (!%p1127_p11), %v891_v59, %v895_v61 }
  0x60   : > { %838 = vmatprep.subr.bf16.mxu0 %v1269_v4  ;;  %v900_v4 = vrot.slane (!%p1127_p11), %v891_v59, %v899_v63 }
  0x62   : > { %786 = vmatpush1.bf16.msra.mxu1 %v1271_v5 }
  0x63   : > { %839 = vmatpush1.bf16.msra.mxu0 %v1272_v6  ;;  %787 = vmatprep.subr.bf16.mxu1 %v1273_v7 }
  0x64   : > { %840 = vmatprep.subr.bf16.mxu0 %v1275_v8 }
  0x66   : > { %788 = vmatpush1.bf16.msra.mxu1 %v1277_v9 }
  0x67   : > { %841 = vmatpush1.bf16.msra.mxu0 %v1278_v10 }
  0x69   : > { %790 = vmatmul.mubr.bf16.vlgmr.msra.gmra.mrb[0].mxu1 %v1279_v11 }
  0x6a   : > { %843 = vmatmul.mubr.bf16.vlgmr.msra.gmra.mrb[0].mxu0 %v1282_v12  ;;  %799 = vmatprep.mubr.bf16.mxu1 %v1285_v13 }
  0x6b   : > { %852 = vmatprep.mubr.bf16.mxu0 %v1287_v14 }
  0x71   : > { %800 = vmatmul.mubr.bf16.gmra.mrb[4].mxu1 %v1289_v15 }
  0x72   : > { %853 = vmatmul.mubr.bf16.gmra.mrb[4].mxu0 %v1290_v16 }
 0x13c   : > { %v791_v17 = vpop.f32.mrb[0].mxu1 }
 0x13d   : > { %v844_v19 = vpop.f32.mrb[0].mxu0  ;;  %v793_v21 = vpop.f32.mrb[1].mxu1 }
 0x13e   : > { %v845_v20 = vadd.f32 %v844_v19, %v791_v17  ;;  %v846_v23 = vpop.f32.mrb[1].mxu0  ;;  %v795_v25 = vpop.f32.mrb[2].mxu1 }
 0x13f   : > { %v847_v24 = vadd.f32 %v846_v23, %v793_v21  ;;  %v848_v27 = vpop.f32.mrb[2].mxu0  ;;  %v797_v30 = vpop.f32.mrb[3].mxu1 }
 0x140   : > { %v863_v28 = vadd.f32 %v845_v20, %v317_v18  ;;  %v849_v29 = vadd.f32 %v848_v27, %v795_v25  ;;  %v850_v32 = vpop.f32.mrb[3].mxu0 }
 0x141   : > { %v864_v33 = vadd.f32 %v847_v24, %v318_v22  ;;  %v851_v34 = vadd.f32 %v850_v32, %v797_v30 }
 0x142   : > { %871 = vst [vmem:[#allocation2] sm:$0xff] %v863_v28  ;;  %v865_v35 = vadd.f32 %v849_v29, %v319_v26 }
 0x143   : > { %872 = vst [vmem:[#allocation2 + $0x8] sm:$0xff] %v864_v33  ;;  %v866_v36 = vadd.f32 %v851_v34, %v320_v31 }
 0x144   : > { %873 = vst [vmem:[#allocation2 + $0x10] sm:$0xff] %v865_v35  ;;  %v801_v37 = vpop.f32.mrb[4].mxu1 }
 0x145   : > { %874 = vst [vmem:[#allocation2 + $0x18] sm:$0xff] %v866_v36  ;;  %v854_v39 = vpop.f32.mrb[4].mxu0  ;;  %v803_v41 = vpop.f32.mrb[5].mxu1 }
 0x146   : > { %v855_v40 = vadd.f32 %v854_v39, %v801_v37  ;;  %v856_v43 = vpop.f32.mrb[5].mxu0  ;;  %v805_v45 = vpop.f32.mrb[6].mxu1 }
 0x147   : > { %v857_v44 = vadd.f32 %v856_v43, %v803_v41  ;;  %v858_v47 = vpop.f32.mrb[6].mxu0  ;;  %v807_v50 = vpop.f32.mrb[7].mxu1  ;;  %882 = sbr.rel (%p1127_p11) target bundleno = 344 (0x158), region = 63 }
 0x148   : > { %v867_v48 = vadd.f32 %v855_v40, %v321_v38  ;;  %v859_v49 = vadd.f32 %v858_v47, %v805_v45  ;;  %v860_v52 = vpop.f32.mrb[7].mxu0 }
 0x149   : > { %v868_v53 = vadd.f32 %v857_v44, %v322_v42  ;;  %v861_v54 = vadd.f32 %v860_v52, %v807_v50  ;;  %v883_v60 = vld [vmem:[#allocation2] sm:$0xff] (!%p1127_p11) }
 0x14a   : > { %875 = vst [vmem:[#allocation2 + $0x20] sm:$0xff] %v867_v48  ;;  %v869_v55 = vadd.f32 %v859_v49, %v323_v46  ;;  %v884_v62 = vld [vmem:[#allocation2 + $0x8] sm:$0xff] (!%p1127_p11)  ;;  %v903_v8 = vadd.f32 (!%p1127_p11), %v896_v3, %v883_v60 }
 0x14b   : > { %876 = vst [vmem:[#allocation2 + $0x28] sm:$0xff] %v868_v53  ;;  %v870_v56 = vadd.f32 %v861_v54, %v324_v51  ;;  %v885_v0 = vld [vmem:[#allocation2 + $0x10] sm:$0xff] (!%p1127_p11)  ;;  %v904_v9 = vadd.f32 (!%p1127_p11), %v900_v4, %v884_v62 }
 0x14c   : > { %877 = vst [vmem:[#allocation2 + $0x30] sm:$0xff] %v869_v55  ;;  %v886_v1 = vld [vmem:[#allocation2 + $0x18] sm:$0xff] (!%p1127_p11)  ;;  %v905_v10 = vadd.f32 (!%p1127_p11), %v896_v3, %v885_v0  ;;  %911 = vst [vmem:[%s1525_s3] sm:$0xff] (!%p1127_p11), %v903_v8 }
 0x14d   : > { %878 = vst [vmem:[#allocation2 + $0x38] sm:$0xff] %v870_v56  ;;  %v906_v11 = vadd.f32 (!%p1127_p11), %v900_v4, %v886_v1  ;;  %912 = vst [vmem:[%s1525_s3 + $0x8] sm:$0xff] (!%p1127_p11), %v904_v9 }
 0x14e   : > { %913 = vst [vmem:[%s1525_s3 + $0x10] sm:$0xff] %v905_v10 }
 0x14f   : > { %914 = vst [vmem:[%s1525_s3 + $0x18] sm:$0xff] %v906_v11 }
 0x151   : > { %v887_v2 = vld [vmem:[#allocation2 + $0x20] sm:$0xff] }
 0x152   : > { %v888_v5 = vld [vmem:[#allocation2 + $0x28] sm:$0xff]  ;;  %v907_v12 = vadd.f32 %v896_v3, %v887_v2 }
 0x153   : > { %v889_v6 = vld [vmem:[#allocation2 + $0x30] sm:$0xff]  ;;  %v908_v13 = vadd.f32 %v900_v4, %v888_v5 }
 0x154   : > { %v890_v7 = vld [vmem:[#allocation2 + $0x38] sm:$0xff]  ;;  %v909_v14 = vadd.f32 %v896_v3, %v889_v6  ;;  %915 = vst [vmem:[%s1525_s3 + $0x20] sm:$0xff] %v907_v12 }
 0x155   : > { %v910_v15 = vadd.f32 %v900_v4, %v890_v7  ;;  %916 = vst [vmem:[%s1525_s3 + $0x28] sm:$0xff] %v908_v13 }
 0x156   : > { %917 = vst [vmem:[%s1525_s3 + $0x30] sm:$0xff] %v909_v14 }
 0x157   : > { %918 = vst [vmem:[%s1525_s3 + $0x38] sm:$0xff] %v910_v15 }
 0x158 PF: > { %s13_s16 = sadd.s32 1, %s1329_s16   ;;  %s1526_s12 = smov %s1317_s13 }
 0x159   : > { %p10_p12 = scmp.ge.s32.totalorder %s13_s16, 6   ;;  %s1527_s13 = smov %s1387_s20 }
 0x15a   : > { %s1528_s14 = smov %s1325_s15  ;;  %s1529_s15 = smov %s1531_s17 }
 0x15b   :  { %12 = sbr.rel (!%p10_p12) target bundleno = 3 (0x3), region = 104 }

// kernel: discriminator_forward.13
= control target key start
LH: loop header
LB: loop body
LE: loop exit
PB: predicated region body
PF: predicated region fallthrough
CT: control target
= control target key end

     0   :  { %s1512_s12 = smov 0   ;;  %s1514_s13 = smov 0   ;;  %s1824_s0 = inlined_call_operand.vmem [shape: bf16[8,4096], index: 0, kind: input, shape index: {}]   ;;  %s1825_s1 = inlined_call_operand.vmem [shape: bf16[4096,512], index: 1, kind: input, shape index: {}]   ;;  %s1826_s2 = inlined_call_operand.vmem [shape: f32[1,512], index: 2, kind: input, shape index: {}]   ;;  %s1827_s3 = inlined_call_operand.vmem [shape: f32[8,512], index: 3, kind: output, shape index: {}]  }
   0x1   :  { %s1516_s14 = smov 0   ;;  %s1518_s15 = smov 0  }
   0x2   :  { %s1520_s16 = smov 0   ;;  %s1522_s17 = smov 0  }
   0x3   :  { %s1524_s18 = smov 0  }
   0x4 LB: > { %s25_s19 = sadd.s32 1, %s1481_s16  ;;  %s28_s20 = sadd.s32 1, %s1485_s17  ;;  %s1489_s18 = sphi %s1524_s18, %s13_s18   ;;  %s1485_s17 = sphi %s1522_s17, %s1833_s17   ;;  %s1481_s16 = sphi %s1520_s16, %s1832_s16   ;;  %s1477_s15 = sphi %s1518_s15, %s1831_s15   ;;  %s1473_s14 = sphi %s1516_s14, %s1830_s14   ;;  %s1469_s13 = sphi %s1514_s13, %s1829_s13   ;;  %s1465_s12 = sphi %s1512_s12, %s1828_s12  }
   0x5   : > { %p26_p0 = scmp.ge.s32.totalorder %s25_s19, 8  ;;  %p76_p1 = scmp.ne.s32.totalorder %s1469_s13, %s1465_s12 }
   0x6   : > { %p77_p2 = scmp.eq.s32.totalorder %s1489_s18, 0  ;;  %s69_s24 = sadd.s32 1, %s1469_s13 }
   0x7   : > { %s1835_s19 = smov (%p26_p0, %s25_s19), 0  ;;  %s1837_s20 = smov (!%p26_p0, %s28_s20), %s1485_s17 }
   0x8   : > { %p78_p3 = por %p77_p2, %p76_p1  ;;  %p30_p4 = scmp.ge.s32.totalorder %s1837_s20, 2 }
   0x9   : > { %s64_s21 = ssub.s32 %s1481_s16, %s1835_s19  ;;  %p1192_p6 = scmp.ge.s32.totalorder %s1489_s18, 16 }
   0xa   : > { %s1839_s20 = smov (%p30_p4, %s1837_s20), 0 }
   0xb   : > { %s65_s22 = ssub.s32 %s1485_s17, %s1839_s20  ;;  %156 = sbr.rel (%p1192_p6) target bundleno = 57 (0x39), region = 16 }
   0xc   : > { %s66_s23 = sor.u32 %s65_s22, %s64_s21 }
   0xd   : > { %p67_p5 = scmp.eq.s32.totalorder %s66_s23, 0 }
   0xf   : > { %s1563_s25 = scalar_select %p67_p5, %s1469_s13, %s69_s24  }
  0x12   : > { %172 = sbr.rel (!%p78_p3) target bundleno = 57 (0x39), region = 24  ;;  %s174_s26 = sand.u32 (%p78_p3), 1, %s1469_s13  }
  0x13   : > { %s1195_s27 = sshll.u32 (%p78_p3), %s1485_s17, 1  ;;  %s1193_s28 = sshll.u32 (%p78_p3), %s174_s26, 9 }
  0x14   : > { %s1277_s29 = sshll.u32 (%p78_p3), %s1481_s16, 8  ;;  %s1577_s8 = scalar_lea.vmem (%p78_p3), [#allocation3], %s1193_s28 }
  0x15   : > { %s180_s30 = sadd.s32 (%p78_p3), %s1277_s29, %s1195_s27 }
  0x16   : > { %s1197_s4 = sshll.u32 (%p78_p3), %s180_s30, 2 }
  0x17   : > { %s1572_s7 = scalar_lea.vmem (%p78_p3), %s1825_s1, %s1197_s4 }
  0x18   : > { %v336_v0 = vld [vmem:[%s1572_s7] sm:$0xff] (%p78_p3)  ;;  %v338_v1 = vld [vmem:[%s1572_s7 + $0x10] sm:$0xff] (%p78_p3) }
  0x19   : > { %v340_v2 = vld [vmem:[%s1572_s7 + $0x20] sm:$0xff]  ;;  %337 = vst [vmem:[%s1577_s8] sm:$0xff] %v336_v0  ;;  %339 = vst [vmem:[%s1577_s8 + $0x8] sm:$0xff] %v338_v1  ;;  %v342_v3 = vld [vmem:[%s1572_s7 + $0x30] sm:$0xff] }
  0x1a   : > { %341 = vst [vmem:[%s1577_s8 + $0x10] sm:$0xff] %v340_v2  ;;  %v344_v4 = vld [vmem:[%s1572_s7 + $0x40] sm:$0xff]  ;;  %v346_v5 = vld [vmem:[%s1572_s7 + $0x50] sm:$0xff]  ;;  %343 = vst [vmem:[%s1577_s8 + $0x18] sm:$0xff] %v342_v3 }
  0x1b   : > { %345 = vst [vmem:[%s1577_s8 + $0x20] sm:$0xff] %v344_v4  ;;  %347 = vst [vmem:[%s1577_s8 + $0x28] sm:$0xff] %v346_v5  ;;  %v348_v6 = vld [vmem:[%s1572_s7 + $0x60] sm:$0xff]  ;;  %v350_v7 = vld [vmem:[%s1572_s7 + $0x70] sm:$0xff] }
  0x1c   : > { %v352_v8 = vld [vmem:[%s1572_s7 + $0x80] sm:$0xff]  ;;  %349 = vst [vmem:[%s1577_s8 + $0x30] sm:$0xff] %v348_v6  ;;  %351 = vst [vmem:[%s1577_s8 + $0x38] sm:$0xff] %v350_v7  ;;  %v354_v9 = vld [vmem:[%s1572_s7 + $0x90] sm:$0xff] }
  0x1d   : > { %353 = vst [vmem:[%s1577_s8 + $0x40] sm:$0xff] %v352_v8  ;;  %v356_v10 = vld [vmem:[%s1572_s7 + $0xa0] sm:$0xff]  ;;  %v358_v11 = vld [vmem:[%s1572_s7 + $0xb0] sm:$0xff]  ;;  %355 = vst [vmem:[%s1577_s8 + $0x48] sm:$0xff] %v354_v9 }
  0x1e   : > { %357 = vst [vmem:[%s1577_s8 + $0x50] sm:$0xff] %v356_v10  ;;  %359 = vst [vmem:[%s1577_s8 + $0x58] sm:$0xff] %v358_v11  ;;  %v360_v12 = vld [vmem:[%s1572_s7 + $0xc0] sm:$0xff]  ;;  %v362_v13 = vld [vmem:[%s1572_s7 + $0xd0] sm:$0xff] }
  0x1f   : > { %v364_v14 = vld [vmem:[%s1572_s7 + $0xe0] sm:$0xff]  ;;  %361 = vst [vmem:[%s1577_s8 + $0x60] sm:$0xff] %v360_v12  ;;  %363 = vst [vmem:[%s1577_s8 + $0x68] sm:$0xff] %v362_v13  ;;  %v366_v15 = vld [vmem:[%s1572_s7 + $0xf0] sm:$0xff] }
  0x20   : > { %365 = vst [vmem:[%s1577_s8 + $0x70] sm:$0xff] %v364_v14  ;;  %v368_v16 = vld [vmem:[%s1572_s7 + $0x100] sm:$0xff]  ;;  %v370_v17 = vld [vmem:[%s1572_s7 + $0x110] sm:$0xff]  ;;  %367 = vst [vmem:[%s1577_s8 + $0x78] sm:$0xff] %v366_v15 }
  0x21   : > { %369 = vst [vmem:[%s1577_s8 + $0x80] sm:$0xff] %v368_v16  ;;  %371 = vst [vmem:[%s1577_s8 + $0x88] sm:$0xff] %v370_v17  ;;  %v372_v18 = vld [vmem:[%s1572_s7 + $0x120] sm:$0xff]  ;;  %v374_v19 = vld [vmem:[%s1572_s7 + $0x130] sm:$0xff] }
  0x22   : > { %v376_v20 = vld [vmem:[%s1572_s7 + $0x140] sm:$0xff]  ;;  %373 = vst [vmem:[%s1577_s8 + $0x90] sm:$0xff] %v372_v18  ;;  %375 = vst [vmem:[%s1577_s8 + $0x98] sm:$0xff] %v374_v19  ;;  %v378_v21 = vld [vmem:[%s1572_s7 + $0x150] sm:$0xff] }
  0x23   : > { %377 = vst [vmem:[%s1577_s8 + $0xa0] sm:$0xff] %v376_v20  ;;  %v380_v22 = vld [vmem:[%s1572_s7 + $0x160] sm:$0xff]  ;;  %v382_v23 = vld [vmem:[%s1572_s7 + $0x170] sm:$0xff]  ;;  %379 = vst [vmem:[%s1577_s8 + $0xa8] sm:$0xff] %v378_v21 }
  0x24   : > { %381 = vst [vmem:[%s1577_s8 + $0xb0] sm:$0xff] %v380_v22  ;;  %383 = vst [vmem:[%s1577_s8 + $0xb8] sm:$0xff] %v382_v23  ;;  %v384_v24 = vld [vmem:[%s1572_s7 + $0x180] sm:$0xff]  ;;  %v386_v25 = vld [vmem:[%s1572_s7 + $0x190] sm:$0xff] }
  0x25   : > { %v388_v26 = vld [vmem:[%s1572_s7 + $0x1a0] sm:$0xff]  ;;  %385 = vst [vmem:[%s1577_s8 + $0xc0] sm:$0xff] %v384_v24  ;;  %387 = vst [vmem:[%s1577_s8 + $0xc8] sm:$0xff] %v386_v25  ;;  %v390_v27 = vld [vmem:[%s1572_s7 + $0x1b0] sm:$0xff] }
  0x26   : > { %389 = vst [vmem:[%s1577_s8 + $0xd0] sm:$0xff] %v388_v26  ;;  %v392_v28 = vld [vmem:[%s1572_s7 + $0x1c0] sm:$0xff]  ;;  %v394_v29 = vld [vmem:[%s1572_s7 + $0x1d0] sm:$0xff]  ;;  %391 = vst [vmem:[%s1577_s8 + $0xd8] sm:$0xff] %v390_v27 }
  0x27   : > { %393 = vst [vmem:[%s1577_s8 + $0xe0] sm:$0xff] %v392_v28  ;;  %395 = vst [vmem:[%s1577_s8 + $0xe8] sm:$0xff] %v394_v29  ;;  %v396_v30 = vld [vmem:[%s1572_s7 + $0x1e0] sm:$0xff]  ;;  %v398_v31 = vld [vmem:[%s1572_s7 + $0x1f0] sm:$0xff] }
  0x28   : > { %v400_v32 = vld [vmem:[%s1572_s7 + $0x200] sm:$0xff]  ;;  %397 = vst [vmem:[%s1577_s8 + $0xf0] sm:$0xff] %v396_v30  ;;  %399 = vst [vmem:[%s1577_s8 + $0xf8] sm:$0xff] %v398_v31  ;;  %v402_v33 = vld [vmem:[%s1572_s7 + $0x210] sm:$0xff] }
  0x29   : > { %401 = vst [vmem:[%s1577_s8 + $0x100] sm:$0xff] %v400_v32  ;;  %v404_v34 = vld [vmem:[%s1572_s7 + $0x220] sm:$0xff]  ;;  %v406_v35 = vld [vmem:[%s1572_s7 + $0x230] sm:$0xff]  ;;  %403 = vst [vmem:[%s1577_s8 + $0x108] sm:$0xff] %v402_v33 }
  0x2a   : > { %405 = vst [vmem:[%s1577_s8 + $0x110] sm:$0xff] %v404_v34  ;;  %407 = vst [vmem:[%s1577_s8 + $0x118] sm:$0xff] %v406_v35  ;;  %v408_v36 = vld [vmem:[%s1572_s7 + $0x240] sm:$0xff]  ;;  %v410_v37 = vld [vmem:[%s1572_s7 + $0x250] sm:$0xff] }
  0x2b   : > { %v412_v38 = vld [vmem:[%s1572_s7 + $0x260] sm:$0xff]  ;;  %409 = vst [vmem:[%s1577_s8 + $0x120] sm:$0xff] %v408_v36  ;;  %411 = vst [vmem:[%s1577_s8 + $0x128] sm:$0xff] %v410_v37  ;;  %v414_v39 = vld [vmem:[%s1572_s7 + $0x270] sm:$0xff] }
  0x2c   : > { %413 = vst [vmem:[%s1577_s8 + $0x130] sm:$0xff] %v412_v38  ;;  %v416_v40 = vld [vmem:[%s1572_s7 + $0x280] sm:$0xff]  ;;  %v418_v41 = vld [vmem:[%s1572_s7 + $0x290] sm:$0xff]  ;;  %415 = vst [vmem:[%s1577_s8 + $0x138] sm:$0xff] %v414_v39 }
  0x2d   : > { %417 = vst [vmem:[%s1577_s8 + $0x140] sm:$0xff] %v416_v40  ;;  %419 = vst [vmem:[%s1577_s8 + $0x148] sm:$0xff] %v418_v41  ;;  %v420_v42 = vld [vmem:[%s1572_s7 + $0x2a0] sm:$0xff]  ;;  %v422_v43 = vld [vmem:[%s1572_s7 + $0x2b0] sm:$0xff] }
  0x2e   : > { %v424_v44 = vld [vmem:[%s1572_s7 + $0x2c0] sm:$0xff]  ;;  %421 = vst [vmem:[%s1577_s8 + $0x150] sm:$0xff] %v420_v42  ;;  %423 = vst [vmem:[%s1577_s8 + $0x158] sm:$0xff] %v422_v43  ;;  %v426_v45 = vld [vmem:[%s1572_s7 + $0x2d0] sm:$0xff] }
  0x2f   : > { %425 = vst [vmem:[%s1577_s8 + $0x160] sm:$0xff] %v424_v44  ;;  %v428_v46 = vld [vmem:[%s1572_s7 + $0x2e0] sm:$0xff]  ;;  %v430_v47 = vld [vmem:[%s1572_s7 + $0x2f0] sm:$0xff]  ;;  %427 = vst [vmem:[%s1577_s8 + $0x168] sm:$0xff] %v426_v45 }
  0x30   : > { %429 = vst [vmem:[%s1577_s8 + $0x170] sm:$0xff] %v428_v46  ;;  %431 = vst [vmem:[%s1577_s8 + $0x178] sm:$0xff] %v430_v47  ;;  %v432_v48 = vld [vmem:[%s1572_s7 + $0x300] sm:$0xff]  ;;  %v434_v49 = vld [vmem:[%s1572_s7 + $0x310] sm:$0xff] }
  0x31   : > { %v436_v50 = vld [vmem:[%s1572_s7 + $0x320] sm:$0xff]  ;;  %433 = vst [vmem:[%s1577_s8 + $0x180] sm:$0xff] %v432_v48  ;;  %435 = vst [vmem:[%s1577_s8 + $0x188] sm:$0xff] %v434_v49  ;;  %v438_v51 = vld [vmem:[%s1572_s7 + $0x330] sm:$0xff] }
  0x32   : > { %437 = vst [vmem:[%s1577_s8 + $0x190] sm:$0xff] %v436_v50  ;;  %v440_v52 = vld [vmem:[%s1572_s7 + $0x340] sm:$0xff]  ;;  %v442_v53 = vld [vmem:[%s1572_s7 + $0x350] sm:$0xff]  ;;  %439 = vst [vmem:[%s1577_s8 + $0x198] sm:$0xff] %v438_v51 }
  0x33   : > { %441 = vst [vmem:[%s1577_s8 + $0x1a0] sm:$0xff] %v440_v52  ;;  %443 = vst [vmem:[%s1577_s8 + $0x1a8] sm:$0xff] %v442_v53  ;;  %v444_v54 = vld [vmem:[%s1572_s7 + $0x360] sm:$0xff]  ;;  %v446_v55 = vld [vmem:[%s1572_s7 + $0x370] sm:$0xff] }
  0x34   : > { %v448_v56 = vld [vmem:[%s1572_s7 + $0x380] sm:$0xff]  ;;  %445 = vst [vmem:[%s1577_s8 + $0x1b0] sm:$0xff] %v444_v54  ;;  %447 = vst [vmem:[%s1577_s8 + $0x1b8] sm:$0xff] %v446_v55  ;;  %v450_v57 = vld [vmem:[%s1572_s7 + $0x390] sm:$0xff] }
  0x35   : > { %449 = vst [vmem:[%s1577_s8 + $0x1c0] sm:$0xff] %v448_v56  ;;  %v452_v58 = vld [vmem:[%s1572_s7 + $0x3a0] sm:$0xff]  ;;  %v454_v59 = vld [vmem:[%s1572_s7 + $0x3b0] sm:$0xff]  ;;  %451 = vst [vmem:[%s1577_s8 + $0x1c8] sm:$0xff] %v450_v57 }
  0x36   : > { %453 = vst [vmem:[%s1577_s8 + $0x1d0] sm:$0xff] %v452_v58  ;;  %455 = vst [vmem:[%s1577_s8 + $0x1d8] sm:$0xff] %v454_v59  ;;  %v456_v60 = vld [vmem:[%s1572_s7 + $0x3c0] sm:$0xff]  ;;  %v458_v61 = vld [vmem:[%s1572_s7 + $0x3d0] sm:$0xff] }
  0x37   : > { %v460_v62 = vld [vmem:[%s1572_s7 + $0x3e0] sm:$0xff]  ;;  %457 = vst [vmem:[%s1577_s8 + $0x1e0] sm:$0xff] %v456_v60  ;;  %459 = vst [vmem:[%s1577_s8 + $0x1e8] sm:$0xff] %v458_v61  ;;  %v462_v63 = vld [vmem:[%s1572_s7 + $0x3f0] sm:$0xff] }
  0x38   : > { %461 = vst [vmem:[%s1577_s8 + $0x1f0] sm:$0xff] %v460_v62  ;;  %463 = vst [vmem:[%s1577_s8 + $0x1f8] sm:$0xff] %v462_v63 }
  0x39 PF: > { %p1198_p7 = scmp.ge.s32.totalorder %s1489_s18, 1  ;;  %p476_p8 = scmp.lt.s32.totalorder %s1489_s18, 17 }
  0x3b   : > { %p477_p9 = pnand %p1198_p7, %p476_p8 }
  0x3c   : > { %s483_s9 = sand.u32 (!%p477_p9), 1, %s1465_s12   ;;  %s1200_s10 = sshll.u32 (!%p477_p9), %s1473_s14, 2 }
  0x3d   : > { %480 = sbr.rel (%p477_p9) target bundleno = 372 (0x174), region = 66  ;;  %s1199_s11 = sshll.u32 (!%p477_p9), %s483_s9, 9 }
  0x3e   : > { %p526_p10 = scmp.lt.s32.totalorder (!%p477_p9), %s1200_s10, 31  ;;  %s1202_s21 = sshll.u32 (!%p477_p9), %s1477_s15, 1 }
  0x3f   : > { %p536_p11 = scmp.lt.s32.totalorder (!%p477_p9), %s1202_s21, 3  ;;  %s1726_s5 = scalar_lea.vmem (!%p477_p9), [#allocation3], %s1199_s11 }
  0x40   : > { %p1205_p12 = scmp.ne.s32.totalorder (!%p477_p9), %s1473_s14, 0 }
  0x44   : > { %s1841_s10 = smov (!%p526_p10, %s1200_s10), 31  ;;  %s1843_s21 = smov (!%p536_p11, %s1202_s21), 3 }
  0x45   : > { %s1201_s22 = sshll.u32 %s1841_s10, 2  ;;  %s538_s12 = scalar_lea.vmem %s1826_s2, %s1843_s21  ;;  %v1491_v0 = vmov (!%p1205_p12), 0.0  }
  0x46   : > { %s1712_s26 = scalar_lea.vmem %s1824_s0, %s1201_s22  ;;  %s1204_s29 = sshll.u32 %s1843_s21, 3  ;;  %554 = vst [vmem:[#allocation2] sm:$0xff] (!%p1205_p12), %v1491_v0  ;;  %555 = vst [vmem:[#allocation2 + $0x8] sm:$0xff] (!%p1205_p12), %v1491_v0 }
  0x47   : > { %s1724_s15 = scalar_lea.vmem %s1827_s3, %s1204_s29  ;;  %553 = sbr.rel (%p1205_p12) target bundleno = 78 (0x4e), region = 74 }
  0x4e PF: > { %v1335_v1 = vld [vmem:[%s1726_s5 + $0x4] ss:$8 sps:$4 sm:$0xff]   ;;  %v1339_v3 = vld [vmem:[%s1726_s5] ss:$8 sps:$4 sm:$0xff]   ;;  %v1341_v5 = vld [vmem:[%s1726_s5 + $0x14] ss:$8 sps:$4 sm:$0xff]  }
  0x4f   : > { %v1337_v2 = vld [vmem:[%s1726_s5 + $0x104] ss:$8 sps:$4 sm:$0xff]   ;;  %958 = vmatprep.subr.bf16.mxu0 %v1335_v1  ;;  %v1340_v4 = vld [vmem:[%s1726_s5 + $0x100] ss:$8 sps:$4 sm:$0xff]   ;;  %v1343_v6 = vld [vmem:[%s1726_s5 + $0x114] ss:$8 sps:$4 sm:$0xff]  }
  0x50   : > { %999 = vmatprep.subr.bf16.mxu1 %v1337_v2  ;;  %959 = vmatpush1.bf16.msra.mxu0 %v1339_v3  ;;  %v1345_v7 = vld [vmem:[%s1726_s5 + $0x10] ss:$8 sps:$4 sm:$0xff]   ;;  %v1347_v9 = vld [vmem:[%s1726_s5 + $0x24] ss:$8 sps:$4 sm:$0xff]   ;;  %v1351_v11 = vld [vmem:[%s1726_s5 + $0x20] ss:$8 sps:$4 sm:$0xff]  }
  0x51   : > { %1000 = vmatpush1.bf16.msra.mxu1 %v1340_v4  ;;  %960 = vmatprep.subr.bf16.mxu0 %v1341_v5  ;;  %v1346_v8 = vld [vmem:[%s1726_s5 + $0x110] ss:$8 sps:$4 sm:$0xff]   ;;  %v1349_v10 = vld [vmem:[%s1726_s5 + $0x124] ss:$8 sps:$4 sm:$0xff]   ;;  %v1352_v12 = vld [vmem:[%s1726_s5 + $0x120] ss:$8 sps:$4 sm:$0xff]  }
  0x52   : > { %1001 = vmatprep.subr.bf16.mxu1 %v1343_v6  ;;  %v1353_v13 = vld [vmem:[%s1726_s5 + $0x34] ss:$8 sps:$4 sm:$0xff]   ;;  %v1357_v15 = vld [vmem:[%s1726_s5 + $0x30] ss:$8 sps:$4 sm:$0xff]   ;;  %v1359_v17 = vld [vmem:[%s1726_s5 + $0x44] ss:$8 sps:$4 sm:$0xff]  }
  0x53   : > { %v1355_v14 = vld [vmem:[%s1726_s5 + $0x134] ss:$8 sps:$4 sm:$0xff]   ;;  %v1358_v16 = vld [vmem:[%s1726_s5 + $0x130] ss:$8 sps:$4 sm:$0xff]   ;;  %v1361_v18 = vld [vmem:[%s1726_s5 + $0x144] ss:$8 sps:$4 sm:$0xff]  }
  0x54   : > { %961 = vmatpush1.bf16.msra.mxu0 %v1345_v7  ;;  %v1363_v19 = vld [vmem:[%s1726_s5 + $0x40] ss:$8 sps:$4 sm:$0xff]   ;;  %v1365_v21 = vld [vmem:[%s1726_s5 + $0x54] ss:$8 sps:$4 sm:$0xff]   ;;  %v1369_v23 = vld [vmem:[%s1726_s5 + $0x50] ss:$8 sps:$4 sm:$0xff]  }
  0x55   : > { %1002 = vmatpush1.bf16.msra.mxu1 %v1346_v8  ;;  %962 = vmatprep.subr.bf16.mxu0 %v1347_v9  ;;  %v1364_v20 = vld [vmem:[%s1726_s5 + $0x140] ss:$8 sps:$4 sm:$0xff]   ;;  %v1367_v22 = vld [vmem:[%s1726_s5 + $0x154] ss:$8 sps:$4 sm:$0xff]   ;;  %v1370_v24 = vld [vmem:[%s1726_s5 + $0x150] ss:$8 sps:$4 sm:$0xff]  }
  0x56   : > { %1003 = vmatprep.subr.bf16.mxu1 %v1349_v10  ;;  %v1371_v25 = vld [vmem:[%s1726_s5 + $0x64] ss:$8 sps:$4 sm:$0xff]   ;;  %v1375_v27 = vld [vmem:[%s1726_s5 + $0x60] ss:$8 sps:$4 sm:$0xff]   ;;  %v1377_v29 = vld [vmem:[%s1726_s5 + $0x74] ss:$8 sps:$4 sm:$0xff]  }
  0x57   : > { %v1373_v26 = vld [vmem:[%s1726_s5 + $0x164] ss:$8 sps:$4 sm:$0xff]   ;;  %v1376_v28 = vld [vmem:[%s1726_s5 + $0x160] ss:$8 sps:$4 sm:$0xff]   ;;  %v1379_v30 = vld [vmem:[%s1726_s5 + $0x174] ss:$8 sps:$4 sm:$0xff]  }
  0x58   : > { %963 = vmatpush1.bf16.msra.mxu0 %v1351_v11  ;;  %v1381_v31 = vld [vmem:[%s1726_s5 + $0x70] ss:$8 sps:$4 sm:$0xff]   ;;  %v1383_v33 = vld [vmem:[%s1726_s5 + $0x84] ss:$8 sps:$4 sm:$0xff]   ;;  %v1387_v35 = vld [vmem:[%s1726_s5 + $0x80] ss:$8 sps:$4 sm:$0xff]  }
  0x59   : > { %1004 = vmatpush1.bf16.msra.mxu1 %v1352_v12  ;;  %964 = vmatprep.subr.bf16.mxu0 %v1353_v13  ;;  %v1382_v32 = vld [vmem:[%s1726_s5 + $0x170] ss:$8 sps:$4 sm:$0xff]   ;;  %v1385_v34 = vld [vmem:[%s1726_s5 + $0x184] ss:$8 sps:$4 sm:$0xff]   ;;  %v1388_v36 = vld [vmem:[%s1726_s5 + $0x180] ss:$8 sps:$4 sm:$0xff]  }
  0x5a   : > { %1005 = vmatprep.subr.bf16.mxu1 %v1355_v14  ;;  %v1389_v37 = vld [vmem:[%s1726_s5 + $0x94] ss:$8 sps:$4 sm:$0xff]   ;;  %v1393_v39 = vld [vmem:[%s1726_s5 + $0x90] ss:$8 sps:$4 sm:$0xff]   ;;  %v1395_v41 = vld [vmem:[%s1726_s5 + $0xa4] ss:$8 sps:$4 sm:$0xff]  }
  0x5b   : > { %v1391_v38 = vld [vmem:[%s1726_s5 + $0x194] ss:$8 sps:$4 sm:$0xff]   ;;  %v1394_v40 = vld [vmem:[%s1726_s5 + $0x190] ss:$8 sps:$4 sm:$0xff]   ;;  %v1397_v42 = vld [vmem:[%s1726_s5 + $0x1a4] ss:$8 sps:$4 sm:$0xff]  }
  0x5c   : > { %965 = vmatpush1.bf16.msra.mxu0 %v1357_v15  ;;  %v1399_v43 = vld [vmem:[%s1726_s5 + $0xa0] ss:$8 sps:$4 sm:$0xff]   ;;  %v1401_v45 = vld [vmem:[%s1726_s5 + $0xb4] ss:$8 sps:$4 sm:$0xff]   ;;  %v1405_v50 = vld [vmem:[%s1726_s5 + $0xb0] ss:$8 sps:$4 sm:$0xff]  }
  0x5d   : > { %1006 = vmatpush1.bf16.msra.mxu1 %v1358_v16  ;;  %966 = vmatprep.subr.bf16.mxu0 %v1359_v17  ;;  %v1400_v44 = vld [vmem:[%s1726_s5 + $0x1a0] ss:$8 sps:$4 sm:$0xff]   ;;  %v1403_v46 = vld [vmem:[%s1726_s5 + $0x1b4] ss:$8 sps:$4 sm:$0xff]   ;;  %v1406_v51 = vld [vmem:[%s1726_s5 + $0x1b0] ss:$8 sps:$4 sm:$0xff]  }
  0x5e   : > { %1007 = vmatprep.subr.bf16.mxu1 %v1361_v18  ;;  %v558_v47 = vld [vmem:[%s1712_s26] sm:$0xff]  ;;  %v559_v49 = vld [vmem:[%s1712_s26 + $0x8] sm:$0xff]  ;;  %v1407_v53 = vld [vmem:[%s1726_s5 + $0xc4] ss:$8 sps:$4 sm:$0xff]   ;;  %p1274_p13 = scmp.ne.s32.totalorder %s1473_s14, 7 }
  0x5f   : > { %v1207_v48 = vcombine.high %v558_v47, %v558_v47  ;;  %v1209_v52 = vcombine.high %v559_v49, %v559_v49  ;;  %v1409_v54 = vld [vmem:[%s1726_s5 + $0x1c4] ss:$8 sps:$4 sm:$0xff]   ;;  %v1411_v55 = vld [vmem:[%s1726_s5 + $0xc0] ss:$8 sps:$4 sm:$0xff]   ;;  %v1413_v57 = vld [vmem:[%s1726_s5 + $0xd4] ss:$8 sps:$4 sm:$0xff]   ;;  %v1206_v5 = vcombine.low %v558_v47, %v558_v47  ;;  %v1208_v6 = vcombine.low %v559_v49, %v559_v49 }
  0x60   : > { %967 = vmatpush1.bf16.msra.mxu0 %v1363_v19  ;;  %v1412_v56 = vld [vmem:[%s1726_s5 + $0x1c0] ss:$8 sps:$4 sm:$0xff]   ;;  %v1415_v58 = vld [vmem:[%s1726_s5 + $0x1d4] ss:$8 sps:$4 sm:$0xff]   ;;  %v1417_v59 = vld [vmem:[%s1726_s5 + $0xd0] ss:$8 sps:$4 sm:$0xff]  }
  0x61   : > { %1008 = vmatpush1.bf16.msra.mxu1 %v1364_v20  ;;  %968 = vmatprep.subr.bf16.mxu0 %v1365_v21  ;;  %v1418_v60 = vld [vmem:[%s1726_s5 + $0x1d0] ss:$8 sps:$4 sm:$0xff]   ;;  %v1419_v61 = vld [vmem:[%s1726_s5 + $0xe4] ss:$8 sps:$4 sm:$0xff]   ;;  %v1423_v63 = vld [vmem:[%s1726_s5 + $0xe0] ss:$8 sps:$4 sm:$0xff]   ;;  %v1052_v21 = vlaneseq (!%p1274_p13) }
  0x62   : > { %1009 = vmatprep.subr.bf16.mxu1 %v1367_v22  ;;  %990 = vmatprep.mubr.bf16.mxu0 %v1207_v48  ;;  %v1421_v62 = vld [vmem:[%s1726_s5 + $0x1e4] ss:$8 sps:$4 sm:$0xff]   ;;  %v1424_v0 = vld [vmem:[%s1726_s5 + $0x1e0] ss:$8 sps:$4 sm:$0xff]   ;;  %v1425_v1 = vld [vmem:[%s1726_s5 + $0xf4] ss:$8 sps:$4 sm:$0xff]  }
  0x63   : > { %1031 = vmatprep.mubr.bf16.mxu1 %v1209_v52  ;;  %v1427_v2 = vld [vmem:[%s1726_s5 + $0x1f4] ss:$8 sps:$4 sm:$0xff]   ;;  %v1429_v3 = vld [vmem:[%s1726_s5 + $0xf0] ss:$8 sps:$4 sm:$0xff]   ;;  %v1053_v22 = vshrl.u32 (!%p1274_p13), %v1052_v21, 7 }
  0x64   : > { %969 = vmatpush1.bf16.msra.mxu0 %v1369_v23  ;;  %v1430_v4 = vld [vmem:[%s1726_s5 + $0x1f0] ss:$8 sps:$4 sm:$0xff]  }
  0x65   : > { %1010 = vmatpush1.bf16.msra.mxu1 %v1370_v24  ;;  %970 = vmatprep.subr.bf16.mxu0 %v1371_v25  ;;  %v556_v8 = vld [vmem:[#allocation2] sm:$0xff]  ;;  %v557_v12 = vld [vmem:[#allocation2 + $0x8] sm:$0xff]  ;;  %v1054_v24 = vsub.s32 (!%p1274_p13), 0, %v1053_v22  ;;  %v1058_v25 = vsub.s32 (!%p1274_p13), 1, %v1053_v22 }
  0x66   : > { %1011 = vmatprep.subr.bf16.mxu1 %v1373_v26  ;;  %v1050_v23 = vld [vmem:[%s538_s12] sm:$0x3] (!%p1274_p13) }
  0x68   : > { %971 = vmatpush1.bf16.msra.mxu0 %v1375_v27 }
  0x69   : > { %1012 = vmatpush1.bf16.msra.mxu1 %v1376_v28  ;;  %972 = vmatprep.subr.bf16.mxu0 %v1377_v29  ;;  %v1055_v28 = vrot.slane (!%p1274_p13), %v1050_v23, %v1054_v24  ;;  %v1059_v29 = vrot.slane (!%p1274_p13), %v1050_v23, %v1058_v25 }
  0x6a   : > { %1013 = vmatprep.subr.bf16.mxu1 %v1379_v30 }
  0x6c   : > { %973 = vmatpush1.bf16.msra.mxu0 %v1381_v31 }
  0x6d   : > { %1014 = vmatpush1.bf16.msra.mxu1 %v1382_v32  ;;  %974 = vmatprep.subr.bf16.mxu0 %v1383_v33 }
  0x6e   : > { %1015 = vmatprep.subr.bf16.mxu1 %v1385_v34 }
  0x70   : > { %975 = vmatpush1.bf16.msra.mxu0 %v1387_v35 }
  0x71   : > { %1016 = vmatpush1.bf16.msra.mxu1 %v1388_v36  ;;  %976 = vmatprep.subr.bf16.mxu0 %v1389_v37 }
  0x72   : > { %1017 = vmatprep.subr.bf16.mxu1 %v1391_v38 }
  0x74   : > { %977 = vmatpush1.bf16.msra.mxu0 %v1393_v39 }
  0x75   : > { %1018 = vmatpush1.bf16.msra.mxu1 %v1394_v40  ;;  %978 = vmatprep.subr.bf16.mxu0 %v1395_v41 }
  0x76   : > { %1019 = vmatprep.subr.bf16.mxu1 %v1397_v42 }
  0x78   : > { %979 = vmatpush1.bf16.msra.mxu0 %v1399_v43 }
  0x79   : > { %1020 = vmatpush1.bf16.msra.mxu1 %v1400_v44  ;;  %980 = vmatprep.subr.bf16.mxu0 %v1401_v45 }
  0x7a   : > { %1021 = vmatprep.subr.bf16.mxu1 %v1403_v46 }
  0x7c   : > { %981 = vmatpush1.bf16.msra.mxu0 %v1405_v50 }
  0x7d   : > { %1022 = vmatpush1.bf16.msra.mxu1 %v1406_v51  ;;  %982 = vmatprep.subr.bf16.mxu0 %v1407_v53 }
  0x7e   : > { %1023 = vmatprep.subr.bf16.mxu1 %v1409_v54 }
  0x80   : > { %983 = vmatpush1.bf16.msra.mxu0 %v1411_v55 }
  0x81   : > { %1024 = vmatpush1.bf16.msra.mxu1 %v1412_v56  ;;  %984 = vmatprep.subr.bf16.mxu0 %v1413_v57 }
  0x82   : > { %1025 = vmatprep.subr.bf16.mxu1 %v1415_v58 }
  0x84   : > { %985 = vmatpush1.bf16.msra.mxu0 %v1417_v59 }
  0x85   : > { %1026 = vmatpush1.bf16.msra.mxu1 %v1418_v60  ;;  %986 = vmatprep.subr.bf16.mxu0 %v1419_v61 }
  0x86   : > { %1027 = vmatprep.subr.bf16.mxu1 %v1421_v62 }
  0x88   : > { %987 = vmatpush1.bf16.msra.mxu0 %v1423_v63 }
  0x89   : > { %1028 = vmatpush1.bf16.msra.mxu1 %v1424_v0  ;;  %988 = vmatprep.subr.bf16.mxu0 %v1425_v1 }
  0x8a   : > { %1029 = vmatprep.subr.bf16.mxu1 %v1427_v2 }
  0x8c   : > { %989 = vmatpush1.bf16.msra.mxu0 %v1429_v3 }
  0x8d   : > { %1030 = vmatpush1.bf16.msra.mxu1 %v1430_v4 }
  0x8f   : > { %991 = vmatmul.mubr.bf16.vlgmr.msra.gmra.mrb[0].mxu0 %v1206_v5 }
  0x90   : > { %1032 = vmatmul.mubr.bf16.vlgmr.msra.gmra.mrb[0].mxu1 %v1208_v6 }
 0x162   : > { %v992_v7 = vpop.f32.mrb[0].mxu0 }
 0x163   : > { %v1033_v9 = vpop.f32.mrb[0].mxu1  ;;  %v994_v11 = vpop.f32.mrb[1].mxu0  ;;  %1047 = sbr.rel (%p1274_p13) target bundleno = 372 (0x174), region = 78 }
 0x164   : > { %v1034_v10 = vadd.f32 %v1033_v9, %v992_v7  ;;  %v1035_v13 = vpop.f32.mrb[1].mxu1  ;;  %v996_v15 = vpop.f32.mrb[2].mxu0 }
 0x165   : > { %v1036_v14 = vadd.f32 %v1035_v13, %v994_v11  ;;  %v1037_v16 = vpop.f32.mrb[2].mxu1  ;;  %v997_v18 = vpop.f32.mrb[3].mxu0 }
 0x166   : > { %v1040_v17 = vadd.f32 %v1034_v10, %v556_v8  ;;  %v1038_v19 = vpop.f32.mrb[3].mxu1 }
 0x167   : > { %v1041_v20 = vadd.f32 %v1036_v14, %v557_v12 }
 0x168   : > { %1042 = vst [vmem:[#allocation2] sm:$0xff] %v1040_v17 }
 0x169   : > { %1043 = vst [vmem:[#allocation2 + $0x8] sm:$0xff] %v1041_v20 }
 0x16f   : > { %v1048_v26 = vld [vmem:[#allocation2] sm:$0xff] }
 0x170   : > { %v1049_v27 = vld [vmem:[#allocation2 + $0x8] sm:$0xff]  ;;  %v1062_v30 = vadd.f32 %v1055_v28, %v1048_v26 }
 0x171   : > { %v1063_v31 = vadd.f32 %v1059_v29, %v1049_v27 }
 0x172   : > { %1064 = vst [vmem:[%s1724_s15] sm:$0xff] %v1062_v30 }
 0x173   : > { %1065 = vst [vmem:[%s1724_s15 + $0x8] sm:$0xff] %v1063_v31 }
 0x174 PF: > { %s13_s18 = sadd.s32 1, %s1489_s18   ;;  %s1828_s12 = smov %s1469_s13 }
 0x175   : > { %p10_p0 = scmp.ge.s32.totalorder %s13_s18, 18   ;;  %s1829_s13 = smov %s1563_s25 }
 0x176   : > { %s1830_s14 = smov %s1481_s16  ;;  %s1831_s15 = smov %s1485_s17 }
 0x177   : > { %s1832_s16 = smov %s1835_s19  ;;  %s1833_s17 = smov %s1839_s20 }
 0x178   :  { %12 = sbr.rel (!%p10_p0) target bundleno = 4 (0x4), region = 119 }

// kernel: discriminator_forward.14
= control target key start
LH: loop header
LB: loop body
LE: loop exit
PB: predicated region body
PF: predicated region fallthrough
CT: control target
= control target key end

     0   :  { %s368_s6 = smov 0   ;;  %s370_s7 = smov 0   ;;  %s423_s0 = inlined_call_operand.vmem [shape: f32[2,4,512], index: 0, kind: input, shape index: {}]   ;;  %s424_s1 = inlined_call_operand.vmem [shape: bf16[2,4,512], index: 1, kind: output, shape index: {}]  }
   0x1   :  { %s372_s8 = smov 0   ;;  %s374_s9 = smov 0  }
   0x2   :  { %s376_s10 = smov 0  }
   0x3 LB: > { %s20_s11 = sadd.s32 1, %s348_s8  ;;  %s23_s12 = sadd.s32 1, %s352_s9  ;;  %s356_s10 = sphi %s376_s10, %s11_s10   ;;  %s352_s9 = sphi %s374_s9, %s428_s9   ;;  %s348_s8 = sphi %s372_s8, %s427_s8   ;;  %s344_s7 = sphi %s370_s7, %s426_s7   ;;  %s340_s6 = sphi %s368_s6, %s425_s6  }
   0x4   : > { %p21_p0 = scmp.ge.s32.totalorder %s20_s11, 4  ;;  %p269_p1 = scmp.ge.s32.totalorder %s356_s10, 1 }
   0x5   : > { %p106_p2 = scmp.lt.s32.totalorder %s356_s10, 9 }
   0x6   : > { %s430_s11 = smov (%p21_p0, %s20_s11), 0  ;;  %s432_s12 = smov (!%p21_p0, %s23_s12), %s352_s9 }
   0x7   : > { %p107_p3 = pnand %p269_p1, %p106_p2  ;;  %p25_p4 = scmp.ge.s32.totalorder %s432_s12, 2 }
   0x8   : > { %p132_p5 = scmp.lt.s32.totalorder (!%p107_p3), %s344_s7, 1  ;;  %p134_p6 = scmp.lt.s32.totalorder (!%p107_p3), %s340_s6, 3  ;;  %vm149_vm0 = vcmask (!%p107_p3), 1043456  }
   0x9   : > { %s434_s12 = smov (%p25_p4, %s432_s12), 0  ;;  %110 = sbr.rel (%p107_p3) target bundleno = 62 (0x3e), region = 24 }
  0x10   : > { %s436_s7 = smov (!%p132_p5, %s344_s7), 1  ;;  %s438_s6 = smov (!%p134_p6, %s340_s6), 3 }
  0x11   : > { %s270_s13 = sshll.u32 %s436_s7, 2 }
  0x12   : > { %s398_s14 = sadd.s32 %s270_s13, %s438_s6 }
  0x13   : > { %s271_s15 = sshll.u32 %s398_s14, 2  ;;  %s273_s19 = sshll.u32 %s398_s14, 1 }
  0x14   : > { %s139_s18 = scalar_lea.vmem %s423_s0, %s271_s15  ;;  %s147_s22 = scalar_lea.vmem %s424_s1, %s273_s19 }
  0x15   : > { %v148_v0 = vld [vmem:[%s139_s18] sm:$0xf] }
  0x16   : > { %v150_v1 = vsel %vm149_vm0, %v148_v0, 0.0  ;;  %v159_v2 = vmul.f32 %v148_v0, %v148_v0 }
  0x17   : > { %v151_v3 = vrot.slane %v150_v1, 4 }
  0x18   : > { %v160_v4 = vsel %vm149_vm0, %v159_v2, 0.0 }
  0x19   : > { %v152_v5 = vadd.f32 %v151_v3, %v150_v1  ;;  %v161_v6 = vrot.slane %v160_v4, 4 }
  0x1b   : > { %v153_v7 = vrot.slane %v152_v5, 2  ;;  %v162_v8 = vadd.f32 %v161_v6, %v160_v4 }
  0x1d   : > { %v154_v9 = vadd.f32 %v153_v7, %v152_v5  ;;  %v163_v10 = vrot.slane %v162_v8, 2 }
  0x1f   : > { %v155_v11 = vrot.slane %v154_v9, 1  ;;  %v164_v12 = vadd.f32 %v163_v10, %v162_v8 }
  0x21   : > { %v156_v13 = vadd.f32 %v155_v11, %v154_v9  ;;  %v165_v14 = vrot.slane %v164_v12, 1 }
  0x23   : > { %v158_v15 = vmul.f32 0.25, %v156_v13  ;;  %v166_v16 = vadd.f32 %v165_v14, %v164_v12 }
  0x25   : > { %v167_v17 = vmul.f32 0.25, %v166_v16  ;;  %v168_v18 = vmul.f32 %v158_v15, %v158_v15  ;;  %v170_v21 = vsub.f32 %v148_v0, %v158_v15 }
  0x27   : > { %v169_v19 = vsub.f32 %v167_v17, %v168_v18 }
  0x29   : > { %v171_v20 = vadd.f32 1e-05, %v169_v19 }
  0x2b   : > { %316 = vrsqrt.f32 %v171_v20 }
  0x35   : > { %v317_v22 = vpop.eup %316 }
  0x36   : > { %v173_v23 = vmul.f32 %v317_v22, %v170_v21 }
  0x38   : > { %vm174_vm1 = vcmp.ge.f32.partialorder %v173_v23, 0.0  ;;  %v175_v24 = vmul.f32 0.2, %v173_v23 }
  0x3a   : > { %v176_v25 = vsel %vm174_vm1, %v173_v23, %v175_v24 }
  0x3b   : > { %v177_v26 = vpack.c.bf16 %v176_v25, %v176_v25 }
  0x3d   : > { %178 = vst [vmem:[%s147_s22] sm:$0x3] %v177_v26 }
  0x3e PF: > { %s11_s10 = sadd.s32 1, %s356_s10   ;;  %s425_s6 = smov %s348_s8 }
  0x3f   : > { %p8_p7 = scmp.ge.s32.totalorder %s11_s10, 10   ;;  %s426_s7 = smov %s352_s9 }
  0x40   : > { %s427_s8 = smov %s430_s11  ;;  %s428_s9 = smov %s434_s12 }
  0x41   :  { %10 = sbr.rel (!%p8_p7) target bundleno = 3 (0x3), region = 54 }

// kernel: discriminator_forward.15
= control target key start
LH: loop header
LB: loop body
LE: loop exit
PB: predicated region body
PF: predicated region fallthrough
CT: control target
= control target key end

     0   :  { %s940_s12 = smov 0   ;;  %s942_s13 = smov 0   ;;  %s1023_s0 = inlined_call_operand.vmem [shape: bf16[8,8192], index: 0, kind: input, shape index: {}]   ;;  %s1024_s1 = inlined_call_operand.vmem [shape: bf16[8192,128], index: 1, kind: input, shape index: {}]   ;;  %s1025_s2 = inlined_call_operand.vmem [shape: f32[1,128], index: 2, kind: input, shape index: {}]   ;;  %s1026_s3 = inlined_call_operand.vmem [shape: f32[8,128], index: 3, kind: output, shape index: {}]  }
   0x1   :  { %s944_s14 = smov 0  }
   0x2 LB: > { %s25_s15 = sadd.s32 1, %s913_s13  ;;  %p743_p0 = scmp.ge.s32.totalorder %s917_s14, 1  ;;  %s917_s14 = sphi %s944_s14, %s13_s14   ;;  %s913_s13 = sphi %s942_s13, %s1028_s13   ;;  %s909_s12 = sphi %s940_s12, %s1027_s12  }
   0x3   : > { %p26_p1 = scmp.ge.s32.totalorder %s25_s15, 16  ;;  %p189_p2 = scmp.lt.s32.totalorder %s917_s14, 17 }
   0x5   : > { %s1030_s15 = smov (%p26_p1, %s25_s15), 0  ;;  %p190_p3 = pnand %p743_p0, %p189_p2 }
   0x6   : > { %s744_s16 = sshll.u32 (!%p190_p3), %s909_s12, 2  ;;  %s746_s17 = sshll.u32 (!%p190_p3), %s909_s12, 6 }
   0x7   : > { %193 = sbr.rel (%p190_p3) target bundleno = 289 (0x121), region = 32  ;;  %p233_p4 = scmp.lt.s32.totalorder (!%p190_p3), %s744_s16, 63 }
   0x8   : > { %p241_p5 = scmp.lt.s32.totalorder (!%p190_p3), %s746_s17, 1023  ;;  %p748_p6 = scmp.ne.s32.totalorder (!%p190_p3), %s909_s12, 0 }
   0xe   : > { %s1032_s16 = smov (!%p233_p4, %s744_s16), 63  ;;  %s1034_s17 = smov (!%p241_p5, %s746_s17), 1023 }
   0xf   : > { %s745_s18 = sshll.u32 %s1032_s16, 2  ;;  %s747_s22 = sshll.u32 %s1034_s17, 2  ;;  %v919_v0 = vmov (!%p748_p6), 0.0  }
  0x10   : > { %s965_s21 = scalar_lea.vmem %s1023_s0, %s745_s18  ;;  %s970_s25 = scalar_lea.vmem %s1024_s1, %s747_s22  ;;  %264 = vst [vmem:[#allocation2] sm:$0xff] (!%p748_p6), %v919_v0 }
  0x11   : > { %263 = sbr.rel (%p748_p6) target bundleno = 24 (0x18), region = 36 }
  0x18 PF: > { %v859_v1 = vld [vmem:[%s970_s25 + $0x40] sm:$0xff]   ;;  %v863_v5 = vld [vmem:[%s970_s25 + $0x48] sm:$0xff]   ;;  %v867_v9 = vld [vmem:[%s970_s25 + $0x50] sm:$0xff]   ;;  %p785_p7 = scmp.ne.s32.totalorder %s909_s12, 15 }
  0x19   : > { %v860_v2 = vld [vmem:[%s970_s25 + $0xc0] sm:$0xff]   ;;  %790 = vmatprep.subr.bf16.mxu0 %v859_v1  ;;  %v864_v6 = vld [vmem:[%s970_s25 + $0xc8] sm:$0xff]   ;;  %v868_v10 = vld [vmem:[%s970_s25 + $0xd0] sm:$0xff]  }
  0x1a   : > { %v861_v3 = vld [vmem:[%s970_s25] sm:$0xff]   ;;  %812 = vmatprep.subr.bf16.mxu1 %v860_v2  ;;  %v865_v7 = vld [vmem:[%s970_s25 + $0x8] sm:$0xff]   ;;  %v869_v11 = vld [vmem:[%s970_s25 + $0x10] sm:$0xff]  }
  0x1b   : > { %v862_v4 = vld [vmem:[%s970_s25 + $0x80] sm:$0xff]   ;;  %791 = vmatpush3.bf16.msra.mxu0 %v861_v3  ;;  %v866_v8 = vld [vmem:[%s970_s25 + $0x88] sm:$0xff]   ;;  %v870_v12 = vld [vmem:[%s970_s25 + $0x90] sm:$0xff]  }
  0x1c   : > { %813 = vmatpush3.bf16.msra.mxu1 %v862_v4  ;;  %792 = vmatprep.subr.bf16.mxu0 %v863_v5  ;;  %v871_v13 = vld [vmem:[%s970_s25 + $0x58] sm:$0xff]   ;;  %v875_v17 = vld [vmem:[%s970_s25 + $0x60] sm:$0xff]   ;;  %v879_v21 = vld [vmem:[%s970_s25 + $0x68] sm:$0xff]  }
  0x1d   : > { %814 = vmatprep.subr.bf16.mxu1 %v864_v6  ;;  %v872_v14 = vld [vmem:[%s970_s25 + $0xd8] sm:$0xff]   ;;  %v876_v18 = vld [vmem:[%s970_s25 + $0xe0] sm:$0xff]   ;;  %v880_v22 = vld [vmem:[%s970_s25 + $0xe8] sm:$0xff]  }
  0x1e   : > { %v873_v15 = vld [vmem:[%s970_s25 + $0x18] sm:$0xff]   ;;  %v877_v19 = vld [vmem:[%s970_s25 + $0x20] sm:$0xff]   ;;  %v881_v23 = vld [vmem:[%s970_s25 + $0x28] sm:$0xff]  }
  0x1f   : > { %793 = vmatpush3.bf16.msra.mxu0 %v865_v7  ;;  %v874_v16 = vld [vmem:[%s970_s25 + $0x98] sm:$0xff]   ;;  %v878_v20 = vld [vmem:[%s970_s25 + $0xa0] sm:$0xff]   ;;  %v882_v24 = vld [vmem:[%s970_s25 + $0xa8] sm:$0xff]  }
  0x20   : > { %815 = vmatpush3.bf16.msra.mxu1 %v866_v8  ;;  %794 = vmatprep.subr.bf16.mxu0 %v867_v9  ;;  %v883_v25 = vld [vmem:[%s970_s25 + $0x70] sm:$0xff]   ;;  %v887_v29 = vld [vmem:[%s970_s25 + $0x78] sm:$0xff]   ;;  %v266_v33 = vld [vmem:[%s965_s21] sm:$0xff] }
  0x21   : > { %816 = vmatprep.subr.bf16.mxu1 %v868_v10  ;;  %v884_v26 = vld [vmem:[%s970_s25 + $0xf0] sm:$0xff]   ;;  %v888_v30 = vld [vmem:[%s970_s25 + $0xf8] sm:$0xff]   ;;  %v267_v34 = vld [vmem:[%s965_s21 + $0x8] sm:$0xff]  ;;  %v749_v35 = vcombine.low %v266_v33, %v266_v33  ;;  %v750_v36 = vcombine.high %v266_v33, %v266_v33 }
  0x22   : > { %v885_v27 = vld [vmem:[%s970_s25 + $0x30] sm:$0xff]   ;;  %v889_v31 = vld [vmem:[%s970_s25 + $0x38] sm:$0xff]   ;;  %v751_v37 = vcombine.low %v267_v34, %v267_v34  ;;  %v752_v38 = vcombine.high %v267_v34, %v267_v34  ;;  %v265_v47 = vld [vmem:[#allocation2] sm:$0xff] }
  0x23   : > { %795 = vmatpush3.bf16.msra.mxu0 %v869_v11  ;;  %v886_v28 = vld [vmem:[%s970_s25 + $0xb0] sm:$0xff]   ;;  %v890_v32 = vld [vmem:[%s970_s25 + $0xb8] sm:$0xff]   ;;  %570 = vmatprep.mubr.bf16.mxu0 %v750_v36  ;;  %v786_v53 = vld [vmem:[%s1025_s2] ss:$0 sm:$0xff] (!%p785_p7) }
  0x24   : > { %817 = vmatpush3.bf16.msra.mxu1 %v870_v12  ;;  %796 = vmatprep.subr.bf16.mxu0 %v871_v13 }
  0x25   : > { %818 = vmatprep.subr.bf16.mxu1 %v872_v14  ;;  %610 = vmatprep.mubr.bf16.mxu1 %v752_v38 }
  0x27   : > { %797 = vmatpush3.bf16.msra.mxu0 %v873_v15 }
  0x28   : > { %819 = vmatpush3.bf16.msra.mxu1 %v874_v16  ;;  %798 = vmatprep.subr.bf16.mxu0 %v875_v17 }
  0x29   : > { %820 = vmatprep.subr.bf16.mxu1 %v876_v18 }
  0x2b   : > { %799 = vmatpush3.bf16.msra.mxu0 %v877_v19 }
  0x2c   : > { %821 = vmatpush3.bf16.msra.mxu1 %v878_v20  ;;  %800 = vmatprep.subr.bf16.mxu0 %v879_v21 }
  0x2d   : > { %822 = vmatprep.subr.bf16.mxu1 %v880_v22 }
  0x2f   : > { %801 = vmatpush3.bf16.msra.mxu0 %v881_v23 }
  0x30   : > { %823 = vmatpush3.bf16.msra.mxu1 %v882_v24  ;;  %802 = vmatprep.subr.bf16.mxu0 %v883_v25 }
  0x31   : > { %824 = vmatprep.subr.bf16.mxu1 %v884_v26 }
  0x33   : > { %803 = vmatpush3.bf16.msra.mxu0 %v885_v27 }
  0x34   : > { %825 = vmatpush3.bf16.msra.mxu1 %v886_v28  ;;  %804 = vmatprep.subr.bf16.mxu0 %v887_v29 }
  0x35   : > { %826 = vmatprep.subr.bf16.mxu1 %v888_v30 }
  0x37   : > { %805 = vmatpush3.bf16.msra.mxu0 %v889_v31 }
  0x38   : > { %827 = vmatpush3.bf16.msra.mxu1 %v890_v32 }
  0x3a   : > { %571 = vmatmul.mubr.bf16.vlgmr.msra.gmra.mrb[0].mxu0 %v749_v35 }
  0x3b   : > { %611 = vmatmul.mubr.bf16.vlgmr.msra.gmra.mrb[0].mxu1 %v751_v37 }
 0x10d   : > { %v806_v39 = vpop.f32.mrb[0].mxu0 }
 0x10e   : > { %v828_v40 = vpop.f32.mrb[0].mxu1  ;;  %v807_v41 = vpop.f32.mrb[1].mxu0 }
 0x10f   : > { %v829_v42 = vpop.f32.mrb[1].mxu1  ;;  %v808_v43 = vadd.f32 %v807_v41, %v806_v39  ;;  %v809_v45 = vpop.f32.mrb[2].mxu0 }
 0x110   : > { %v830_v44 = vadd.f32 %v829_v42, %v828_v40  ;;  %v831_v46 = vpop.f32.mrb[2].mxu1  ;;  %v810_v48 = vpop.f32.mrb[3].mxu0  ;;  %623 = sbr.rel (%p785_p7) target bundleno = 289 (0x121), region = 40 }
 0x111   : > { %v832_v49 = vpop.f32.mrb[3].mxu1 }
 0x112   : > { %v613_v50 = vadd.f32 %v830_v44, %v808_v43 }
 0x114   : > { %v618_v51 = vadd.f32 %v613_v50, %v265_v47 }
 0x116   : > { %619 = vst [vmem:[#allocation2] sm:$0xff] %v618_v51 }
 0x11d   : > { %v624_v52 = vld [vmem:[#allocation2] sm:$0xff] }
 0x11e   : > { %v632_v54 = vadd.f32 %v786_v53, %v624_v52 }
 0x120   : > { %633 = vst [vmem:[%s1026_s3] sm:$0xff] %v632_v54 }
 0x121 PF: > { %s13_s14 = sadd.s32 1, %s917_s14   ;;  %s1027_s12 = smov %s913_s13 }
 0x122   : > { %p10_p8 = scmp.ge.s32.totalorder %s13_s14, 18   ;;  %s1028_s13 = smov %s1030_s15 }
 0x124   :  { %12 = sbr.rel (!%p10_p8) target bundleno = 2 (0x2), region = 76 }

</bundles_post_ra>
